<compile_context>
chip_gen: v5e
topology: v5e:2x2
jax: 0.10.0
libtpu: 0.0.40
codegen_flags: <defaults>
</compile_context>

<pallas_src>
import functools

import numpy as np
import jax
import jax.numpy as jnp
from jax import lax
from jax.experimental import pallas as pl
from jax.experimental.pallas import tpu as pltpu


# ----------------------------------------------------------------------------
# host-side constant builders
# ----------------------------------------------------------------------------
def _upsample_indices(n_in):
    """PyTorch Upsample(scale=2, mode=bilinear, align_corners=False) taps."""
    n_out = 2 * n_in
    i = np.arange(n_out, dtype=np.float64)
    src = np.maximum(0.5 * (i + 0.5) - 0.5, 0.0)
    i0 = np.floor(src).astype(np.int64)
    frac = (src - i0).astype(np.float32)
    i1 = np.minimum(i0 + 1, n_in - 1).astype(np.int64)
    i0 = np.minimum(i0, n_in - 1).astype(np.int64)
    return i0, i1, frac


def _upsample_matrix(n_in):
    """(2*n_in, n_in) bilinear 2x interpolation matrix (rows sum to 1)."""
    i0, i1, f = _upsample_indices(n_in)
    n_out = 2 * n_in
    u = np.zeros((n_out, n_in), np.float32)
    r = np.arange(n_out)
    u[r, i0] += (1.0 - f)
    u[r, i1] += f
    return u


def _upsample2x_flat_matrix_t(h, w):
    """(h*w, 4*h*w) matrix M^T so that up_flat = x_flat @ M^T (channel-major)."""
    m = np.kron(_upsample_matrix(h), _upsample_matrix(w))     # (4hw, hw)
    return np.ascontiguousarray(m.T)


_TAPS = tuple((dh, dw) for dh in (-1, 0, 1) for dw in (-1, 0, 1))


def _tap_masks(h, w):
    """(9, 1, h*w) 0/1 source-validity mask per 3x3 tap for 'same' conv."""
    hh, ww = np.meshgrid(np.arange(h), np.arange(w), indexing="ij")
    hh, ww = hh.reshape(-1), ww.reshape(-1)
    m = np.zeros((9, 1, h * w), np.float32)
    for t, (dh, dw) in enumerate(_TAPS):
        m[t, 0] = ((hh + dh >= 0) & (hh + dh < h)
                   & (ww + dw >= 0) & (ww + dw < w)).astype(np.float32)
    return m


# ----------------------------------------------------------------------------
# in-kernel building blocks
# ----------------------------------------------------------------------------
def _conv3x3_gn_relu(xpad_ref, stack_ref, cin, w_flat_ref, bias_ref, mask_ref, *,
                     lane_off, p, w_spatial, groups, eps):
    """3x3 'same' conv as ONE im2col matmul -> GroupNorm(affine=False) -> ReLU.

    xpad_ref  : (C, Ppad) bf16 scratch; data in lanes [lane_off, lane_off+p),
                zero halo strips of width (w_spatial+1) on both sides.
    stack_ref : (>= 9*cin, p) bf16 scratch; im2col stack (taps-major rows).
    w_flat_ref: (Cout, 9*cin) bf16 weights matching the stack row order.
    Returns (Cout, p) float32.
    """
    cout = w_flat_ref.shape[0]
    assert w_flat_ref.shape[1] == 9 * cin

    # --- one-time im2col stack build (boundary mask folded in here)
    for t, (dh, dw) in enumerate(_TAPS):
        d = dh * w_spatial + dw
        src = xpad_ref[:cin, pl.ds(lane_off + d, p)]          # (cin, p)
        if not (dh == 0 and dw == 0):
            src = src * mask_ref[t]                           # zero invalid taps
        stack_ref[t * cin:(t + 1) * cin, :] = src

    # --- single deep-K MXU matmul: (Cout, 9*cin) @ (9*cin, p), f32 accumulate
    acc = jnp.dot(w_flat_ref[...], stack_ref[:9 * cin, :],
                  preferred_element_type=jnp.float32)

    gs = cout // groups
    if bias_ref is not None:          # only needed when a group spans >1 channel
        acc = acc + bias_ref[...]

    # GroupNorm (affine=False), two-pass stats in f32.
    ch_sum = jnp.sum(acc, axis=1, keepdims=True)              # (Cout, 1)
    if gs > 1:
        mean = jnp.broadcast_to(
            jnp.mean(ch_sum.reshape(groups, gs), axis=1, keepdims=True),
            (groups, gs)).reshape(cout, 1) / p
    else:
        mean = ch_sum / p
    cen = acc - mean
    ch_ss = jnp.sum(cen * cen, axis=1, keepdims=True)
    if gs > 1:
        var = jnp.broadcast_to(
            jnp.mean(ch_ss.reshape(groups, gs), axis=1, keepdims=True),
            (groups, gs)).reshape(cout, 1) / p
    else:
        var = ch_ss / p
    return jnp.maximum(cen * lax.rsqrt(var + eps), 0.0)


def _conv_up_kernel(x1_ref, x2_ref, up_ref, wup_ref, bup_ref,
                    w1_ref, b1_ref, w2_ref, b2_ref, mask_ref,
                    o_ref, xpad_ref, stack_ref, *,
                    w_spatial, lane_off, groups, eps, add_conv_bias):
    cdt = xpad_ref.dtype
    ccat = xpad_ref.shape[0]
    cout, p2 = o_ref.shape[1], o_ref.shape[2]
    halo = w_spatial + 1                     # max |shift| the 3x3 taps read

    # ---- 1x1 conv (in_ch -> out_ch) at LOW resolution, then exact bilinear
    # 2x upsample as one f32 matmul against the precomputed kron(U_h,U_w)^T.
    x1 = x1_ref[0]                                                 # (Cin, P1) bf16
    y_lo = jnp.dot(wup_ref[...], x1, preferred_element_type=jnp.float32)
    y_lo = y_lo + bup_ref[...]                                     # (Cout, P1) f32
    x1_up = jnp.dot(y_lo, up_ref[...],
                    preferred_element_type=jnp.float32)            # (Cout, P2) f32

    # ---- zero only the halo strips the shifted slices actually read, then
    # assemble the channel concat [up(x1), crop(x2)] directly in VMEM.
    xpad_ref[:, lane_off - halo:lane_off] = jnp.zeros((ccat, halo), cdt)
    xpad_ref[:, lane_off + p2:lane_off + p2 + halo] = jnp.zeros((ccat, halo), cdt)
    xpad_ref[:cout, pl.ds(lane_off, p2)] = x1_up.astype(cdt)
    xpad_ref[cout:, pl.ds(lane_off, p2)] = x2_ref[0]

    # ---- Double_conv: (3x3 conv -> GroupNorm(affine=False) -> ReLU) x 2
    b1 = b1_ref if add_conv_bias else None
    b2 = b2_ref if add_conv_bias else None
    h = _conv3x3_gn_relu(xpad_ref, stack_ref, ccat, w1_ref, b1, mask_ref,
                         lane_off=lane_off, p=p2, w_spatial=w_spatial,
                         groups=groups, eps=eps)
    xpad_ref[:cout, pl.ds(lane_off, p2)] = h.astype(cdt)
    h = _conv3x3_gn_relu(xpad_ref, stack_ref, cout, w2_ref, b2, mask_ref,
                         lane_off=lane_off, p=p2, w_spatial=w_spatial,
                         groups=groups, eps=eps)
    o_ref[0] = h.astype(o_ref.dtype)


# ----------------------------------------------------------------------------
# forward wrapper
# ----------------------------------------------------------------------------
def conv_up_forward(params, x1_nchw, x2_nchw, *, groups=32, eps=1e-5,
                    compute_dtype=jnp.bfloat16, out_dtype=jnp.bfloat16):
    """Forward pass of Conv_up.  Inputs/outputs are NCHW (PyTorch layout)."""
    n, cin, h1, w1sp = x1_nchw.shape
    cout = params["w_up"].shape[0]
    c2 = x2_nchw.shape[1]
    assert cin == params["w_up"].shape[1]
    assert cout + c2 == params["w1"].shape[1], "concat channels must match w1"
    assert cout % groups == 0, "GroupNorm requires num_groups | out_ch"
    h2, w2 = 2 * h1, 2 * w1sp
    p1, p2 = h1 * w1sp, h2 * w2
    ccat = cout + c2
    cdt = compute_dtype

    # center-crop the skip connection (extract_img) and flatten spatial.
    d1, d2 = x2_nchw.shape[2], x2_nchw.shape[3]
    r0, c0 = (d1 - h2) // 2, (d2 - w2) // 2
    x2c = x2_nchw[:, :, r0:r0 + h2, c0:c0 + w2].reshape(n, c2, p2).astype(cdt)
    x1f = x1_nchw.reshape(n, cin, p1).astype(cdt)

    # host-precomputed constants (exact bilinear matrix in f32, 3x3 masks)
    up_t = jnp.asarray(_upsample2x_flat_matrix_t(h1, w1sp), jnp.float32)  # (P1,P2)
    masks = jnp.asarray(_tap_masks(h2, w2), dtype=cdt)                    # (9,1,P2)

    # weight packing: im2col layout, taps-major rows matching the VMEM stack.
    def im2col_w(w):  # (Cout, Ci, 3, 3) -> (Cout, 9*Ci) with col = t*Ci + ci
        co, ci = w.shape[0], w.shape[1]
        return jnp.transpose(w, (0, 2, 3, 1)).reshape(co, 9 * ci).astype(cdt)

    w_up = params["w_up"].astype(cdt)                                  # (Cout, Cin)
    b_up = params["b_up"].reshape(cout, 1).astype(jnp.float32)
    w1f = im2col_w(params["w1"])                                       # (Cout, 9*Ccat)
    w2f = im2col_w(params["w2"])                                       # (Cout, 9*Cout)
    b1 = params["b1"].reshape(cout, 1).astype(jnp.float32)
    b2 = params["b2"].reshape(cout, 1).astype(jnp.float32)

    # conv bias is exactly cancelled by affine-free GroupNorm when gs == 1
    add_conv_bias = (cout // groups) > 1

    # flat zero-padded scratch: 128-aligned data start, halo >= w2+1 per side
    lane_off = ((w2 + 1 + 127) // 128) * 128
    ppad = 2 * lane_off + p2

    kernel = functools.partial(
        _conv_up_kernel, w_spatial=w2, lane_off=lane_off,
        groups=groups, eps=eps, add_conv_bias=add_conv_bias)

    # constants never change block index across the grid -> single-buffer them
    def const_spec(shape):
        idx = lambda i: (0,) * len(shape)          # noqa: E731
        try:
            return pl.BlockSpec(shape, idx, pipeline_mode=pl.Buffered(1))
        except Exception:                          # older API: fall back
            return pl.BlockSpec(shape, idx)

    flops = int(n * 2 * cout * (cin * p1 + p1 * p2
                                + 9 * ccat * p2 + 9 * cout * p2))
    itemsize = jnp.dtype(cdt).itemsize
    bytes_accessed = int(
        n * itemsize * (cin * p1 + c2 * p2)                       # inputs
        + n * jnp.dtype(out_dtype).itemsize * cout * p2           # output
        + 4 * p1 * p2                                             # upsample matrix
        + itemsize * (cout * cin + 9 * p2 + cout * 9 * (ccat + cout))
        + 4 * 3 * cout)                                           # biases
    cost = pl.CostEstimate(flops=flops, transcendentals=int(n * 4 * cout),
                           bytes_accessed=bytes_accessed)

    out = pl.pallas_call(
        kernel,
        out_shape=jax.ShapeDtypeStruct((n, cout, p2), out_dtype),
        grid=(n,),
        in_specs=[
            pl.BlockSpec((1, cin, p1), lambda i: (i, 0, 0)),   # x1 (low res)
            pl.BlockSpec((1, c2, p2), lambda i: (i, 0, 0)),    # cropped skip
            const_spec((p1, p2)),                              # upsample matrix^T
            const_spec((cout, cin)),                           # w_up
            const_spec((cout, 1)),                             # b_up
            const_spec((cout, 9 * ccat)),                      # w1 (im2col flat)
            const_spec((cout, 1)),                             # b1
            const_spec((cout, 9 * cout)),                      # w2 (im2col flat)
            const_spec((cout, 1)),                             # b2
            const_spec((9, 1, p2)),                            # tap masks
        ],
        out_specs=pl.BlockSpec((1, cout, p2), lambda i: (i, 0, 0)),
        scratch_shapes=[pltpu.VMEM((ccat, ppad), cdt),         # padded concat
                        pltpu.VMEM((9 * ccat, p2), cdt)],      # im2col stack
        compiler_params=pltpu.CompilerParams(
            dimension_semantics=("parallel",)),
        cost_estimate=cost,
    )(x1f, x2c, up_t, w_up, b_up, w1f, b1, w2f, b2, masks)

    # (N, Cout, H2*W2) is already channel-major -> free reshape to NCHW.
    return out.reshape(n, cout, h2, w2)


# ----------------------------------------------------------------------------
# pure-JAX/XLA f32 reference (mirrors the PyTorch module op for op)
# ----------------------------------------------------------------------------
def _upsample2x_bilinear_ref(x):
    n, c, h, w = x.shape
    i0, i1, fh = _upsample_indices(h)
    j0, j1, fw = _upsample_indices(w)
    fh = jnp.asarray(fh)[None, None, :, None]
    fw = jnp.asarray(fw)[None, None, None, :]
    x = x[:, :, i0, :] * (1.0 - fh) + x[:, :, i1, :] * fh
    x = x[:, :, :, j0] * (1.0 - fw) + x[:, :, :, j1] * fw
    return x


def _group_norm_ref(x, groups, eps):
    n, c, h, w = x.shape
    xg = x.reshape(n, groups, (c // groups) * h * w)
    mean = jnp.mean(xg, axis=2, keepdims=True)
    var = jnp.mean((xg - mean) ** 2, axis=2, keepdims=True)
    return ((xg - mean) / jnp.sqrt(var + eps)).reshape(n, c, h, w)


def _conv2d_ref(x, w, b, padding):
    y = lax.conv_general_dilated(
        x, w, window_strides=(1, 1), padding=padding,
        dimension_numbers=("NCHW", "OIHW", "NCHW"))
    return y + b.reshape(1, -1, 1, 1)


def conv_up_reference(params, x1, x2, *, groups=32, eps=1e-5):
    x1 = _upsample2x_bilinear_ref(x1)
    x1 = _conv2d_ref(x1, params["w_up"][:, :, None, None], params["b_up"], "VALID")
    size = x1.shape[2]
    d1, d2 = x2.shape[2], x2.shape[3]
    x2 = x2[:, :, (d1 - size) // 2:(d1 + size) // 2,
            (d2 - size) // 2:(d2 + size) // 2]
    x = jnp.concatenate([x1, x2], axis=1)
    for w, b in ((params["w1"], params["b1"]), (params["w2"], params["b2"])):
        x = _conv2d_ref(x, w, b, ((1, 1), (1, 1)))
        x = jnp.maximum(_group_norm_ref(x, groups, eps), 0.0)
    return x


# ----------------------------------------------------------------------------
# main
# ----------------------------------------------------------------------------
if __name__ == "__main__":
    in_ch, out_ch = 64, 32          # GroupNorm(32, out_ch) needs out_ch % 32 == 0
    skip_ch = in_ch - out_ch        # concat: out_ch (upsampled) + skip_ch == in_ch
    n = 2

    key = jax.random.PRNGKey(0)
    ks = jax.random.split(key, 8)
    params = {
        "w_up": 0.1 * jax.random.normal(ks[0], (out_ch, in_ch), jnp.float32),
        "b_up": 0.1 * jax.random.normal(ks[1], (out_ch,), jnp.float32),
        "w1": 0.1 * jax.random.normal(ks[2], (out_ch, in_ch, 3, 3), jnp.float32),
        "b1": 0.1 * jax.random.normal(ks[3], (out_ch,), jnp.float32),
        "w2": 0.1 * jax.random.normal(ks[4], (out_ch, out_ch, 3, 3), jnp.float32),
        "b2": 0.1 * jax.random.normal(ks[5], (out_ch,), jnp.float32),
    }
    # x1: decoder feature (NCHW), x2: skip connection (NCHW, larger spatial)
    x1 = jax.random.normal(ks[6], (n, in_ch, 8, 8), jnp.float32)
    x2 = jax.random.normal(ks[7], (n, skip_ch, 20, 20), jnp.float32)

    fwd = jax.jit(functools.partial(conv_up_forward, groups=32))
    out = fwd(params, x1, x2)
    jax.block_until_ready(out)
    assert out.shape == (n, out_ch, 16, 16), out.shape
    assert bool(jnp.all(jnp.isfinite(out.astype(jnp.float32))))

    # correctness vs pure-XLA f32 reference (kernel uses bf16 MXU operands and
    # a bf16 output, so a loose-ish tolerance; structural errors would be O(1)).
    ref = conv_up_reference(params, x1, x2, groups=32)
    err = float(jnp.max(jnp.abs(out.astype(jnp.float32) - ref)))
    assert err < 2e-1, f"max abs error vs reference: {err}"
    print("KERNEL_OK")
</pallas_src>

<mosaic_0001>
module attributes {stable_mosaic.version = 11 : i64} {
  func.func @_conv_up_kernel(%arg0: i32, %arg1: memref<1x64x64xbf16, #tpu.memory_space<vmem>>, %arg2: memref<1x32x256xbf16, #tpu.memory_space<vmem>>, %arg3: memref<64x256xf32, #tpu.memory_space<vmem>>, %arg4: memref<32x64xbf16, #tpu.memory_space<vmem>>, %arg5: memref<32x1xf32, #tpu.memory_space<vmem>>, %arg6: memref<32x576xbf16, #tpu.memory_space<vmem>>, %arg7: memref<32x1xf32, #tpu.memory_space<vmem>>, %arg8: memref<32x288xbf16, #tpu.memory_space<vmem>>, %arg9: memref<32x1xf32, #tpu.memory_space<vmem>>, %arg10: memref<9x1x256xbf16, #tpu.memory_space<vmem>>, %arg11: memref<1x32x256xbf16, #tpu.memory_space<vmem>>, %arg12: memref<64x512xbf16, #tpu.memory_space<vmem>>, %arg13: memref<576x256xbf16, #tpu.memory_space<vmem>>) attributes {dimension_semantics = [#tpu.dimension_semantics<parallel>], iteration_bounds = array<i64: 2>, scalar_prefetch = 0 : i64, scratch_operands = 2 : i64, tpu.core_type = #tpu.core_type<tc>, window_params = [{transform_indices = @transform_0, window_bounds = array<i64: 1, 64, 64>}, {transform_indices = @transform_1, window_bounds = array<i64: 1, 32, 256>}, {pipeline_mode = #tpu.pipeline_mode<synchronous>, transform_indices = @transform_2, window_bounds = array<i64: 64, 256>}, {pipeline_mode = #tpu.pipeline_mode<synchronous>, transform_indices = @transform_3, window_bounds = array<i64: 32, 64>}, {pipeline_mode = #tpu.pipeline_mode<synchronous>, transform_indices = @transform_4, window_bounds = array<i64: 32, 1>}, {pipeline_mode = #tpu.pipeline_mode<synchronous>, transform_indices = @transform_5, window_bounds = array<i64: 32, 576>}, {pipeline_mode = #tpu.pipeline_mode<synchronous>, transform_indices = @transform_6, window_bounds = array<i64: 32, 1>}, {pipeline_mode = #tpu.pipeline_mode<synchronous>, transform_indices = @transform_7, window_bounds = array<i64: 32, 288>}, {pipeline_mode = #tpu.pipeline_mode<synchronous>, transform_indices = @transform_8, window_bounds = array<i64: 32, 1>}, {pipeline_mode = #tpu.pipeline_mode<synchronous>, transform_indices = @transform_9, window_bounds = array<i64: 9, 1, 256>}, {transform_indices = @transform_10, window_bounds = array<i64: 1, 32, 256>}]} {
    %c0 = arith.constant 0 : index
    %c0_0 = arith.constant 0 : index
    %c0_1 = arith.constant 0 : index
    %0 = vector.load %arg1[%c0, %c0_0, %c0_1] : memref<1x64x64xbf16, #tpu.memory_space<vmem>>, vector<1x64x64xbf16>
    %1 = vector.shape_cast %0 : vector<1x64x64xbf16> to vector<64x64xbf16>
    %c0_2 = arith.constant 0 : index
    %c0_3 = arith.constant 0 : index
    %2 = vector.load %arg4[%c0_2, %c0_3] : memref<32x64xbf16, #tpu.memory_space<vmem>>, vector<32x64xbf16>
    %cst = arith.constant dense<0.000000e+00> : vector<32x64xf32>
    %3 = tpu.matmul %2, %1, %cst {dimension_numbers = #tpu.dot_dimension_numbers<[1], [0], [0], [1], [0, 0, 1, 1], [], []>} : vector<32x64xbf16>, vector<64x64xbf16>, vector<32x64xf32> -> vector<32x64xf32>
    %c0_4 = arith.constant 0 : index
    %c0_5 = arith.constant 0 : index
    %4 = vector.load %arg5[%c0_4, %c0_5] : memref<32x1xf32, #tpu.memory_space<vmem>>, vector<32x1xf32>
    %5 = vector.broadcast %4 : vector<32x1xf32> to vector<32x64xf32>
    %6 = arith.addf %3, %5 : vector<32x64xf32>
    %c0_6 = arith.constant 0 : index
    %c0_7 = arith.constant 0 : index
    %7 = vector.load %arg3[%c0_6, %c0_7] : memref<64x256xf32, #tpu.memory_space<vmem>>, vector<64x256xf32>
    %cst_8 = arith.constant dense<0.000000e+00> : vector<32x256xf32>
    %8 = tpu.matmul %6, %7, %cst_8 {dimension_numbers = #tpu.dot_dimension_numbers<[1], [0], [0], [1], [0, 0, 1, 1], [], []>} : vector<32x64xf32>, vector<64x256xf32>, vector<32x256xf32> -> vector<32x256xf32>
    %cst_9 = arith.constant 0.000000e+00 : bf16
    %9 = vector.broadcast %cst_9 : bf16 to vector<64x17xbf16>
    %c0_10 = arith.constant 0 : index
    %c111 = arith.constant 111 : index
    %10 = vector.load %arg12[%c0_10, %c111] : memref<64x512xbf16, #tpu.memory_space<vmem>>, vector<64x17xbf16>
    tpu.vector_store %arg12[%c0_10, %c111], %9 {strides = array<i32>} : memref<64x512xbf16, #tpu.memory_space<vmem>>, vector<64x17xbf16>,
    %cst_11 = arith.constant 0.000000e+00 : bf16
    %11 = vector.broadcast %cst_11 : bf16 to vector<64x17xbf16>
    %c0_12 = arith.constant 0 : index
    %c384 = arith.constant 384 : index
    %12 = vector.load %arg12[%c0_12, %c384] : memref<64x512xbf16, #tpu.memory_space<vmem>>, vector<64x17xbf16>
    tpu.vector_store %arg12[%c0_12, %c384], %11 {strides = array<i32>} : memref<64x512xbf16, #tpu.memory_space<vmem>>, vector<64x17xbf16>,
    %13 = arith.truncf %8 : vector<32x256xf32> to vector<32x256xbf16>
    %c0_13 = arith.constant 0 : index
    %c128 = arith.constant 128 : index
    %14 = vector.load %arg12[%c0_13, %c128] : memref<64x512xbf16, #tpu.memory_space<vmem>>, vector<32x256xbf16>
    tpu.vector_store %arg12[%c0_13, %c128], %13 {strides = array<i32>} : memref<64x512xbf16, #tpu.memory_space<vmem>>, vector<32x256xbf16>,
    %c0_14 = arith.constant 0 : index
    %c0_15 = arith.constant 0 : index
    %c0_16 = arith.constant 0 : index
    %15 = vector.load %arg2[%c0_14, %c0_15, %c0_16] : memref<1x32x256xbf16, #tpu.memory_space<vmem>>, vector<1x32x256xbf16>
    %16 = vector.shape_cast %15 : vector<1x32x256xbf16> to vector<32x256xbf16>
    %c32 = arith.constant 32 : index
    %c128_17 = arith.constant 128 : index
    %17 = vector.load %arg12[%c32, %c128_17] : memref<64x512xbf16, #tpu.memory_space<vmem>>, vector<32x256xbf16>
    tpu.vector_store %arg12[%c32, %c128_17], %16 {strides = array<i32>} : memref<64x512xbf16, #tpu.memory_space<vmem>>, vector<32x256xbf16>,
    %c0_18 = arith.constant 0 : index
    %c111_19 = arith.constant 111 : index
    %18 = vector.load %arg12[%c0_18, %c111_19] : memref<64x512xbf16, #tpu.memory_space<vmem>>, vector<64x256xbf16>
    %c0_20 = arith.constant 0 : index
    %c0_21 = arith.constant 0 : index
    %c0_22 = arith.constant 0 : index
    %19 = vector.load %arg10[%c0_20, %c0_21, %c0_22] : memref<9x1x256xbf16, #tpu.memory_space<vmem>>, vector<1x1x256xbf16>
    %20 = vector.shape_cast %19 : vector<1x1x256xbf16> to vector<1x256xbf16>
    %21 = vector.broadcast %20 : vector<1x256xbf16> to vector<64x256xbf16>
    %22 = arith.mulf %18, %21 : vector<64x256xbf16>
    %c0_23 = arith.constant 0 : index
    %c0_24 = arith.constant 0 : index
    %23 = vector.load %arg13[%c0_23, %c0_24] : memref<576x256xbf16, #tpu.memory_space<vmem>>, vector<64x256xbf16>
    tpu.vector_store %arg13[%c0_23, %c0_24], %22 {strides = array<i32>} : memref<576x256xbf16, #tpu.memory_space<vmem>>, vector<64x256xbf16>,
    %c0_25 = arith.constant 0 : index
    %c112 = arith.constant 112 : index
    %24 = vector.load %arg12[%c0_25, %c112] : memref<64x512xbf16, #tpu.memory_space<vmem>>, vector<64x256xbf16>
    %c1 = arith.constant 1 : index
    %c0_26 = arith.constant 0 : index
    %c0_27 = arith.constant 0 : index
    %25 = vector.load %arg10[%c1, %c0_26, %c0_27] : memref<9x1x256xbf16, #tpu.memory_space<vmem>>, vector<1x1x256xbf16>
    %26 = vector.shape_cast %25 : vector<1x1x256xbf16> to vector<1x256xbf16>
    %27 = vector.broadcast %26 : vector<1x256xbf16> to vector<64x256xbf16>
    %28 = arith.mulf %24, %27 : vector<64x256xbf16>
    %c64 = arith.constant 64 : index
    %c0_28 = arith.constant 0 : index
    %29 = vector.load %arg13[%c64, %c0_28] : memref<576x256xbf16, #tpu.memory_space<vmem>>, vector<64x256xbf16>
    tpu.vector_store %arg13[%c64, %c0_28], %28 {strides = array<i32>} : memref<576x256xbf16, #tpu.memory_space<vmem>>, vector<64x256xbf16>,
    %c0_29 = arith.constant 0 : index
    %c113 = arith.constant 113 : index
    %30 = vector.load %arg12[%c0_29, %c113] : memref<64x512xbf16, #tpu.memory_space<vmem>>, vector<64x256xbf16>
    %c2 = arith.constant 2 : index
    %c0_30 = arith.constant 0 : index
    %c0_31 = arith.constant 0 : index
    %31 = vector.load %arg10[%c2, %c0_30, %c0_31] : memref<9x1x256xbf16, #tpu.memory_space<vmem>>, vector<1x1x256xbf16>
    %32 = vector.shape_cast %31 : vector<1x1x256xbf16> to vector<1x256xbf16>
    %33 = vector.broadcast %32 : vector<1x256xbf16> to vector<64x256xbf16>
    %34 = arith.mulf %30, %33 : vector<64x256xbf16>
    %c128_32 = arith.constant 128 : index
    %c0_33 = arith.constant 0 : index
    %35 = vector.load %arg13[%c128_32, %c0_33] : memref<576x256xbf16, #tpu.memory_space<vmem>>, vector<64x256xbf16>
    tpu.vector_store %arg13[%c128_32, %c0_33], %34 {strides = array<i32>} : memref<576x256xbf16, #tpu.memory_space<vmem>>, vector<64x256xbf16>,
    %c0_34 = arith.constant 0 : index
    %c127 = arith.constant 127 : index
    %36 = vector.load %arg12[%c0_34, %c127] : memref<64x512xbf16, #tpu.memory_space<vmem>>, vector<64x256xbf16>
    %c3 = arith.constant 3 : index
    %c0_35 = arith.constant 0 : index
    %c0_36 = arith.constant 0 : index
    %37 = vector.load %arg10[%c3, %c0_35, %c0_36] : memref<9x1x256xbf16, #tpu.memory_space<vmem>>, vector<1x1x256xbf16>
    %38 = vector.shape_cast %37 : vector<1x1x256xbf16> to vector<1x256xbf16>
    %39 = vector.broadcast %38 : vector<1x256xbf16> to vector<64x256xbf16>
    %40 = arith.mulf %36, %39 : vector<64x256xbf16>
    %c192 = arith.constant 192 : index
    %c0_37 = arith.constant 0 : index
    %41 = vector.load %arg13[%c192, %c0_37] : memref<576x256xbf16, #tpu.memory_space<vmem>>, vector<64x256xbf16>
    tpu.vector_store %arg13[%c192, %c0_37], %40 {strides = array<i32>} : memref<576x256xbf16, #tpu.memory_space<vmem>>, vector<64x256xbf16>,
    %c0_38 = arith.constant 0 : index
    %c128_39 = arith.constant 128 : index
    %42 = vector.load %arg12[%c0_38, %c128_39] : memref<64x512xbf16, #tpu.memory_space<vmem>>, vector<64x256xbf16>
    %c256 = arith.constant 256 : index
    %c0_40 = arith.constant 0 : index
    %43 = vector.load %arg13[%c256, %c0_40] : memref<576x256xbf16, #tpu.memory_space<vmem>>, vector<64x256xbf16>
    tpu.vector_store %arg13[%c256, %c0_40], %42 {strides = array<i32>} : memref<576x256xbf16, #tpu.memory_space<vmem>>, vector<64x256xbf16>,
    %c0_41 = arith.constant 0 : index
    %c129 = arith.constant 129 : index
    %44 = vector.load %arg12[%c0_41, %c129] : memref<64x512xbf16, #tpu.memory_space<vmem>>, vector<64x256xbf16>
    %c5 = arith.constant 5 : index
    %c0_42 = arith.constant 0 : index
    %c0_43 = arith.constant 0 : index
    %45 = vector.load %arg10[%c5, %c0_42, %c0_43] : memref<9x1x256xbf16, #tpu.memory_space<vmem>>, vector<1x1x256xbf16>
    %46 = vector.shape_cast %45 : vector<1x1x256xbf16> to vector<1x256xbf16>
    %47 = vector.broadcast %46 : vector<1x256xbf16> to vector<64x256xbf16>
    %48 = arith.mulf %44, %47 : vector<64x256xbf16>
    %c320 = arith.constant 320 : index
    %c0_44 = arith.constant 0 : index
    %49 = vector.load %arg13[%c320, %c0_44] : memref<576x256xbf16, #tpu.memory_space<vmem>>, vector<64x256xbf16>
    tpu.vector_store %arg13[%c320, %c0_44], %48 {strides = array<i32>} : memref<576x256xbf16, #tpu.memory_space<vmem>>, vector<64x256xbf16>,
    %c0_45 = arith.constant 0 : index
    %c143 = arith.constant 143 : index
    %50 = vector.load %arg12[%c0_45, %c143] : memref<64x512xbf16, #tpu.memory_space<vmem>>, vector<64x256xbf16>
    %c6 = arith.constant 6 : index
    %c0_46 = arith.constant 0 : index
    %c0_47 = arith.constant 0 : index
    %51 = vector.load %arg10[%c6, %c0_46, %c0_47] : memref<9x1x256xbf16, #tpu.memory_space<vmem>>, vector<1x1x256xbf16>
    %52 = vector.shape_cast %51 : vector<1x1x256xbf16> to vector<1x256xbf16>
    %53 = vector.broadcast %52 : vector<1x256xbf16> to vector<64x256xbf16>
    %54 = arith.mulf %50, %53 : vector<64x256xbf16>
    %c384_48 = arith.constant 384 : index
    %c0_49 = arith.constant 0 : index
    %55 = vector.load %arg13[%c384_48, %c0_49] : memref<576x256xbf16, #tpu.memory_space<vmem>>, vector<64x256xbf16>
    tpu.vector_store %arg13[%c384_48, %c0_49], %54 {strides = array<i32>} : memref<576x256xbf16, #tpu.memory_space<vmem>>, vector<64x256xbf16>,
    %c0_50 = arith.constant 0 : index
    %c144 = arith.constant 144 : index
    %56 = vector.load %arg12[%c0_50, %c144] : memref<64x512xbf16, #tpu.memory_space<vmem>>, vector<64x256xbf16>
    %c7 = arith.constant 7 : index
    %c0_51 = arith.constant 0 : index
    %c0_52 = arith.constant 0 : index
    %57 = vector.load %arg10[%c7, %c0_51, %c0_52] : memref<9x1x256xbf16, #tpu.memory_space<vmem>>, vector<1x1x256xbf16>
    %58 = vector.shape_cast %57 : vector<1x1x256xbf16> to vector<1x256xbf16>
    %59 = vector.broadcast %58 : vector<1x256xbf16> to vector<64x256xbf16>
    %60 = arith.mulf %56, %59 : vector<64x256xbf16>
    %c448 = arith.constant 448 : index
    %c0_53 = arith.constant 0 : index
    %61 = vector.load %arg13[%c448, %c0_53] : memref<576x256xbf16, #tpu.memory_space<vmem>>, vector<64x256xbf16>
    tpu.vector_store %arg13[%c448, %c0_53], %60 {strides = array<i32>} : memref<576x256xbf16, #tpu.memory_space<vmem>>, vector<64x256xbf16>,
    %c0_54 = arith.constant 0 : index
    %c145 = arith.constant 145 : index
    %62 = vector.load %arg12[%c0_54, %c145] : memref<64x512xbf16, #tpu.memory_space<vmem>>, vector<64x256xbf16>
    %c8 = arith.constant 8 : index
    %c0_55 = arith.constant 0 : index
    %c0_56 = arith.constant 0 : index
    %63 = vector.load %arg10[%c8, %c0_55, %c0_56] : memref<9x1x256xbf16, #tpu.memory_space<vmem>>, vector<1x1x256xbf16>
    %64 = vector.shape_cast %63 : vector<1x1x256xbf16> to vector<1x256xbf16>
    %65 = vector.broadcast %64 : vector<1x256xbf16> to vector<64x256xbf16>
    %66 = arith.mulf %62, %65 : vector<64x256xbf16>
    %c512 = arith.constant 512 : index
    %c0_57 = arith.constant 0 : index
    %67 = vector.load %arg13[%c512, %c0_57] : memref<576x256xbf16, #tpu.memory_space<vmem>>, vector<64x256xbf16>
    tpu.vector_store %arg13[%c512, %c0_57], %66 {strides = array<i32>} : memref<576x256xbf16, #tpu.memory_space<vmem>>, vector<64x256xbf16>,
    %c0_58 = arith.constant 0 : index
    %c0_59 = arith.constant 0 : index
    %68 = vector.load %arg6[%c0_58, %c0_59] : memref<32x576xbf16, #tpu.memory_space<vmem>>, vector<32x576xbf16>
    %c0_60 = arith.constant 0 : index
    %c0_61 = arith.constant 0 : index
    %69 = vector.load %arg13[%c0_60, %c0_61] : memref<576x256xbf16, #tpu.memory_space<vmem>>, vector<576x256xbf16>
    %cst_62 = arith.constant dense<0.000000e+00> : vector<32x256xf32>
    %70 = tpu.matmul %68, %69, %cst_62 {dimension_numbers = #tpu.dot_dimension_numbers<[1], [0], [0], [1], [0, 0, 1, 1], [], []>} : vector<32x576xbf16>, vector<576x256xbf16>, vector<32x256xf32> -> vector<32x256xf32>
    %cst_63 = arith.constant dense<0.000000e+00> : vector<32xf32>
    %71 = vector.multi_reduction <add>, %70, %cst_63 [1] : vector<32x256xf32> to vector<32xf32>
    %72 = vector.shape_cast %71 : vector<32xf32> to vector<32x1xf32>
    %cst_64 = arith.constant 2.560000e+02 : f32
    %73 = vector.broadcast %cst_64 : f32 to vector<32x1xf32>
    %74 = arith.divf %72, %73 : vector<32x1xf32>
    %75 = vector.broadcast %74 : vector<32x1xf32> to vector<32x256xf32>
    %76 = arith.subf %70, %75 : vector<32x256xf32>
    %77 = arith.mulf %76, %76 : vector<32x256xf32>
    %cst_65 = arith.constant dense<0.000000e+00> : vector<32xf32>
    %78 = vector.multi_reduction <add>, %77, %cst_65 [1] : vector<32x256xf32> to vector<32xf32>
    %79 = vector.shape_cast %78 : vector<32xf32> to vector<32x1xf32>
    %cst_66 = arith.constant 2.560000e+02 : f32
    %80 = vector.broadcast %cst_66 : f32 to vector<32x1xf32>
    %81 = arith.divf %79, %80 : vector<32x1xf32>
    %cst_67 = arith.constant 9.99999974E-6 : f32
    %82 = vector.broadcast %cst_67 : f32 to vector<32x1xf32>
    %83 = arith.addf %81, %82 : vector<32x1xf32>
    %84 = math.rsqrt %83 : vector<32x1xf32>
    %85 = vector.broadcast %84 : vector<32x1xf32> to vector<32x256xf32>
    %86 = arith.mulf %76, %85 : vector<32x256xf32>
    %cst_68 = arith.constant 0.000000e+00 : f32
    %87 = vector.broadcast %cst_68 : f32 to vector<32x256xf32>
    %88 = arith.maximumf %86, %87 : vector<32x256xf32>
    %89 = arith.truncf %88 : vector<32x256xf32> to vector<32x256xbf16>
    %c0_69 = arith.constant 0 : index
    %c128_70 = arith.constant 128 : index
    %90 = vector.load %arg12[%c0_69, %c128_70] : memref<64x512xbf16, #tpu.memory_space<vmem>>, vector<32x256xbf16>
    tpu.vector_store %arg12[%c0_69, %c128_70], %89 {strides = array<i32>} : memref<64x512xbf16, #tpu.memory_space<vmem>>, vector<32x256xbf16>,
    %c0_71 = arith.constant 0 : index
    %c111_72 = arith.constant 111 : index
    %91 = vector.load %arg12[%c0_71, %c111_72] : memref<64x512xbf16, #tpu.memory_space<vmem>>, vector<32x256xbf16>
    %c0_73 = arith.constant 0 : index
    %c0_74 = arith.constant 0 : index
    %c0_75 = arith.constant 0 : index
    %92 = vector.load %arg10[%c0_73, %c0_74, %c0_75] : memref<9x1x256xbf16, #tpu.memory_space<vmem>>, vector<1x1x256xbf16>
    %93 = vector.shape_cast %92 : vector<1x1x256xbf16> to vector<1x256xbf16>
    %94 = vector.broadcast %93 : vector<1x256xbf16> to vector<32x256xbf16>
    %95 = arith.mulf %91, %94 : vector<32x256xbf16>
    %c0_76 = arith.constant 0 : index
    %c0_77 = arith.constant 0 : index
    %96 = vector.load %arg13[%c0_76, %c0_77] : memref<576x256xbf16, #tpu.memory_space<vmem>>, vector<32x256xbf16>
    tpu.vector_store %arg13[%c0_76, %c0_77], %95 {strides = array<i32>} : memref<576x256xbf16, #tpu.memory_space<vmem>>, vector<32x256xbf16>,
    %c0_78 = arith.constant 0 : index
    %c112_79 = arith.constant 112 : index
    %97 = vector.load %arg12[%c0_78, %c112_79] : memref<64x512xbf16, #tpu.memory_space<vmem>>, vector<32x256xbf16>
    %c1_80 = arith.constant 1 : index
    %c0_81 = arith.constant 0 : index
    %c0_82 = arith.constant 0 : index
    %98 = vector.load %arg10[%c1_80, %c0_81, %c0_82] : memref<9x1x256xbf16, #tpu.memory_space<vmem>>, vector<1x1x256xbf16>
    %99 = vector.shape_cast %98 : vector<1x1x256xbf16> to vector<1x256xbf16>
    %100 = vector.broadcast %99 : vector<1x256xbf16> to vector<32x256xbf16>
    %101 = arith.mulf %97, %100 : vector<32x256xbf16>
    %c32_83 = arith.constant 32 : index
    %c0_84 = arith.constant 0 : index
    %102 = vector.load %arg13[%c32_83, %c0_84] : memref<576x256xbf16, #tpu.memory_space<vmem>>, vector<32x256xbf16>
    tpu.vector_store %arg13[%c32_83, %c0_84], %101 {strides = array<i32>} : memref<576x256xbf16, #tpu.memory_space<vmem>>, vector<32x256xbf16>,
    %c0_85 = arith.constant 0 : index
    %c113_86 = arith.constant 113 : index
    %103 = vector.load %arg12[%c0_85, %c113_86] : memref<64x512xbf16, #tpu.memory_space<vmem>>, vector<32x256xbf16>
    %c2_87 = arith.constant 2 : index
    %c0_88 = arith.constant 0 : index
    %c0_89 = arith.constant 0 : index
    %104 = vector.load %arg10[%c2_87, %c0_88, %c0_89] : memref<9x1x256xbf16, #tpu.memory_space<vmem>>, vector<1x1x256xbf16>
    %105 = vector.shape_cast %104 : vector<1x1x256xbf16> to vector<1x256xbf16>
    %106 = vector.broadcast %105 : vector<1x256xbf16> to vector<32x256xbf16>
    %107 = arith.mulf %103, %106 : vector<32x256xbf16>
    %c64_90 = arith.constant 64 : index
    %c0_91 = arith.constant 0 : index
    %108 = vector.load %arg13[%c64_90, %c0_91] : memref<576x256xbf16, #tpu.memory_space<vmem>>, vector<32x256xbf16>
    tpu.vector_store %arg13[%c64_90, %c0_91], %107 {strides = array<i32>} : memref<576x256xbf16, #tpu.memory_space<vmem>>, vector<32x256xbf16>,
    %c0_92 = arith.constant 0 : index
    %c127_93 = arith.constant 127 : index
    %109 = vector.load %arg12[%c0_92, %c127_93] : memref<64x512xbf16, #tpu.memory_space<vmem>>, vector<32x256xbf16>
    %c3_94 = arith.constant 3 : index
    %c0_95 = arith.constant 0 : index
    %c0_96 = arith.constant 0 : index
    %110 = vector.load %arg10[%c3_94, %c0_95, %c0_96] : memref<9x1x256xbf16, #tpu.memory_space<vmem>>, vector<1x1x256xbf16>
    %111 = vector.shape_cast %110 : vector<1x1x256xbf16> to vector<1x256xbf16>
    %112 = vector.broadcast %111 : vector<1x256xbf16> to vector<32x256xbf16>
    %113 = arith.mulf %109, %112 : vector<32x256xbf16>
    %c96 = arith.constant 96 : index
    %c0_97 = arith.constant 0 : index
    %114 = vector.load %arg13[%c96, %c0_97] : memref<576x256xbf16, #tpu.memory_space<vmem>>, vector<32x256xbf16>
    tpu.vector_store %arg13[%c96, %c0_97], %113 {strides = array<i32>} : memref<576x256xbf16, #tpu.memory_space<vmem>>, vector<32x256xbf16>,
    %c0_98 = arith.constant 0 : index
    %c128_99 = arith.constant 128 : index
    %115 = vector.load %arg12[%c0_98, %c128_99] : memref<64x512xbf16, #tpu.memory_space<vmem>>, vector<32x256xbf16>
    %c128_100 = arith.constant 128 : index
    %c0_101 = arith.constant 0 : index
    %116 = vector.load %arg13[%c128_100, %c0_101] : memref<576x256xbf16, #tpu.memory_space<vmem>>, vector<32x256xbf16>
    tpu.vector_store %arg13[%c128_100, %c0_101], %115 {strides = array<i32>} : memref<576x256xbf16, #tpu.memory_space<vmem>>, vector<32x256xbf16>,
    %c0_102 = arith.constant 0 : index
    %c129_103 = arith.constant 129 : index
    %117 = vector.load %arg12[%c0_102, %c129_103] : memref<64x512xbf16, #tpu.memory_space<vmem>>, vector<32x256xbf16>
    %c5_104 = arith.constant 5 : index
    %c0_105 = arith.constant 0 : index
    %c0_106 = arith.constant 0 : index
    %118 = vector.load %arg10[%c5_104, %c0_105, %c0_106] : memref<9x1x256xbf16, #tpu.memory_space<vmem>>, vector<1x1x256xbf16>
    %119 = vector.shape_cast %118 : vector<1x1x256xbf16> to vector<1x256xbf16>
    %120 = vector.broadcast %119 : vector<1x256xbf16> to vector<32x256xbf16>
    %121 = arith.mulf %117, %120 : vector<32x256xbf16>
    %c160 = arith.constant 160 : index
    %c0_107 = arith.constant 0 : index
    %122 = vector.load %arg13[%c160, %c0_107] : memref<576x256xbf16, #tpu.memory_space<vmem>>, vector<32x256xbf16>
    tpu.vector_store %arg13[%c160, %c0_107], %121 {strides = array<i32>} : memref<576x256xbf16, #tpu.memory_space<vmem>>, vector<32x256xbf16>,
    %c0_108 = arith.constant 0 : index
    %c143_109 = arith.constant 143 : index
    %123 = vector.load %arg12[%c0_108, %c143_109] : memref<64x512xbf16, #tpu.memory_space<vmem>>, vector<32x256xbf16>
    %c6_110 = arith.constant 6 : index
    %c0_111 = arith.constant 0 : index
    %c0_112 = arith.constant 0 : index
    %124 = vector.load %arg10[%c6_110, %c0_111, %c0_112] : memref<9x1x256xbf16, #tpu.memory_space<vmem>>, vector<1x1x256xbf16>
    %125 = vector.shape_cast %124 : vector<1x1x256xbf16> to vector<1x256xbf16>
    %126 = vector.broadcast %125 : vector<1x256xbf16> to vector<32x256xbf16>
    %127 = arith.mulf %123, %126 : vector<32x256xbf16>
    %c192_113 = arith.constant 192 : index
    %c0_114 = arith.constant 0 : index
    %128 = vector.load %arg13[%c192_113, %c0_114] : memref<576x256xbf16, #tpu.memory_space<vmem>>, vector<32x256xbf16>
    tpu.vector_store %arg13[%c192_113, %c0_114], %127 {strides = array<i32>} : memref<576x256xbf16, #tpu.memory_space<vmem>>, vector<32x256xbf16>,
    %c0_115 = arith.constant 0 : index
    %c144_116 = arith.constant 144 : index
    %129 = vector.load %arg12[%c0_115, %c144_116] : memref<64x512xbf16, #tpu.memory_space<vmem>>, vector<32x256xbf16>
    %c7_117 = arith.constant 7 : index
    %c0_118 = arith.constant 0 : index
    %c0_119 = arith.constant 0 : index
    %130 = vector.load %arg10[%c7_117, %c0_118, %c0_119] : memref<9x1x256xbf16, #tpu.memory_space<vmem>>, vector<1x1x256xbf16>
    %131 = vector.shape_cast %130 : vector<1x1x256xbf16> to vector<1x256xbf16>
    %132 = vector.broadcast %131 : vector<1x256xbf16> to vector<32x256xbf16>
    %133 = arith.mulf %129, %132 : vector<32x256xbf16>
    %c224 = arith.constant 224 : index
    %c0_120 = arith.constant 0 : index
    %134 = vector.load %arg13[%c224, %c0_120] : memref<576x256xbf16, #tpu.memory_space<vmem>>, vector<32x256xbf16>
    tpu.vector_store %arg13[%c224, %c0_120], %133 {strides = array<i32>} : memref<576x256xbf16, #tpu.memory_space<vmem>>, vector<32x256xbf16>,
    %c0_121 = arith.constant 0 : index
    %c145_122 = arith.constant 145 : index
    %135 = vector.load %arg12[%c0_121, %c145_122] : memref<64x512xbf16, #tpu.memory_space<vmem>>, vector<32x256xbf16>
    %c8_123 = arith.constant 8 : index
    %c0_124 = arith.constant 0 : index
    %c0_125 = arith.constant 0 : index
    %136 = vector.load %arg10[%c8_123, %c0_124, %c0_125] : memref<9x1x256xbf16, #tpu.memory_space<vmem>>, vector<1x1x256xbf16>
    %137 = vector.shape_cast %136 : vector<1x1x256xbf16> to vector<1x256xbf16>
    %138 = vector.broadcast %137 : vector<1x256xbf16> to vector<32x256xbf16>
    %139 = arith.mulf %135, %138 : vector<32x256xbf16>
    %c256_126 = arith.constant 256 : index
    %c0_127 = arith.constant 0 : index
    %140 = vector.load %arg13[%c256_126, %c0_127] : memref<576x256xbf16, #tpu.memory_space<vmem>>, vector<32x256xbf16>
    tpu.vector_store %arg13[%c256_126, %c0_127], %139 {strides = array<i32>} : memref<576x256xbf16, #tpu.memory_space<vmem>>, vector<32x256xbf16>,
    %c0_128 = arith.constant 0 : index
    %c0_129 = arith.constant 0 : index
    %141 = vector.load %arg8[%c0_128, %c0_129] : memref<32x288xbf16, #tpu.memory_space<vmem>>, vector<32x288xbf16>
    %c0_130 = arith.constant 0 : index
    %c0_131 = arith.constant 0 : index
    %142 = vector.load %arg13[%c0_130, %c0_131] : memref<576x256xbf16, #tpu.memory_space<vmem>>, vector<288x256xbf16>
    %cst_132 = arith.constant dense<0.000000e+00> : vector<32x256xf32>
    %143 = tpu.matmul %141, %142, %cst_132 {dimension_numbers = #tpu.dot_dimension_numbers<[1], [0], [0], [1], [0, 0, 1, 1], [], []>} : vector<32x288xbf16>, vector<288x256xbf16>, vector<32x256xf32> -> vector<32x256xf32>
    %cst_133 = arith.constant dense<0.000000e+00> : vector<32xf32>
    %144 = vector.multi_reduction <add>, %143, %cst_133 [1] : vector<32x256xf32> to vector<32xf32>
    %145 = vector.shape_cast %144 : vector<32xf32> to vector<32x1xf32>
    %cst_134 = arith.constant 2.560000e+02 : f32
    %146 = vector.broadcast %cst_134 : f32 to vector<32x1xf32>
    %147 = arith.divf %145, %146 : vector<32x1xf32>
    %148 = vector.broadcast %147 : vector<32x1xf32> to vector<32x256xf32>
    %149 = arith.subf %143, %148 : vector<32x256xf32>
    %150 = arith.mulf %149, %149 : vector<32x256xf32>
    %cst_135 = arith.constant dense<0.000000e+00> : vector<32xf32>
    %151 = vector.multi_reduction <add>, %150, %cst_135 [1] : vector<32x256xf32> to vector<32xf32>
    %152 = vector.shape_cast %151 : vector<32xf32> to vector<32x1xf32>
    %cst_136 = arith.constant 2.560000e+02 : f32
    %153 = vector.broadcast %cst_136 : f32 to vector<32x1xf32>
    %154 = arith.divf %152, %153 : vector<32x1xf32>
    %cst_137 = arith.constant 9.99999974E-6 : f32
    %155 = vector.broadcast %cst_137 : f32 to vector<32x1xf32>
    %156 = arith.addf %154, %155 : vector<32x1xf32>
    %157 = math.rsqrt %156 : vector<32x1xf32>
    %158 = vector.broadcast %157 : vector<32x1xf32> to vector<32x256xf32>
    %159 = arith.mulf %149, %158 : vector<32x256xf32>
    %cst_138 = arith.constant 0.000000e+00 : f32
    %160 = vector.broadcast %cst_138 : f32 to vector<32x256xf32>
    %161 = arith.maximumf %159, %160 : vector<32x256xf32>
    %162 = arith.truncf %161 : vector<32x256xf32> to vector<32x256xbf16>
    %c0_139 = arith.constant 0 : index
    %c0_140 = arith.constant 0 : index
    %c0_141 = arith.constant 0 : index
    %163 = vector.load %arg11[%c0_139, %c0_140, %c0_141] : memref<1x32x256xbf16, #tpu.memory_space<vmem>>, vector<1x32x256xbf16>
    %164 = vector.shape_cast %163 : vector<1x32x256xbf16> to vector<32x256xbf16>
    %165 = vector.shape_cast %162 : vector<32x256xbf16> to vector<1x32x256xbf16>
    tpu.vector_store %arg11[%c0_139, %c0_140, %c0_141], %165 {strides = array<i32>} : memref<1x32x256xbf16, #tpu.memory_space<vmem>>, vector<1x32x256xbf16>,
    return
  }
  func.func @transform_0(%arg0: i32) -> (i32, i32, i32) {
    %c0_i32 = arith.constant 0 : i32
    %c0_i32_0 = arith.constant 0 : i32
    %c0_i32_1 = arith.constant 0 : i32
    return %arg0, %c0_i32, %c0_i32_0 : i32, i32, i32
  }
  func.func @transform_1(%arg0: i32) -> (i32, i32, i32) {
    %c0_i32 = arith.constant 0 : i32
    %c0_i32_0 = arith.constant 0 : i32
    %c0_i32_1 = arith.constant 0 : i32
    return %arg0, %c0_i32, %c0_i32_0 : i32, i32, i32
  }
  func.func @transform_2(%arg0: i32) -> (i32, i32) {
    %c0_i32 = arith.constant 0 : i32
    %c0_i32_0 = arith.constant 0 : i32
    %c0_i32_1 = arith.constant 0 : i32
    return %c0_i32, %c0_i32_0 : i32, i32
  }
  func.func @transform_3(%arg0: i32) -> (i32, i32) {
    %c0_i32 = arith.constant 0 : i32
    %c0_i32_0 = arith.constant 0 : i32
    %c0_i32_1 = arith.constant 0 : i32
    return %c0_i32, %c0_i32_0 : i32, i32
  }
  func.func @transform_4(%arg0: i32) -> (i32, i32) {
    %c0_i32 = arith.constant 0 : i32
    %c0_i32_0 = arith.constant 0 : i32
    %c0_i32_1 = arith.constant 0 : i32
    return %c0_i32, %c0_i32_0 : i32, i32
  }
  func.func @transform_5(%arg0: i32) -> (i32, i32) {
    %c0_i32 = arith.constant 0 : i32
    %c0_i32_0 = arith.constant 0 : i32
    %c0_i32_1 = arith.constant 0 : i32
    return %c0_i32, %c0_i32_0 : i32, i32
  }
  func.func @transform_6(%arg0: i32) -> (i32, i32) {
    %c0_i32 = arith.constant 0 : i32
    %c0_i32_0 = arith.constant 0 : i32
    %c0_i32_1 = arith.constant 0 : i32
    return %c0_i32, %c0_i32_0 : i32, i32
  }
  func.func @transform_7(%arg0: i32) -> (i32, i32) {
    %c0_i32 = arith.constant 0 : i32
    %c0_i32_0 = arith.constant 0 : i32
    %c0_i32_1 = arith.constant 0 : i32
    return %c0_i32, %c0_i32_0 : i32, i32
  }
  func.func @transform_8(%arg0: i32) -> (i32, i32) {
    %c0_i32 = arith.constant 0 : i32
    %c0_i32_0 = arith.constant 0 : i32
    %c0_i32_1 = arith.constant 0 : i32
    return %c0_i32, %c0_i32_0 : i32, i32
  }
  func.func @transform_9(%arg0: i32) -> (i32, i32, i32) {
    %c0_i32 = arith.constant 0 : i32
    %c0_i32_0 = arith.constant 0 : i32
    %c0_i32_1 = arith.constant 0 : i32
    %c0_i32_2 = arith.constant 0 : i32
    return %c0_i32, %c0_i32_0, %c0_i32_1 : i32, i32, i32
  }
  func.func @transform_10(%arg0: i32) -> (i32, i32, i32) {
    %c0_i32 = arith.constant 0 : i32
    %c0_i32_0 = arith.constant 0 : i32
    %c0_i32_1 = arith.constant 0 : i32
    return %arg0, %c0_i32, %c0_i32_0 : i32, i32, i32
  }
}

</mosaic_0001>

<bundles_post_ra>
// kernel: conv_up_forward.1
= control target key start
LH: loop header
LB: loop body
LE: loop exit
PB: predicated region body
PF: predicated region fallthrough
CT: control target
= control target key end

     0   :  { %s5385_s13 = smov 0   ;;  %s7326_s0 = inlined_call_operand.vmem [shape: bf16[2,64,64], index: 0, kind: input, shape index: {}]   ;;  %s7327_s1 = inlined_call_operand.vmem [shape: bf16[2,32,256], index: 1, kind: input, shape index: {}]   ;;  %s7328_s2 = inlined_call_operand.vmem [shape: f32[64,256], index: 2, kind: input, shape index: {}]   ;;  %s7329_s3 = inlined_call_operand.vmem [shape: bf16[32,64], index: 3, kind: input, shape index: {}]   ;;  %s7330_s4 = inlined_call_operand.vmem [shape: f32[32,1], index: 4, kind: input, shape index: {}]   ;;  %s7331_s5 = inlined_call_operand.vmem [shape: bf16[32,576], index: 5, kind: input, shape index: {}]   ;;  %s7332_s6 = inlined_call_operand.vmem [shape: f32[32,1], index: 6, kind: input, shape index: {}]   ;;  %s7333_s7 = inlined_call_operand.vmem [shape: bf16[32,288], index: 7, kind: input, shape index: {}]   ;;  %s7334_s8 = inlined_call_operand.vmem [shape: f32[32,1], index: 8, kind: input, shape index: {}]   ;;  %s7335_s9 = inlined_call_operand.vmem [shape: bf16[9,1,256], index: 9, kind: input, shape index: {}]   ;;  %s7336_s10 = inlined_call_operand.vmem [shape: bf16[2,32,256], index: 10, kind: output, shape index: {}]  }
   0x1 LB: > { %s4496_s6 = sadd.s32 4294967295, %s5318_s13   ;;  %p4500_p0 = scmp.ge.s32.totalorder %s5318_s13, 1  ;;  %s5318_s13 = sphi %s5385_s13, %s20_s13  }
   0x2   : > { %p322_p1 = scmp.lt.s32.totalorder %s5318_s13, 3 }
   0x4   : > { %p323_p2 = pnand %p4500_p0, %p322_p1 }
   0x6   : > { %326 = sbr.rel (%p323_p2) target bundleno = 1764 (0x6e4), region = 60 }
   0xb   : > { %v393_v0 = vld [vmem:[%s7330_s4] sm:$0xff]  ;;  %p365_p3 = scmp.lt.s32.totalorder %s4496_s6, 1  ;;  %v5320_v2 = vmov 0   ;;  %v395_v3 = vld [vmem:[%s7330_s4 + $0x10] sm:$0xff]  ;;  %v394_v4 = vld [vmem:[%s7330_s4 + $0x8] sm:$0xff]  ;;  %s5321_s8 = smov 111  }
   0xc   : > { %v613_v1 = vld [vmem:[%s7335_s9] sm:$0x3]  ;;  %5212 = vset.pattern.permute.xlu0 %v5320_v2  ;;  %5213 = vset.pattern.permute.xlu1 %v5320_v2  ;;  %v4541_v10 = vld [vmem:[%s7335_s9 + $0x2] sm:$0x3]  ;;  %v396_v16 = vld [vmem:[%s7330_s4 + $0x18] sm:$0xff]  ;;  %vm451_vm0 = vcmask 523264  }
   0xd   : > { %615 = vst [vmem:[#allocation1] ss:$9 sm:$0xff] %v613_v1  ;;  %399 = vperm.xlu0 %5212, %v393_v0   ;;  %s7370_s6 = smov (!%p365_p3, %s4496_s6), 1  ;;  %409 = vperm.xlu1 %5213, %v395_v3   ;;  %v4542_v24 = vld [vmem:[%s7335_s9 + $0x4] sm:$0x3]  ;;  %s5322_s18 = smov 112  }
   0xe   : > { %s5404_s19 = sshll.u32 %s7370_s6, 5  ;;  %v5068_v27 = vld [vmem:[%s7329_s3] sm:$0xff]  ;;  %v4544_v44 = vld [vmem:[%s7335_s9 + $0xa] sm:$0x3]  ;;  %s5323_s24 = smov 113   ;;  %vm563_vm1 = vcmask 1044344  }
   0xf   : > { %s5410_s22 = scalar_lea.vmem %s7326_s0, %s5404_s19  ;;  %s374_s25 = scalar_lea.vmem %s7327_s1, %s5404_s19  ;;  %v4543_v34 = vld [vmem:[%s7335_s9 + $0x6] sm:$0x3]  ;;  %v5069_v48 = vld [vmem:[%s7329_s3 + $0x8] sm:$0xff]  ;;  %571 = vst.msk [vmem:[#allocation2 + $0x70] sm:$0xf] %vm563_vm1, %v5320_v2  ;;  %vm656_vm2 = vcmask 908288  }
  0x10   : > { %v5067_v5 = vld [vmem:[%s5410_s22 + $0x18] sm:$0xff]  ;;  %v589_v6 = vld [vmem:[%s374_s25] sm:$0xff]  ;;  %v590_v7 = vld [vmem:[%s374_s25 + $0x8] sm:$0xff]  ;;  %s5325_s26 = smov 1   ;;  %s5326_s6 = smov 15   ;;  %vm859_vm3 = vcmask 916480  }
  0x11   : > { %v5420_v8 = vld [vmem:[%s374_s25 + $0x10] sm:$0xff]  ;;  %v5422_v9 = vld [vmem:[%s374_s25 + $0x18] sm:$0xff]  ;;  %593 = vst [vmem:[#allocation2 + $0x44] sm:$0xff] %v589_v6  ;;  %462 = vmatpush.bf16.msra.mxu0 %v5067_v5  ;;  %v5065_v19 = vld [vmem:[%s5410_s22 + $0x8] sm:$0xff]  ;;  %s5324_s25 = smov 127   ;;  %s5327_s20 = smov 17  }
  0x12   : > { %594 = vst [vmem:[#allocation2 + $0x54] sm:$0xff] %v590_v7  ;;  %v5066_v11 = vld [vmem:[%s5410_s22 + $0x10] sm:$0xff]  ;;  %v5064_v23 = vld [vmem:[%s5410_s22] sm:$0xff]  ;;  %v4545_v1 = vld [vmem:[%s7335_s9 + $0xc] sm:$0x3]  ;;  %s5328_s21 = smov 16  }
  0x13   : > { %595 = vst [vmem:[#allocation2 + $0x64] sm:$0xff] %v5420_v8  ;;  %v4546_v5 = vld [vmem:[%s7335_s9 + $0xe] sm:$0x3]  ;;  %vm1263_vm4 = vcmask 1039360   ;;  %vm1061_vm5 = vcmask 924672   ;;  %vm572_vm6 = vcmask 134144  }
  0x14   : > { %v616_v12 = vld [vmem:[#allocation1] sm:$0xff]  ;;  %v617_v13 = vld [vmem:[#allocation1 + $0x9] sm:$0xff]  ;;  %596 = vst [vmem:[#allocation2 + $0x74] sm:$0xff] %v5422_v9  ;;  %vm1373_vm7 = vcmask 7168   ;;  %vm767_vm8 = vcmask 138240   ;;  %vm1171_vm9 = vcmask 121856  }
  0x15   : > { %v618_v14 = vpack.i.b16 %v616_v12, %v616_v12  ;;  %v621_v15 = vpack.i.b16 %v617_v13, %v617_v13  ;;  %404 = vperm.xlu0 %5212, %v394_v4   ;;  %414 = vperm.xlu1 %5213, %v396_v16   ;;  %818 = vst [vmem:[#allocation1] ss:$9 sm:$0xff] %v4541_v10  ;;  %v4547_v10 = vld [vmem:[%s7335_s9 + $0x10] sm:$0x3]  ;;  %vm765_vm10 = vcmask 1043456   ;;  %vm969_vm11 = vcmask 130048  }
  0x16   : > { %463 = vmatpush.bf16.msra.mxu0 %v5066_v11  ;;  %564 = vst.msk [vmem:[#allocation2] sm:$0xf] %vm563_vm1, %v5320_v2 }
  0x17   : > { %v620_v17 = vperm.slane %v618_v14, 0  ;;  %v623_v18 = vperm.slane %v621_v15, 0  ;;  %565 = vst.msk [vmem:[#allocation2 + $0x10] sm:$0xf] %vm563_vm1, %v5320_v2 }
  0x18   : > { %566 = vst.msk [vmem:[#allocation2 + $0x20] sm:$0xf] %vm563_vm1, %v5320_v2 }
  0x19   : > { %v648_v20 = vunpack.c.l.bf16 %v620_v17  ;;  %v649_v21 = vunpack.c.l.bf16 %v623_v18  ;;  %567 = vst.msk [vmem:[#allocation2 + $0x30] sm:$0xf] %vm563_vm1, %v5320_v2 }
  0x1a   : > { %464 = vmatpush.bf16.msra.mxu0 %v5065_v19  ;;  %568 = vst.msk [vmem:[#allocation2 + $0x40] sm:$0xf] %vm563_vm1, %v5320_v2 }
  0x1b   : > { %v5214_v22 = vpack.i.bf16 %v649_v21, %v648_v20  ;;  %569 = vst.msk [vmem:[#allocation2 + $0x50] sm:$0xf] %vm563_vm1, %v5320_v2 }
  0x1c   : > { %v819_v25 = vld [vmem:[#allocation1] sm:$0xff]  ;;  %v820_v26 = vld [vmem:[#allocation1 + $0x9] sm:$0xff]  ;;  %570 = vst.msk [vmem:[#allocation2 + $0x60] sm:$0xf] %vm563_vm1, %v5320_v2 }
  0x1d   : > { %5215 = vrot.lane.b32.xlu0 %v5214_v22, %s5321_s8  ;;  %v821_v28 = vpack.i.b16 %v819_v25, %v819_v25  ;;  %v824_v29 = vpack.i.b16 %v820_v26, %v820_v26  ;;  %1020 = vst [vmem:[#allocation1] ss:$9 sm:$0xff] %v4542_v24  ;;  %v3050_v26 = vld [vmem:[%s7335_s9] sm:$0x3] }
  0x1e   : > { %465 = vmatpush.bf16.msra.mxu0 %v5064_v23  ;;  %580 = vst.msk [vmem:[#allocation2 + $0x7c] sm:$0xf] %vm572_vm6, %v5320_v2 }
  0x1f   : > { %v823_v30 = vperm.slane %v821_v28, 0  ;;  %v826_v31 = vperm.slane %v824_v29, 0  ;;  %573 = vst.msk [vmem:[#allocation2 + $0xc] sm:$0xf] %vm572_vm6, %v5320_v2 }
  0x20   : > { %574 = vst.msk [vmem:[#allocation2 + $0x1c] sm:$0xf] %vm572_vm6, %v5320_v2 }
  0x21   : > { %4531 = vmatmul.msk.bf16.vlgmr.msra.gmra.mxu0 %vm451_vm0, %v5068_v27  ;;  %v851_v32 = vunpack.c.l.bf16 %v823_v30  ;;  %v852_v33 = vunpack.c.l.bf16 %v826_v31  ;;  %575 = vst.msk [vmem:[#allocation2 + $0x2c] sm:$0xf] %vm572_vm6, %v5320_v2 }
  0x22   : > { %576 = vst.msk [vmem:[#allocation2 + $0x3c] sm:$0xf] %vm572_vm6, %v5320_v2 }
  0x23   : > { %v5219_v35 = vpack.i.bf16 %v852_v33, %v851_v32  ;;  %577 = vst.msk [vmem:[#allocation2 + $0x4c] sm:$0xf] %vm572_vm6, %v5320_v2 }
  0x24   : > { %v1021_v36 = vld [vmem:[#allocation1] sm:$0xff]  ;;  %v1022_v37 = vld [vmem:[#allocation1 + $0x9] sm:$0xff]  ;;  %578 = vst.msk [vmem:[#allocation2 + $0x5c] sm:$0xf] %vm572_vm6, %v5320_v2 }
  0x25   : > { %5220 = vrot.lane.b32.xlu2 %v5219_v35, %s5322_s18  ;;  %v1023_v38 = vpack.i.b16 %v1021_v36, %v1021_v36  ;;  %v1026_v39 = vpack.i.b16 %v1022_v37, %v1022_v37  ;;  %1222 = vst [vmem:[#allocation1] ss:$9 sm:$0xff] %v4543_v34  ;;  %v4880_v34 = vld [vmem:[%s7335_s9 + $0x2] sm:$0x3] }
  0x26   : > { %579 = vst.msk [vmem:[#allocation2 + $0x6c] sm:$0xf] %vm572_vm6, %v5320_v2 }
  0x27   : > { %v1025_v40 = vperm.slane %v1023_v38, 0  ;;  %v1028_v41 = vperm.slane %v1026_v39, 0  ;;  %v491_v38 = vld [vmem:[%s7328_s2 + $0x70] sm:$0xff]  ;;  %v492_v39 = vld [vmem:[%s7328_s2 + $0x78] sm:$0xff] }
  0x28   : > { %513 = vmatpush.msra.mxu1 %v491_v38  ;;  %542 = vmatpush.msra.mxu2 %v492_v39 }
  0x29   : > { %v1053_v42 = vunpack.c.l.bf16 %v1025_v40  ;;  %v1054_v43 = vunpack.c.l.bf16 %v1028_v41  ;;  %v489_v40 = vld [vmem:[%s7328_s2 + $0x60] sm:$0xff]  ;;  %v490_v41 = vld [vmem:[%s7328_s2 + $0x68] sm:$0xff] }
  0x2a   : > { %514 = vmatpush.msra.mxu1 %v489_v40  ;;  %543 = vmatpush.msra.mxu2 %v490_v41  ;;  %v609_v40 = vld [vmem:[#allocation2 + $0x60] sm:$0xff] }
  0x2b   : > { %v5224_v45 = vpack.i.bf16 %v1054_v43, %v1053_v42  ;;  %v4881_v42 = vld [vmem:[%s7335_s9 + $0x4] sm:$0x3] }
  0x2c   : > { %v1223_v46 = vld [vmem:[#allocation1] sm:$0xff]  ;;  %v1224_v47 = vld [vmem:[#allocation1 + $0x9] sm:$0xff] }
  0x2d   : > { %5225 = vrot.lane.b32.xlu1 %v5224_v45, %s5323_s24  ;;  %1440 = vst [vmem:[#allocation1] ss:$9 sm:$0xff] %v4544_v44  ;;  %v1225_v49 = vpack.i.b16 %v1223_v46, %v1223_v46  ;;  %v1228_v50 = vpack.i.b16 %v1224_v47, %v1224_v47  ;;  %v487_v45 = vld [vmem:[%s7328_s2 + $0x50] sm:$0xff]  ;;  %v488_v46 = vld [vmem:[%s7328_s2 + $0x58] sm:$0xff]  ;;  %v485_v47 = vld [vmem:[%s7328_s2 + $0x40] sm:$0xff] }
  0x2e   : > { %515 = vmatpush.msra.mxu1 %v487_v45  ;;  %544 = vmatpush.msra.mxu2 %v488_v46  ;;  %v605_v45 = vld [vmem:[#allocation2 + $0x40] sm:$0xff] }
  0x2f   : > { %v1227_v51 = vperm.slane %v1225_v49, 0  ;;  %v1230_v52 = vperm.slane %v1228_v50, 0  ;;  %v483_v49 = vld [vmem:[%s7328_s2 + $0x30] sm:$0xff]  ;;  %v484_v50 = vld [vmem:[%s7328_s2 + $0x38] sm:$0xff] }
  0x30   : > { %516 = vmatpush.msra.mxu1 %v485_v47 }
  0x31   : > { %4532 = vmatmul.msk.bf16.gmra.mxu0 %vm451_vm0, %v5069_v48  ;;  %v1255_v53 = vunpack.c.l.bf16 %v1227_v51  ;;  %v1256_v54 = vunpack.c.l.bf16 %v1230_v52  ;;  %v486_v48 = vld [vmem:[%s7328_s2 + $0x48] sm:$0xff]  ;;  %v481_v51 = vld [vmem:[%s7328_s2 + $0x20] sm:$0xff] }
  0x32   : > { %545 = vmatpush.msra.mxu2 %v486_v48  ;;  %517 = vmatpush.msra.mxu1 %v483_v49  ;;  %v482_v52 = vld [vmem:[%s7328_s2 + $0x28] sm:$0xff]  ;;  %v5609_v49 = vunpack.c.l.bf16 %v609_v40 }
  0x33   : > { %v5229_v55 = vpack.i.bf16 %v1256_v54, %v1255_v53  ;;  %v4882_v53 = vld [vmem:[%s7335_s9 + $0x6] sm:$0x3] }
  0x34   : > { %v1441_v56 = vld [vmem:[#allocation1] sm:$0xff]  ;;  %v1442_v57 = vld [vmem:[#allocation1 + $0x9] sm:$0xff]  ;;  %546 = vmatpush.msra.mxu2 %v484_v50  ;;  %518 = vmatpush.msra.mxu1 %v481_v51  ;;  %v5611_v50 = vunpack.c.h.bf16 %v609_v40 }
  0x35   : > { %v1443_v58 = vpack.i.b16 %v1441_v56, %v1441_v56  ;;  %v1446_v59 = vpack.i.b16 %v1442_v57, %v1442_v57  ;;  %5230 = vrot.lane.b32.xlu2 %v5229_v55, %s5324_s25  ;;  %1642 = vst [vmem:[#allocation1] ss:$9 sm:$0xff] %v4545_v1  ;;  %v479_v57 = vld [vmem:[%s7328_s2 + $0x10] sm:$0xff]  ;;  %v612_v1 = vld [vmem:[#allocation2 + $0x78] sm:$0xf] }
  0x36   : > { %547 = vmatpush.msra.mxu2 %v482_v52  ;;  %519 = vmatpush.msra.mxu1 %v479_v57  ;;  %v5613_v52 = vunpack.c.l.bf16 %v605_v45 }
  0x37   : > { %v1445_v60 = vperm.slane %v1443_v58, 0  ;;  %v1448_v61 = vperm.slane %v1446_v59, 0  ;;  %v480_v58 = vld [vmem:[%s7328_s2 + $0x18] sm:$0xff]  ;;  %v477_v59 = vld [vmem:[%s7328_s2] sm:$0xff] }
  0x38   : > { %548 = vmatpush.msra.mxu2 %v480_v58  ;;  %520 = vmatpush.msra.mxu1 %v477_v59 }
  0x39   : > { %v1473_v62 = vunpack.c.l.bf16 %v1445_v60  ;;  %v1474_v63 = vunpack.c.l.bf16 %v1448_v61  ;;  %v478_v60 = vld [vmem:[%s7328_s2 + $0x8] sm:$0xff] }
  0x3a   : > { %549 = vmatpush.msra.mxu2 %v478_v60  ;;  %v4883_v61 = vld [vmem:[%s7335_s9 + $0xa] sm:$0x3] }
  0x3b   : > { %v5234_v0 = vpack.i.bf16 %v1474_v63, %v1473_v62 }
  0x3c   : > { %v1643_v3 = vld [vmem:[#allocation1] sm:$0xff]  ;;  %v1644_v4 = vld [vmem:[#allocation1 + $0x9] sm:$0xff] }
  0x3d   : > { %5235 = vrot.lane.b32.xlu0 %v5234_v0, %s5325_s26  ;;  %1844 = vst [vmem:[#allocation1] ss:$9 sm:$0xff] %v4546_v5  ;;  %v1645_v11 = vpack.i.b16 %v1643_v3, %v1643_v3  ;;  %v1648_v12 = vpack.i.b16 %v1644_v4, %v1644_v4  ;;  %v610_v3 = vld [vmem:[#allocation2 + $0x68] sm:$0xf]  ;;  %v608_v4 = vld [vmem:[#allocation2 + $0x58] sm:$0xf] }
  0x3e   : > { %v4884_v5 = vld [vmem:[%s7335_s9 + $0xc] sm:$0x3] }
  0x3f   : > { %v1647_v13 = vperm.slane %v1645_v11, 0  ;;  %v1650_v14 = vperm.slane %v1648_v12, 0 }
  0x41   : > { %v1675_v15 = vunpack.c.l.bf16 %v1647_v13  ;;  %v1676_v16 = vunpack.c.l.bf16 %v1650_v14 }
  0x43   : > { %v5239_v17 = vpack.i.bf16 %v1676_v16, %v1675_v15  ;;  %v607_v15 = vld [vmem:[#allocation2 + $0x50] sm:$0xff]  ;;  %v606_v16 = vld [vmem:[#allocation2 + $0x48] sm:$0xf] }
  0x44   : > { %v1845_v6 = vld [vmem:[#allocation1] sm:$0xff]  ;;  %v1846_v7 = vld [vmem:[#allocation1 + $0x9] sm:$0xff] }
  0x45   : > { %2046 = vst [vmem:[#allocation1] ss:$9 sm:$0xff] %v4547_v10  ;;  %5240 = vrot.lane.b32.xlu2 %v5239_v17, %s5326_s6  ;;  %v1847_v22 = vpack.i.b16 %v1845_v6, %v1845_v6  ;;  %v1850_v23 = vpack.i.b16 %v1846_v7, %v1846_v7  ;;  %v647_v6 = vunpack.c.l.bf16 %v612_v1  ;;  %v644_v7 = vunpack.c.l.bf16 %v610_v3 }
  0x46   : > { %v641_v10 = vunpack.c.l.bf16 %v608_v4  ;;  %v808_v4 = vld [vmem:[#allocation2 + $0x48] sm:$0xf] }
  0x47   : > { %v1849_v29 = vperm.slane %v1847_v22, 0  ;;  %v1852_v30 = vperm.slane %v1850_v23, 0  ;;  %v5582_v22 = vunpack.c.l.bf16 %v607_v15  ;;  %v638_v23 = vunpack.c.l.bf16 %v606_v16 }
  0x49   : > { %v1877_v32 = vunpack.c.l.bf16 %v1849_v29  ;;  %v1878_v33 = vunpack.c.l.bf16 %v1852_v30 }
  0x4b   : > { %v5244_v35 = vpack.i.bf16 %v1878_v33, %v1877_v32  ;;  %v814_v32 = vld [vmem:[#allocation2 + $0x78] sm:$0xf] }
  0x4c   : > { %v2047_v18 = vld [vmem:[#allocation1] sm:$0xff]  ;;  %v2048_v19 = vld [vmem:[#allocation1 + $0x9] sm:$0xff] }
  0x4d   : > { %v2049_v20 = vpack.i.b16 %v2047_v18, %v2047_v18  ;;  %v2052_v21 = vpack.i.b16 %v2048_v19, %v2048_v19  ;;  %3052 = vst [vmem:[#allocation1] ss:$9 sm:$0xff] %v3050_v26  ;;  %5245 = vrot.lane.b32.xlu2 %v5244_v35, %s5328_s21 }
  0x4f   : > { %v2051_v24 = vperm.slane %v2049_v20, 0  ;;  %v2054_v25 = vperm.slane %v2052_v21, 0  ;;  %v611_v21 = vld [vmem:[#allocation2 + $0x70] sm:$0xff] }
  0x50   : > { %v5588_v29 = vunpack.c.h.bf16 %v611_v21 }
  0x51   : > { %v2079_v27 = vunpack.c.l.bf16 %v2051_v24  ;;  %v2080_v28 = vunpack.c.l.bf16 %v2054_v25 }
  0x53   : > { %v5249_v31 = vpack.i.bf16 %v2080_v28, %v2079_v27  ;;  %v5584_v27 = vunpack.c.h.bf16 %v607_v15  ;;  %v5586_v28 = vunpack.c.l.bf16 %v611_v21 }
  0x54   : > { %v5482_v36 = vld [vmem:[#allocation1] sm:$0xff]  ;;  %v5484_v37 = vld [vmem:[#allocation1 + $0x9] sm:$0xff] }
  0x55   : > { %5250 = vrot.lane.b32.xlu1 %v5249_v31, %s5327_s20  ;;  %7339 = vst [vmem:[#allocation4_spill] sm:$0xff] %v5482_v36 }
  0x56   : > { %7340 = vst [vmem:[#allocation5_spill] sm:$0xff] %v5484_v37 }
  0x57   : > { %3163 = vst [vmem:[#allocation1] ss:$9 sm:$0xff] %v4880_v34 }
  0x5e   : > { %v5510_v43 = vld [vmem:[#allocation1] sm:$0xff]  ;;  %v5512_v44 = vld [vmem:[#allocation1 + $0x9] sm:$0xff] }
  0x5f   : > { %7341 = vst [vmem:[#allocation6_spill] sm:$0xff] %v5510_v43 }
  0x60   : > { %7342 = vst [vmem:[#allocation7_spill] sm:$0xff] %v5512_v44 }
  0x61   : > { %3274 = vst [vmem:[#allocation1] ss:$9 sm:$0xff] %v4881_v42  ;;  %v850_v42 = vunpack.c.l.bf16 %v814_v32 }
  0x68   : > { %v5543_v55 = vld [vmem:[#allocation1] sm:$0xff]  ;;  %v5545_v56 = vld [vmem:[#allocation1 + $0x9] sm:$0xff] }
  0x69   : > { %7343 = vst [vmem:[#allocation8_spill] sm:$0xff] %v5543_v55 }
  0x6a   : > { %7344 = vst [vmem:[#allocation9_spill] sm:$0xff] %v5545_v56 }
  0x6b   : > { %3385 = vst [vmem:[#allocation1] ss:$9 sm:$0xff] %v4882_v53  ;;  %v5615_v53 = vunpack.c.h.bf16 %v605_v45 }
  0x72   : > { %v5564_v63 = vld [vmem:[#allocation1] sm:$0xff]  ;;  %v5566_v0 = vld [vmem:[#allocation1 + $0x9] sm:$0xff] }
  0x73   : > { %7345 = vst [vmem:[#allocation10_spill] sm:$0xff] %v5566_v0 }
  0x74   : > { %3504 = vst [vmem:[#allocation1] ss:$9 sm:$0xff] %v4883_v61 }
  0x7b   : > { %v5571_v11 = vld [vmem:[#allocation1] sm:$0xff]  ;;  %v5573_v12 = vld [vmem:[#allocation1 + $0x9] sm:$0xff] }
  0x7c   : > { %7346 = vst [vmem:[#allocation11_spill] sm:$0xff] %v5571_v11  ;;  %v1837_v11 = vld [vmem:[#allocation2 + $0x64] sm:$0xff] }
  0x7d   : > { %7347 = vst [vmem:[#allocation12_spill] sm:$0xff] %v5573_v12 }
  0x7e   : > { %3615 = vst [vmem:[#allocation1] ss:$9 sm:$0xff] %v4884_v5  ;;  %v810_v5 = vld [vmem:[#allocation2 + $0x58] sm:$0xf] }
  0x7f   : > { %v5541_v54 = vpop.permute.xlu0 %399  ;;  %v5221_v31 = vpop.permute.xlu2 %5220 }
  0x80   : > { %v5607_v41 = vunpack.i.h.bf16 %v5221_v31  ;;  %v410_v48 = vpop.permute.xlu1 %409 }
  0x82   : > { %v887_v57 = vmul.f32 %v5607_v41, %v850_v42 }
  0x87   : > { %v5562_v62 = vpop.permute.xlu0 %404 }
  0x8f   : > { %v5216_v13 = vpop.permute.xlu0 %5215 }
  0x90   : > { %v5575_v14 = vunpack.i.h.bf16 %v5216_v13  ;;  %v5577_v17 = vunpack.i.l.bf16 %v5216_v13  ;;  %v844_v13 = vunpack.c.l.bf16 %v810_v5 }
  0x92   : > { %v684_v18 = vmul.f32 %v5575_v14, %v647_v6  ;;  %v681_v19 = vmul.f32 %v5575_v14, %v644_v7  ;;  %v678_v20 = vmul.f32 %v5575_v14, %v641_v10  ;;  %v5593_v30 = vsel %vm656_vm2, %v5577_v17, %v5575_v14 }
  0x93   : > { %v676_v33 = vmul.f32 %v5577_v17, %v5582_v22  ;;  %v677_v34 = vmul.f32 %v5593_v30, %v5584_v27  ;;  %v675_v35 = vmul.f32 %v5575_v14, %v638_v23  ;;  %v682_v38 = vmul.f32 %v5577_v17, %v5586_v28 }
  0x94   : > { %v700_v24 = vpack.c.bf16 %v684_v18, %v684_v18  ;;  %v698_v25 = vpack.c.bf16 %v681_v19, %v681_v19  ;;  %v696_v26 = vpack.c.bf16 %v678_v20, %v678_v20  ;;  %v683_v39 = vmul.f32 %v5593_v30, %v5588_v29  ;;  %v415_v18 = vpop.permute.xlu1 %414 }
  0x95   : > { %v695_v46 = vpack.c.bf16 %v677_v34, %v676_v33  ;;  %v694_v47 = vpack.c.bf16 %v675_v35, %v675_v35  ;;  %v679_v60 = vmul.f32 %v5577_v17, %v5609_v49  ;;  %v680_v61 = vmul.f32 %v5593_v30, %v5611_v50  ;;  %v1012_v34 = vld [vmem:[#allocation2 + $0x58] sm:$0xf]  ;;  %v5231_v35 = vpop.permute.xlu2 %5230 }
  0x96   : > { %747 = vrot.lane.b32.xlu0 %v700_v24, %s5327_s20  ;;  %743 = vrot.lane.b32.xlu1 %v698_v25, %s5327_s20  ;;  %v699_v51 = vpack.c.bf16 %v683_v39, %v682_v38  ;;  %v673_v1 = vmul.f32 %v5577_v17, %v5613_v52  ;;  %v674_v3 = vmul.f32 %v5593_v30, %v5615_v53  ;;  %v841_v10 = vunpack.c.l.bf16 %v808_v4 }
  0x97   : > { %739 = vrot.lane.b32.xlu2 %v696_v26, %s5327_s20  ;;  %v903_v6 = vpack.c.bf16 %v887_v57, %v887_v57  ;;  %v697_v7 = vpack.c.bf16 %v680_v61, %v679_v60  ;;  %v881_v23 = vmul.f32 %v5607_v41, %v844_v13  ;;  %v5638_v24 = vunpack.i.l.bf16 %v5221_v31  ;;  %v1016_v57 = vld [vmem:[#allocation2 + $0x78] sm:$0xf] }
  0x98   : > { %v693_v15 = vpack.c.bf16 %v674_v3, %v673_v1  ;;  %v878_v21 = vmul.f32 %v5607_v41, %v841_v10  ;;  %v5665_v60 = vunpack.i.h.bf16 %v5231_v35  ;;  %v5667_v61 = vunpack.i.l.bf16 %v5231_v35 }
  0x99   : > { %v899_v32 = vpack.c.bf16 %v881_v23, %v881_v23  ;;  %v882_v39 = vmul.f32 %v5638_v24, %v5609_v49  ;;  %v885_v40 = vmul.f32 %v5638_v24, %v5586_v28  ;;  %v879_v42 = vmul.f32 %v5638_v24, %v5582_v22 }
  0x9a   : > { %v897_v26 = vpack.c.bf16 %v878_v21, %v878_v21  ;;  %v5719_v35 = vmul.f32 %v5667_v61, %v5613_v52 }
  0x9e   : > { %737 = vrot.lane.b32.xlu1 %v695_v46, %s5327_s20  ;;  %735 = vrot.lane.b32.xlu0 %v694_v47, %s5327_s20  ;;  %v467_v58 = vpop.f32.mrf.mxu0 }
  0x9f   : > { %745 = vrot.lane.b32.xlu2 %v699_v51, %s5327_s20  ;;  %v468_v59 = vadd.f32 %v467_v58, %v5541_v54  ;;  %v812_v54 = vld [vmem:[#allocation2 + $0x68] sm:$0xf]  ;;  %v5226_v31 = vpop.permute.xlu1 %5225 }
  0xa0   : > { %v847_v16 = vunpack.c.l.bf16 %v812_v54  ;;  %v5663_v58 = vunpack.i.h.bf16 %v5226_v31  ;;  %v5681_v54 = vmul.f32 %v5667_v61, %v5582_v22  ;;  %v5701_v23 = vunpack.i.l.bf16 %v5226_v31 }
  0xa1   : > { %4533 = vmatmul.msk.f32.vlgmr.msra.gmra.mxu1 %vm451_vm0, %v468_v59  ;;  %4537 = vmatmul.msk.f32.vlgmr.msra.gmra.mxu2 %vm451_vm0, %v468_v59  ;;  %v1046_v59 = vunpack.c.l.bf16 %v1012_v34  ;;  %v5711_v34 = vmul.f32 %v5667_v61, %v5609_v49 }
  0xa2   : > { %v884_v25 = vmul.f32 %v5607_v41, %v847_v16  ;;  %v1081_v2 = vmul.f32 %v5701_v23, %v5582_v22 }
  0xa3   : > { %v1083_v5 = vmul.f32 %v5663_v58, %v1046_v59 }
  0xa4   : > { %v901_v33 = vpack.c.bf16 %v884_v25, %v884_v25 }
  0xa5   : > { %v1101_v25 = vpack.c.bf16 %v1083_v5, %v1083_v5  ;;  %v1218_v5 = vld [vmem:[#allocation2 + $0x78] sm:$0xf] }
  0xa6   : > { %950 = vrot.lane.b32.xlu1 %v903_v6, %s5328_s21  ;;  %741 = vrot.lane.b32.xlu0 %v697_v7, %s5327_s20  ;;  %v469_v19 = vpop.f32.mrf.mxu0  ;;  %v5675_v6 = vsel %vm1263_vm4, %v5667_v61, %v5665_v60 }
  0xa7   : > { %733 = vrot.lane.b32.xlu2 %v693_v15, %s5327_s20  ;;  %v470_v20 = vadd.f32 %v469_v19, %v5562_v62  ;;  %v5646_v62 = vsel %vm859_vm3, %v5638_v24, %v5607_v41  ;;  %v5687_v13 = vmul.f32 %v5675_v6, %v5584_v27  ;;  %v5691_v15 = vmul.f32 %v5667_v61, %v5586_v28 }
  0xa8   : > { %v883_v46 = vmul.f32 %v5646_v62, %v5611_v50  ;;  %v886_v47 = vmul.f32 %v5646_v62, %v5588_v29  ;;  %v880_v51 = vmul.f32 %v5646_v62, %v5584_v27  ;;  %v5695_v16 = vmul.f32 %v5675_v6, %v5588_v29 }
  0xa9   : > { %4534 = vmatmul.msk.f32.gmra.mxu1 %vm451_vm0, %v470_v20  ;;  %4538 = vmatmul.msk.f32.gmra.mxu2 %vm451_vm0, %v470_v20  ;;  %v876_v20 = vmul.f32 %v5638_v24, %v5613_v52  ;;  %v877_v21 = vmul.f32 %v5646_v62, %v5615_v53  ;;  %v5715_v31 = vmul.f32 %v5675_v6, %v5611_v50 }
  0xaa   : > { %v900_v1 = vpack.c.bf16 %v883_v46, %v882_v39  ;;  %v902_v3 = vpack.c.bf16 %v886_v47, %v885_v40  ;;  %v898_v4 = vpack.c.bf16 %v880_v51, %v879_v42  ;;  %v5723_v39 = vmul.f32 %v5675_v6, %v5615_v53 }
  0xab   : > { %v896_v40 = vpack.c.bf16 %v877_v21, %v876_v20  ;;  %v5732_v46 = vsel %vm1061_vm5, %v5701_v23, %v5663_v58  ;;  %v1214_v20 = vld [vmem:[#allocation2 + $0x58] sm:$0xf]  ;;  %v1084_v21 = vmul.f32 %v5701_v23, %v5609_v49 }
  0xac   : > { %v1300_v51 = vpack.c.bf16 %v5723_v39, %v5719_v35  ;;  %v1088_v59 = vmul.f32 %v5732_v46, %v5588_v29  ;;  %v1216_v29 = vld [vmem:[#allocation2 + $0x68] sm:$0xf] }
  0xae   : > { %938 = vrot.lane.b32.xlu1 %v897_v26, %s5328_s21  ;;  %942 = vrot.lane.b32.xlu0 %v899_v32, %s5328_s21  ;;  %v472_v38 = vpop.f32.mrf.mxu0  ;;  %v1014_v26 = vld [vmem:[#allocation2 + $0x68] sm:$0xf]  ;;  %v1302_v32 = vpack.c.bf16 %v5687_v13, %v5681_v54 }
  0xaf   : > { %946 = vrot.lane.b32.xlu2 %v901_v33, %s5328_s21  ;;  %v473_v45 = vadd.f32 %v472_v38, %v410_v48  ;;  %v1052_v48 = vunpack.c.l.bf16 %v1016_v57  ;;  %v1306_v33 = vpack.c.bf16 %v5695_v16, %v5691_v15  ;;  %v1049_v42 = vunpack.c.l.bf16 %v1014_v26 }
  0xb0   : > { %v1087_v57 = vmul.f32 %v5701_v23, %v5586_v28  ;;  %v1251_v26 = vunpack.c.l.bf16 %v1216_v29 }
  0xb1   : > { %4535 = vmatmul.msk.f32.gmra.mxu1 %vm451_vm0, %v473_v45  ;;  %4539 = vmatmul.msk.f32.gmra.mxu2 %vm451_vm0, %v473_v45  ;;  %v1089_v10 = vmul.f32 %v5663_v58, %v1052_v48  ;;  %v1304_v45 = vpack.c.bf16 %v5715_v31, %v5711_v34  ;;  %v1086_v48 = vmul.f32 %v5663_v58, %v1049_v42 }
  0xb2   : > { %v1104_v28 = vpack.c.bf16 %v1088_v59, %v1087_v57  ;;  %v1288_v22 = vmul.f32 %v5665_v60, %v1251_v26 }
  0xb3   : > { %v1105_v38 = vpack.c.bf16 %v1089_v10, %v1089_v10  ;;  %v1079_v10 = vmul.f32 %v5732_v46, %v5615_v53  ;;  %v1212_v53 = vld [vmem:[#allocation2 + $0x48] sm:$0xf] }
  0xb4   : > { %v1245_v59 = vunpack.c.l.bf16 %v1212_v53 }
  0xb6   : > { %944 = vrot.lane.b32.xlu1 %v900_v1, %s5328_s21  ;;  %948 = vrot.lane.b32.xlu0 %v902_v3, %s5328_s21  ;;  %v474_v7 = vpop.f32.mrf.mxu0  ;;  %v1103_v3 = vpack.c.bf16 %v1086_v48, %v1086_v48  ;;  %v5236_v48 = vpop.permute.xlu0 %5235 }
  0xb7   : > { %940 = vrot.lane.b32.xlu2 %v898_v4, %s5328_s21  ;;  %v475_v19 = vadd.f32 %v474_v7, %v415_v18  ;;  %v1010_v18 = vld [vmem:[#allocation2 + $0x48] sm:$0xf]  ;;  %v1078_v7 = vmul.f32 %v5701_v23, %v5613_v52  ;;  %v5810_v35 = vunpack.i.l.bf16 %v5236_v48 }
  0xb8   : > { %v1043_v47 = vunpack.c.l.bf16 %v1010_v18  ;;  %v1254_v18 = vunpack.c.l.bf16 %v1218_v5  ;;  %v5241_v5 = vpop.permute.xlu2 %5240 }
  0xb9   : > { %4536 = vmatmul.msk.f32.gmra.mxu1 %vm451_vm0, %v475_v19  ;;  %4540 = vmatmul.msk.f32.gmra.mxu2 %vm451_vm0, %v475_v19  ;;  %v1082_v19 = vmul.f32 %v5732_v46, %v5584_v27  ;;  %v1098_v52 = vpack.c.bf16 %v1079_v10, %v1078_v7  ;;  %v1432_v10 = vld [vmem:[#allocation2 + $0x5c] sm:$0xf]  ;;  %v5814_v39 = vunpack.i.h.bf16 %v5241_v5 }
  0xba   : > { %v1080_v1 = vmul.f32 %v5663_v58, %v1043_v47  ;;  %v1291_v27 = vmul.f32 %v5665_v60, %v1254_v18  ;;  %v1430_v18 = vld [vmem:[#allocation2 + $0x4c] sm:$0xf] }
  0xbc   : > { %v1099_v4 = vpack.c.bf16 %v1080_v1, %v1080_v1  ;;  %v1307_v47 = vpack.c.bf16 %v1291_v27, %v1291_v27  ;;  %v1436_v1 = vld [vmem:[#allocation2 + $0x7c] sm:$0xf]  ;;  %v5821_v27 = vunpack.i.l.bf16 %v5241_v5 }
  0xbe   : > { %1144 = vrot.lane.b32.xlu1 %v1101_v25, %s5326_s6  ;;  %936 = vrot.lane.b32.xlu0 %v896_v40, %s5328_s21  ;;  %v1085_v25 = vmul.f32 %v5732_v46, %v5611_v50  ;;  %v1100_v40 = vpack.c.bf16 %v1082_v19, %v1081_v2  ;;  %v1305_v50 = vpack.c.bf16 %v1288_v22, %v1288_v22  ;;  %v1428_v2 = vld [vmem:[#allocation2 + $0x3c] sm:$0xf] }
  0xbf   : > { %1152 = vrot.lane.b32.xlu2 %v1105_v38, %s5326_s6  ;;  %v1248_v38 = vunpack.c.l.bf16 %v1214_v20  ;;  %v1434_v20 = vld [vmem:[#allocation2 + $0x6c] sm:$0xf] }
  0xc0   : > { %v1102_v42 = vpack.c.bf16 %v1085_v25, %v1084_v21  ;;  %v1466_v21 = vunpack.c.l.bf16 %v1432_v10  ;;  %v1460_v25 = vunpack.c.l.bf16 %v1428_v2  ;;  %v1469_v26 = vunpack.c.l.bf16 %v1434_v20  ;;  %v5805_v54 = vpop.permute.xlu2 %5245  ;;  %v1431_v2 = vld [vmem:[#allocation2 + $0x54] sm:$0xff] }
  0xc1   : > { %v1285_v49 = vmul.f32 %v5665_v60, %v1248_v38  ;;  %v5838_v5 = vunpack.i.h.bf16 %v5805_v54 }
  0xc3   : > { %v1303_v57 = vpack.c.bf16 %v1285_v49, %v1285_v49 }
  0xc6   : > { %1150 = vrot.lane.b32.xlu1 %v1104_v28, %s5326_s6  ;;  %1148 = vrot.lane.b32.xlu0 %v1103_v3, %s5326_s6  ;;  %v1282_v28 = vmul.f32 %v5665_v60, %v1245_v59  ;;  %v5784_v3 = vunpack.i.h.bf16 %v5236_v48  ;;  %v1467_v48 = vunpack.c.l.bf16 %v5420_v8 }
  0xc7   : > { %1140 = vrot.lane.b32.xlu2 %v1099_v4, %s5326_s6  ;;  %v1472_v4 = vunpack.c.l.bf16 %v1436_v1  ;;  %v1468_v1 = vunpack.c.h.bf16 %v5420_v8 }
  0xc8   : > { %v1301_v29 = vpack.c.bf16 %v1282_v28, %v1282_v28  ;;  %v1503_v13 = vmul.f32 %v5784_v3, %v1466_v21  ;;  %v1497_v15 = vmul.f32 %v5784_v3, %v1460_v25  ;;  %v1506_v16 = vmul.f32 %v5784_v3, %v1469_v26 }
  0xc9   : > { %v1509_v7 = vmul.f32 %v5784_v3, %v1472_v4  ;;  %v5833_v28 = vsel %vm1373_vm7, %v5810_v35, %v5784_v3  ;;  %v1470_v4 = vunpack.c.l.bf16 %v5422_v9  ;;  %v1504_v26 = vmul.f32 %v5810_v35, %v1467_v48 }
  0xca   : > { %v1521_v38 = vpack.c.bf16 %v1503_v13, %v1503_v13  ;;  %v1505_v13 = vmul.f32 %v5833_v28, %v1468_v1 }
  0xcb   : > { %v1525_v19 = vpack.c.bf16 %v1509_v7, %v1509_v7 }
  0xcc   : > { %v1522_v1 = vpack.c.bf16 %v1505_v13, %v1504_v26  ;;  %v1832_v13 = vld [vmem:[#allocation2 + $0x3c] sm:$0xf] }
  0xce   : > { %1138 = vrot.lane.b32.xlu1 %v1098_v52, %s5326_s6  ;;  %1142 = vrot.lane.b32.xlu0 %v1100_v40, %s5326_s6  ;;  %v1517_v52 = vpack.c.bf16 %v1497_v15, %v1497_v15  ;;  %v1523_v40 = vpack.c.bf16 %v1506_v16, %v1506_v16  ;;  %v5858_v15 = vunpack.c.l.bf16 %v1431_v2 }
  0xcf   : > { %1146 = vrot.lane.b32.xlu2 %v1102_v42, %s5326_s6  ;;  %v1463_v42 = vunpack.c.l.bf16 %v1430_v18  ;;  %v5870_v18 = vunpack.c.h.bf16 %v1431_v2  ;;  %v1838_v2 = vld [vmem:[#allocation2 + $0x6c] sm:$0xf] }
  0xd1   : > { %v1500_v59 = vmul.f32 %v5784_v3, %v1463_v42  ;;  %v1502_v26 = vmul.f32 %v5833_v28, %v5870_v18 }
  0xd3   : > { %v1519_v25 = vpack.c.bf16 %v1500_v59, %v1500_v59 }
  0xd6   : > { %1350 = vrot.lane.b32.xlu1 %v1305_v50, %s5325_s26  ;;  %1354 = vrot.lane.b32.xlu0 %v1307_v47, %s5325_s26  ;;  %v1840_v50 = vld [vmem:[#allocation2 + $0x7c] sm:$0xf]  ;;  %v1429_v47 = vld [vmem:[#allocation2 + $0x44] sm:$0xff] }
  0xd7   : > { %1346 = vrot.lane.b32.xlu2 %v1303_v57, %s5325_s26  ;;  %v1876_v7 = vunpack.c.l.bf16 %v1840_v50  ;;  %v5840_v10 = vunpack.c.l.bf16 %v1429_v47  ;;  %v5847_v21 = vunpack.c.h.bf16 %v1429_v47 }
  0xde   : > { %1344 = vrot.lane.b32.xlu1 %v1302_v32, %s5325_s26  ;;  %1342 = vrot.lane.b32.xlu0 %v1301_v29, %s5325_s26  ;;  %v1426_v32 = vld [vmem:[#allocation2 + $0x2c] sm:$0xf]  ;;  %v1471_v29 = vunpack.c.h.bf16 %v5422_v9  ;;  %v5852_v9 = vsel %vm1171_vm9, %v5821_v27, %v5814_v39 }
  0xdf   : > { %1352 = vrot.lane.b32.xlu2 %v1306_v33, %s5325_s26  ;;  %v1422_v33 = vld [vmem:[#allocation2 + $0xc] sm:$0xf]  ;;  %v1457_v34 = vunpack.c.l.bf16 %v1426_v32 }
  0xe0   : > { %v1451_v31 = vunpack.c.l.bf16 %v1422_v33  ;;  %v1913_v33 = vmul.f32 %v5838_v5, %v1876_v7  ;;  %v1828_v7 = vld [vmem:[#allocation2 + $0x1c] sm:$0xf] }
  0xe1   : > { %v1494_v49 = vmul.f32 %v5784_v3, %v1457_v34  ;;  %v1507_v34 = vmul.f32 %v5810_v35, %v1470_v4 }
  0xe2   : > { %v1488_v53 = vmul.f32 %v5784_v3, %v1451_v31  ;;  %v1508_v31 = vmul.f32 %v5833_v28, %v1471_v29  ;;  %v1929_v47 = vpack.c.bf16 %v1913_v33, %v1913_v33 }
  0xe4   : > { %v1511_v20 = vpack.c.bf16 %v1488_v53, %v1488_v53  ;;  %v1524_v4 = vpack.c.bf16 %v1508_v31, %v1507_v34  ;;  %v1858_v34 = vunpack.c.l.bf16 %v1828_v7  ;;  %v1873_v31 = vunpack.c.l.bf16 %v1838_v2 }
  0xe6   : > { %1572 = vrot.lane.b32.xlu1 %v1525_v19, %s5324_s25  ;;  %1348 = vrot.lane.b32.xlu0 %v1304_v45, %s5325_s26  ;;  %v5251_v45 = vpop.permute.xlu1 %5250  ;;  %v1515_v19 = vpack.c.bf16 %v1494_v49, %v1494_v49  ;;  %v1910_v48 = vmul.f32 %v5838_v5, %v1873_v31 }
  0xe7   : > { %1340 = vrot.lane.b32.xlu2 %v1300_v51, %s5325_s26  ;;  %v5817_v51 = vunpack.i.h.bf16 %v5251_v45  ;;  %v5819_v22 = vunpack.i.l.bf16 %v5251_v45  ;;  %v1836_v45 = vld [vmem:[#allocation2 + $0x5c] sm:$0xf] }
  0xe8   : > { %v1870_v59 = vunpack.c.l.bf16 %v1836_v45 }
  0xe9   : > { %v5845_v8 = vsel %vm767_vm8, %v5819_v22, %v5817_v51  ;;  %v5862_v16 = vmul.f32 %v5819_v22, %v5840_v10  ;;  %v5886_v42 = vmul.f32 %v5819_v22, %v5858_v15 }
  0xea   : > { %v5866_v32 = vmul.f32 %v5845_v8, %v5847_v21  ;;  %v5892_v50 = vmul.f32 %v5845_v8, %v5870_v18  ;;  %v1907_v29 = vmul.f32 %v5838_v5, %v1870_v59 }
  0xec   : > { %v1925_v45 = vpack.c.bf16 %v1907_v29, %v1907_v29  ;;  %v5917_v29 = vunpack.i.l.bf16 %v5805_v54 }
  0xee   : > { %1564 = vrot.lane.b32.xlu1 %v1521_v38, %s5324_s25  ;;  %1556 = vrot.lane.b32.xlu0 %v1517_v52, %s5324_s25  ;;  %v5874_v38 = vmul.f32 %v5821_v27, %v5840_v10  ;;  %v5878_v52 = vmul.f32 %v5852_v9, %v5847_v21  ;;  %v5926_v54 = vsel %vm969_vm11, %v5917_v29, %v5838_v5 }
  0xef   : > { %1568 = vrot.lane.b32.xlu2 %v1523_v40, %s5324_s25 }
  0xf1   : > { %v5825_v57 = vpop.permute.xlu2 %739 }
  0xf6   : > { %1552 = vrot.lane.b32.xlu1 %v1515_v19, %s5324_s25  ;;  %1544 = vrot.lane.b32.xlu0 %v1511_v20, %s5324_s25  ;;  %v1498_v19 = vmul.f32 %v5810_v35, %v5840_v10  ;;  %v1499_v20 = vmul.f32 %v5833_v28, %v5847_v21 }
  0xf7   : > { %1560 = vrot.lane.b32.xlu2 %v1519_v25, %s5324_s25  ;;  %v1501_v25 = vmul.f32 %v5810_v35, %v5858_v15 }
  0xf8   : > { %v1518_v59 = vpack.c.bf16 %v1499_v20, %v1498_v19 }
  0xf9   : > { %v746_v49 = vpop.permute.xlu2 %745 }
  0xfa   : > { %v763_v2 = vrot.slane %v746_v49, 4 }
  0xfe   : > { %1566 = vrot.lane.b32.xlu1 %v1522_v1, %s5324_s25  ;;  %1570 = vrot.lane.b32.xlu0 %v1524_v4, %s5324_s25  ;;  %v1520_v1 = vpack.c.bf16 %v1502_v26, %v1501_v25  ;;  %v1895_v4 = vmul.f32 %v5838_v5, %v1858_v34  ;;  %v1834_v25 = vld [vmem:[#allocation2 + $0x4c] sm:$0xf]  ;;  %v1927_v34 = vpack.c.bf16 %v1910_v48, %v1910_v48 }
  0xff   : > { %1976 = vrot.lane.b32.xlu2 %v1929_v47, %s5322_s18  ;;  %v1864_v47 = vunpack.c.l.bf16 %v1832_v13  ;;  %v1826_v26 = vld [vmem:[#allocation2 + $0xc] sm:$0xf] }
 0x100   : > { %v1917_v13 = vpack.c.bf16 %v1895_v4, %v1895_v4  ;;  %v1855_v44 = vunpack.c.l.bf16 %v1826_v26  ;;  %v1636_v26 = vld [vmem:[#allocation2 + $0x6c] sm:$0xf] }
 0x101   : > { %v734_v33 = vpop.permute.xlu2 %733  ;;  %v1901_v53 = vmul.f32 %v5838_v5, %v1864_v47  ;;  %v1839_v47 = vld [vmem:[#allocation2 + $0x74] sm:$0xff]  ;;  %v1671_v36 = vunpack.c.l.bf16 %v1636_v26 }
 0x102   : > { %v5932_v48 = vunpack.c.h.bf16 %v1839_v47 }
 0x106   : > { %1558 = vrot.lane.b32.xlu1 %v1518_v59, %s5324_s25  ;;  %1562 = vrot.lane.b32.xlu0 %v1520_v1, %s5324_s25  ;;  %v1867_v1 = vunpack.c.l.bf16 %v1834_v25  ;;  %v1892_v25 = vmul.f32 %v5838_v5, %v1855_v44 }
 0x107   : > { %1968 = vrot.lane.b32.xlu2 %v1925_v45, %s5322_s18  ;;  %v1921_v45 = vpack.c.bf16 %v1901_v53, %v1901_v53 }
 0x108   : > { %v748_v40 = vpop.permute.xlu0 %747  ;;  %v5914_v7 = vpop.permute.xlu1 %743  ;;  %v1915_v0 = vpack.c.bf16 %v1892_v25, %v1892_v25 }
 0x109   : > { %v764_v19 = vrot.slane %v748_v40, 4  ;;  %v5919_v20 = vpop.permute.xlu2 %946  ;;  %v5930_v40 = vunpack.c.l.bf16 %v1839_v47 }
 0x10b   : > { %v781_v31 = vsel %vm765_vm10, %v763_v2, %v764_v19  ;;  %v1911_v4 = vmul.f32 %v5917_v29, %v5930_v40  ;;  %v1912_v2 = vmul.f32 %v5926_v54, %v5932_v48  ;;  %v1904_v19 = vmul.f32 %v5838_v5, %v1867_v1 }
 0x10c   : > { %v782_v59 = vsel %vm767_vm8, %v746_v49, %v781_v31  ;;  %v757_v31 = vrot.slane %v734_v33, 4 }
 0x10d   : > { %798 = vst [vmem:[#allocation3 + $0x38] sm:$0xff] %v782_v59  ;;  %v1928_v12 = vpack.c.bf16 %v1912_v2, %v1911_v4  ;;  %v1923_v44 = vpack.c.bf16 %v1904_v19, %v1904_v19 }
 0x10e   : > { %1952 = vrot.lane.b32.xlu1 %v1917_v13, %s5322_s18  ;;  %1972 = vrot.lane.b32.xlu0 %v1927_v34, %s5322_s18  ;;  %v1830_v13 = vld [vmem:[#allocation2 + $0x2c] sm:$0xf]  ;;  %v760_v34 = vrot.slane %v5825_v57, 4  ;;  %v1871_v57 = vunpack.c.l.bf16 %v1837_v11 }
 0x10f   : > { %1960 = vrot.lane.b32.xlu2 %v1921_v45, %s5322_s18  ;;  %v1861_v56 = vunpack.c.l.bf16 %v1830_v13 }
 0x110   : > { %v738_v53 = vpop.permute.xlu1 %737  ;;  %v736_v49 = vpop.permute.xlu0 %735 }
 0x111   : > { %v759_v47 = vrot.slane %v738_v53, 4  ;;  %v758_v59 = vrot.slane %v736_v49, 4  ;;  %v941_v45 = vpop.permute.xlu2 %940  ;;  %v1872_v49 = vunpack.c.h.bf16 %v1837_v11 }
 0x113   : > { %v777_v43 = vsel %vm765_vm10, %v759_v47, %v760_v34  ;;  %v775_v37 = vsel %vm765_vm10, %v757_v31, %v758_v59  ;;  %v1909_v4 = vmul.f32 %v5926_v54, %v1872_v49  ;;  %v1906_v34 = vmul.f32 %v5926_v54, %v5870_v18  ;;  %v1424_v59 = vld [vmem:[#allocation2 + $0x1c] sm:$0xf] }
 0x114   : > { %v778_v55 = vsel %vm767_vm8, %v738_v53, %v777_v43  ;;  %v776_v1 = vsel %vm767_vm8, %v734_v33, %v775_v37  ;;  %v1708_v43 = vmul.f32 %v5814_v39, %v1671_v36  ;;  %v1898_v37 = vmul.f32 %v5838_v5, %v1861_v56 }
 0x115   : > { %796 = vst [vmem:[#allocation3 + $0x28] sm:$0xff] %v778_v55  ;;  %v762_v33 = vrot.slane %v5914_v7, 4  ;;  %v1905_v7 = vmul.f32 %v5917_v29, %v5858_v15  ;;  %v1706_v31 = vmul.f32 %v5821_v27, %v1871_v57  ;;  %v1707_v47 = vmul.f32 %v1872_v49, %v5852_v9 }
 0x116   : > { %795 = vst [vmem:[#allocation3 + $0x20] sm:$0xff] %v776_v1  ;;  %1974 = vrot.lane.b32.xlu1 %v1928_v12, %s5322_s18  ;;  %1964 = vrot.lane.b32.xlu0 %v1923_v44, %s5322_s18  ;;  %v1908_v12 = vmul.f32 %v5917_v29, %v1871_v57  ;;  %v1725_v2 = vpack.c.bf16 %v1708_v43, %v1708_v43  ;;  %v962_v1 = vrot.slane %v941_v45, 4 }
 0x117   : > { %1948 = vrot.lane.b32.xlu2 %v1915_v0, %s5322_s18  ;;  %v1919_v19 = vpack.c.bf16 %v1898_v37, %v1898_v37  ;;  %v1902_v43 = vmul.f32 %v5917_v29, %v5840_v10  ;;  %v1903_v37 = vmul.f32 %v5926_v54, %v5847_v21 }
 0x118   : > { %v5949_v26 = vpop.permute.xlu1 %950  ;;  %v742_v13 = vpop.permute.xlu0 %741  ;;  %v1926_v25 = vpack.c.bf16 %v1909_v4, %v1908_v12  ;;  %v1454_v12 = vunpack.c.l.bf16 %v1424_v59  ;;  %v965_v59 = vrot.slane %v5919_v20, 4 }
 0x119   : > { %v761_v55 = vrot.slane %v742_v13, 4  ;;  %v5954_v53 = vpop.permute.xlu2 %1152 }
 0x11b   : > { %v779_v0 = vsel %vm765_vm10, %v761_v55, %v762_v33  ;;  %v1638_v33 = vld [vmem:[#allocation2 + $0x7c] sm:$0xf] }
 0x11c   : > { %v780_v11 = vsel %vm767_vm8, %v742_v13, %v779_v0  ;;  %v1924_v0 = vpack.c.bf16 %v1906_v34, %v1905_v7  ;;  %v2111_v7 = vmul.f32 %v5845_v8, %v1872_v49 }
 0x11d   : > { %797 = vst [vmem:[#allocation3 + $0x30] sm:$0xff] %v780_v11  ;;  %v1724_v11 = vpack.c.bf16 %v1707_v47, %v1706_v31  ;;  %v1491_v31 = vmul.f32 %v5784_v3, %v1454_v12  ;;  %v2042_v47 = vld [vmem:[#allocation2 + $0x7c] sm:$0xf] }
 0x11e   : > { %1770 = vrot.lane.b32.xlu1 %v1725_v2, %s5323_s24  ;;  %1956 = vrot.lane.b32.xlu0 %v1919_v19, %s5322_s18  ;;  %v522_v36 = vpop.f32.mrf.mxu1  ;;  %v1674_v2 = vunpack.c.l.bf16 %v1638_v33  ;;  %v1922_v19 = vpack.c.bf16 %v1903_v37, %v1902_v43  ;;  %v2078_v33 = vunpack.c.l.bf16 %v2042_v47  ;;  %v1710_v47 = vmul.f32 %v5932_v48, %v5852_v9 }
 0x11f   : > { %1970 = vrot.lane.b32.xlu2 %v1926_v25, %s5322_s18 }
 0x120   : > { %v5963_v56 = vpop.permute.xlu1 %938  ;;  %v943_v5 = vpop.permute.xlu0 %942  ;;  %v1711_v34 = vmul.f32 %v5814_v39, %v1674_v2 }
 0x121   : > { %v963_v44 = vrot.slane %v943_v5, 4  ;;  %v5971_v13 = vpop.permute.xlu2 %1140 }
 0x122   : > { %v1727_v20 = vpack.c.bf16 %v1711_v34, %v1711_v34 }
 0x123   : > { %v979_v55 = vsel %vm765_vm10, %v962_v1, %v963_v44 }
 0x124   : > { %v980_v4 = vsel %vm969_vm11, %v941_v45, %v979_v55  ;;  %v551_v25 = vpop.f32.mrf.mxu2  ;;  %v2110_v45 = vmul.f32 %v5819_v22, %v1871_v57 }
 0x125   : > { %998 = vst [vmem:[#allocation3 + $0x68] sm:$0xff] %v980_v4  ;;  %v5981_v10 = vpack.c.bf16 %v551_v25, %v522_v36  ;;  %v967_v36 = vrot.slane %v5949_v26, 4  ;;  %v1513_v26 = vpack.c.bf16 %v1491_v31, %v1491_v31  ;;  %v2113_v25 = vmul.f32 %v5819_v22, %v5930_v40 }
 0x126   : > { %1966 = vrot.lane.b32.xlu1 %v1924_v0, %s5322_s18  ;;  %1768 = vrot.lane.b32.xlu0 %v1724_v11, %s5323_s24  ;;  %v525_v37 = vpop.f32.mrf.mxu1  ;;  %v2128_v12 = vpack.c.bf16 %v2111_v7, %v2110_v45  ;;  %v2115_v11 = vmul.f32 %v5817_v51, %v2078_v33  ;;  %v961_v45 = vrot.slane %v5963_v56, 4  ;;  %v1709_v31 = vmul.f32 %v5821_v27, %v5930_v40 }
 0x127   : > { %1962 = vrot.lane.b32.xlu2 %v1922_v19, %s5322_s18  ;;  %585 = vst [vmem:[#allocation2 + $0x4] sm:$0xff] %v5981_v10 }
 0x128   : > { %v945_v21 = vpop.permute.xlu1 %944  ;;  %v949_v5 = vpop.permute.xlu0 %948  ;;  %1413 = vst [vmem:[#allocation3 + $0x100] sm:$0xff] %v5981_v10 }
 0x129   : > { %v964_v1 = vrot.slane %v945_v21, 4  ;;  %v966_v44 = vrot.slane %v949_v5, 4  ;;  %v5992_v43 = vpop.permute.xlu2 %1146 }
 0x12b   : > { %v981_v57 = vsel %vm765_vm10, %v964_v1, %v965_v59  ;;  %v983_v49 = vsel %vm765_vm10, %v966_v44, %v967_v36  ;;  %v2040_v59 = vld [vmem:[#allocation2 + $0x6c] sm:$0xf]  ;;  %v2131_v44 = vpack.c.bf16 %v2115_v11, %v2115_v11  ;;  %v1704_v11 = vmul.f32 %v5852_v9, %v5870_v18 }
 0x12c   : > { %v982_v55 = vsel %vm969_vm11, %v945_v21, %v981_v57  ;;  %v984_v3 = vsel %vm969_vm11, %v949_v5, %v983_v49  ;;  %v554_v4 = vpop.f32.mrf.mxu2  ;;  %v2114_v21 = vmul.f32 %v5845_v8, %v5932_v48  ;;  %v1632_v5 = vld [vmem:[#allocation2 + $0x4c] sm:$0xf]  ;;  %v2075_v33 = vunpack.c.l.bf16 %v2040_v59 }
 0x12d   : > { %999 = vst [vmem:[#allocation3 + $0x70] sm:$0xff] %v982_v55  ;;  %v6000_v0 = vpack.c.bf16 %v554_v4, %v525_v37  ;;  %v1665_v49 = vunpack.c.l.bf16 %v1632_v5  ;;  %v1726_v55 = vpack.c.bf16 %v1710_v47, %v1709_v31  ;;  %v1169_v5 = vrot.slane %v5954_v53, 4 }
 0x12e   : > { %1000 = vst [vmem:[#allocation3 + $0x78] sm:$0xff] %v984_v3  ;;  %2172 = vrot.lane.b32.xlu1 %v2128_v12, %s5321_s8  ;;  %1774 = vrot.lane.b32.xlu0 %v1727_v20, %s5323_s24  ;;  %v528_v1 = vpop.f32.mrf.mxu1  ;;  %v2130_v57 = vpack.c.bf16 %v2114_v21, %v2113_v25  ;;  %v1703_v20 = vmul.f32 %v5821_v27, %v5858_v15  ;;  %v2036_v21 = vld [vmem:[#allocation2 + $0x4c] sm:$0xf] }
 0x12f   : > { %1548 = vrot.lane.b32.xlu2 %v1513_v26, %s5324_s25  ;;  %586 = vst [vmem:[#allocation2 + $0x14] sm:$0xff] %v6000_v0  ;;  %v2112_v25 = vmul.f32 %v5817_v51, %v2075_v33 }
 0x130   : > { %v6005_v2 = vpop.permute.xlu1 %1144  ;;  %v937_v19 = vpop.permute.xlu0 %936  ;;  %1414 = vst [vmem:[#allocation3 + $0x108] sm:$0xff] %v6000_v0 }
 0x131   : > { %v960_v7 = vrot.slane %v937_v19, 4  ;;  %v6013_v34 = vpop.permute.xlu2 %1346 }
 0x133   : > { %v977_v36 = vsel %vm765_vm10, %v960_v7, %v961_v45  ;;  %v1166_v45 = vrot.slane %v5992_v43, 4 }
 0x134   : > { %v978_v37 = vsel %vm969_vm11, %v937_v19, %v977_v36  ;;  %v4646_v56 = vld [vmem:[#allocation3 + $0x70] sm:$0xf]  ;;  %v557_v3 = vpop.f32.mrf.mxu2  ;;  %v1702_v19 = vmul.f32 %v5814_v39, %v1665_v49  ;;  %v2069_v36 = vunpack.c.l.bf16 %v2036_v21  ;;  %v2129_v49 = vpack.c.bf16 %v2112_v25, %v2112_v25  ;;  %v1203_v25 = vld [vmem:[#allocation2] sm:$0xff]  ;;  %v1634_v21 = vld [vmem:[#allocation2 + $0x5c] sm:$0xf] }
 0x135   : > { %997 = vst [vmem:[#allocation3 + $0x60] sm:$0xff] %v978_v37  ;;  %v5095_v12 = vld [vmem:[#allocation3 + $0x74] sm:$0xf0]  ;;  %v6023_v40 = vpack.c.bf16 %v557_v3, %v528_v1 }
 0x136   : > { %2178 = vrot.lane.b32.xlu1 %v2131_v44, %s5321_s8  ;;  %2176 = vrot.lane.b32.xlu0 %v2130_v57, %s5321_s8  ;;  %v4647_v48 = vor.u32 %v5095_v12, %v4646_v56  ;;  %v1722_v44 = vpack.c.bf16 %v1704_v11, %v1703_v20  ;;  %v1721_v37 = vpack.c.bf16 %v1702_v19, %v1702_v19  ;;  %v5093_v57 = vld [vmem:[#allocation3 + $0x64] sm:$0xf0]  ;;  %v531_v56 = vpop.f32.mrf.mxu1  ;;  %v1163_v20 = vrot.slane %v5971_v13, 4 }
 0x137   : > { %1772 = vrot.lane.b32.xlu2 %v1726_v55, %s5323_s24  ;;  %587 = vst [vmem:[#allocation2 + $0x24] sm:$0xff] %v6023_v40  ;;  %v1232_v13 = vunpack.c.h.bf16 %v1203_v25 }
 0x138   : > { %2729 = vmatpush.bf16.msra.mxu3 %v4647_v48  ;;  %v1151_v26 = vpop.permute.xlu1 %1150  ;;  %v1149_v4 = vpop.permute.xlu0 %1148  ;;  %1415 = vst [vmem:[#allocation3 + $0x110] sm:$0xff] %v6023_v40 }
 0x139   : > { %v1168_v15 = vrot.slane %v1151_v26, 4  ;;  %v1167_v7 = vrot.slane %v1149_v4, 4  ;;  %v1353_v31 = vpop.permute.xlu2 %1352 }
 0x13b   : > { %v1185_v47 = vsel %vm765_vm10, %v1168_v15, %v1169_v5  ;;  %v1183_v59 = vsel %vm765_vm10, %v1166_v45, %v1167_v7 }
 0x13c   : > { %v1186_v18 = vsel %vm1171_vm9, %v1151_v26, %v1185_v47  ;;  %v1184_v1 = vsel %vm1171_vm9, %v5992_v43, %v1183_v59  ;;  %v4638_v53 = vld [vmem:[#allocation3 + $0x60] sm:$0xf]  ;;  %v560_v33 = vpop.f32.mrf.mxu2  ;;  %v2106_v43 = vmul.f32 %v5817_v51, %v2069_v36  ;;  %v1165_v26 = vrot.slane %v6005_v2, 4 }
 0x13d   : > { %1202 = vst [vmem:[#allocation3 + $0xb8] sm:$0xff] %v1186_v18  ;;  %v4639_v55 = vor.u32 %v5093_v57, %v4638_v53  ;;  %v6043_v3 = vpack.c.bf16 %v560_v33, %v531_v56  ;;  %v1231_v59 = vunpack.c.l.bf16 %v1203_v25  ;;  %v1668_v2 = vunpack.c.l.bf16 %v1634_v21 }
 0x13e   : > { %1201 = vst [vmem:[#allocation3 + $0xb0] sm:$0xff] %v1184_v1  ;;  %1764 = vrot.lane.b32.xlu1 %v1722_v44, %s5323_s24  ;;  %1762 = vrot.lane.b32.xlu0 %v1721_v37, %s5323_s24  ;;  %v2125_v15 = vpack.c.bf16 %v2106_v43, %v2106_v43  ;;  %v7348_v36 = vpack.c.bf16 %v5866_v32, %v5862_v16  ;;  %v1204_v32 = vld [vmem:[#allocation2 + $0x8] sm:$0xf] }
 0x13f   : > { %2174 = vrot.lane.b32.xlu2 %v2129_v49, %s5321_s8  ;;  %2730 = vmatpush.bf16.msra.mxu3 %v4639_v55  ;;  %588 = vst [vmem:[#allocation2 + $0x34] sm:$0xff] %v6043_v3  ;;  %v7349_v18 = vpack.c.bf16 %v5878_v52, %v5874_v38  ;;  %v1268_v37 = vmul.f32 %v5667_v61, %v1231_v59  ;;  %v1370_v49 = vrot.slane %v1353_v31, 4 }
 0x140   : > { %v1139_v12 = vpop.permute.xlu1 %1138  ;;  %v1143_v48 = vpop.permute.xlu0 %1142  ;;  %1416 = vst [vmem:[#allocation3 + $0x118] sm:$0xff] %v6043_v3  ;;  %v1269_v53 = vmul.f32 %v5675_v6, %v1232_v13  ;;  %v864_v57 = vmul.f32 %v5638_v24, %v1231_v59  ;;  %v865_v56 = vmul.f32 %v1232_v13, %v5646_v62  ;;  %v1705_v16 = vmul.f32 %v5814_v39, %v1668_v2  ;;  %v800_v2 = vld [vmem:[#allocation2 + $0x8] sm:$0xf] }
 0x141   : > { %v1162_v4 = vrot.slane %v1139_v12, 4  ;;  %v1164_v11 = vrot.slane %v1143_v48, 4  ;;  %v1341_v19 = vpop.permute.xlu2 %1340  ;;  %v661_v25 = vmul.f32 %v5577_v17, %v1231_v59  ;;  %v662_v21 = vmul.f32 %v1232_v13, %v5593_v30 }
 0x142   : > { %v1292_v43 = vpack.c.bf16 %v1269_v53, %v1268_v37 }
 0x143   : > { %v1179_v5 = vsel %vm765_vm10, %v1162_v4, %v1163_v20  ;;  %v1181_v45 = vsel %vm765_vm10, %v1164_v11, %v1165_v26  ;;  %v1723_v20 = vpack.c.bf16 %v1705_v16, %v1705_v16 }
 0x144   : > { %v1180_v7 = vsel %vm1171_vm9, %v1139_v12, %v1179_v5  ;;  %v1182_v47 = vsel %vm1171_vm9, %v1143_v48, %v1181_v45  ;;  %v888_v12 = vpack.c.bf16 %v865_v56, %v864_v57  ;;  %v1233_v48 = vunpack.c.l.bf16 %v1204_v32 }
 0x145   : > { %1199 = vst [vmem:[#allocation3 + $0xa0] sm:$0xff] %v1180_v7  ;;  %v1367_v5 = vrot.slane %v6013_v34, 4  ;;  %v1364_v45 = vrot.slane %v1341_v19, 4  ;;  %v685_v56 = vpack.c.bf16 %v662_v21, %v661_v25  ;;  %v7350_v34 = vpack.c.bf16 %v5892_v50, %v5886_v42 }
 0x146   : > { %1200 = vst [vmem:[#allocation3 + $0xa8] sm:$0xff] %v1182_v47  ;;  %2166 = vrot.lane.b32.xlu1 %v2125_v15, %s5321_s8  ;;  %2164 = vrot.lane.b32.xlu0 %v7348_v36, %s5321_s8  ;;  %v1270_v11 = vmul.f32 %v5665_v60, %v1233_v48 }
 0x147   : > { %1760 = vrot.lane.b32.xlu2 %v7349_v18, %s5323_s24 }
 0x148   : > { %v1351_v1 = vpop.permute.xlu1 %1350  ;;  %v1355_v44 = vpop.permute.xlu0 %1354  ;;  %v1293_v57 = vpack.c.bf16 %v1270_v11, %v1270_v11 }
 0x149   : > { %v1371_v33 = vrot.slane %v1355_v44, 4  ;;  %v6068_v55 = vpop.permute.xlu2 %1568 }
 0x14b   : > { %v1387_v38 = vsel %vm765_vm10, %v1370_v49, %v1371_v33  ;;  %v829_v49 = vunpack.c.l.bf16 %v800_v2 }
 0x14c   : > { %v1388_v52 = vsel %vm1373_vm7, %v1353_v31, %v1387_v38  ;;  %v598_v31 = vld [vmem:[#allocation2 + $0x8] sm:$0xf]  ;;  %v1067_v38 = vmul.f32 %v1232_v13, %v5732_v46 }
 0x14d   : > { %1404 = vst [vmem:[#allocation3 + $0xf8] sm:$0xff] %v1388_v52  ;;  %v626_v44 = vunpack.c.l.bf16 %v598_v31  ;;  %v1002_v52 = vld [vmem:[#allocation2 + $0x8] sm:$0xf]  ;;  %v1450_v31 = vunpack.c.h.bf16 %v5981_v10 }
 0x14e   : > { %1324 = vrot.lane.b32.xlu0 %v1292_v43, %s5325_s26  ;;  %920 = vrot.lane.b32.xlu1 %v888_v12, %s5328_s21  ;;  %v1369_v43 = vrot.slane %v1351_v1, 4  ;;  %v1449_v1 = vunpack.c.l.bf16 %v5981_v10 }
 0x14f   : > { %1766 = vrot.lane.b32.xlu2 %v1723_v20, %s5323_s24  ;;  %v663_v33 = vmul.f32 %v5575_v14, %v626_v44  ;;  %v866_v20 = vmul.f32 %v5607_v41, %v829_v49  ;;  %v1206_v44 = vld [vmem:[#allocation2 + $0x18] sm:$0xf] }
 0x150   : > { %v1345_v26 = vpop.permute.xlu1 %1344  ;;  %v1343_v4 = vpop.permute.xlu0 %1342  ;;  %v1486_v10 = vmul.f32 %v5810_v35, %v1449_v1  ;;  %v1236_v49 = vunpack.c.l.bf16 %v1206_v44 }
 0x151   : > { %v1366_v15 = vrot.slane %v1345_v26, 4  ;;  %v1365_v7 = vrot.slane %v1343_v4, 4  ;;  %v6080_v47 = vpop.permute.xlu2 %1560  ;;  %v686_v50 = vpack.c.bf16 %v663_v33, %v663_v33  ;;  %v1031_v4 = vunpack.c.l.bf16 %v1002_v52 }
 0x152   : > { %v889_v13 = vpack.c.bf16 %v866_v20, %v866_v20  ;;  %v1273_v20 = vmul.f32 %v5665_v60, %v1236_v49 }
 0x153   : > { %v1383_v36 = vsel %vm765_vm10, %v1366_v15, %v1367_v5  ;;  %v1381_v18 = vsel %vm765_vm10, %v1364_v45, %v1365_v7  ;;  %v1068_v15 = vmul.f32 %v5663_v58, %v1031_v4 }
 0x154   : > { %v1384_v37 = vsel %vm1373_vm7, %v1345_v26, %v1383_v36  ;;  %v1382_v53 = vsel %vm1373_vm7, %v1341_v19, %v1381_v18  ;;  %v1066_v19 = vmul.f32 %v5701_v23, %v1231_v59  ;;  %v801_v26 = vld [vmem:[#allocation2 + $0x10] sm:$0xff]  ;;  %v1487_v18 = vmul.f32 %v5833_v28, %v1450_v31 }
 0x155   : > { %1402 = vst [vmem:[#allocation3 + $0xe8] sm:$0xff] %v1384_v37  ;;  %v6102_v21 = vunpack.c.l.bf16 %v801_v26  ;;  %v6104_v59 = vunpack.c.h.bf16 %v801_v26  ;;  %v1091_v37 = vpack.c.bf16 %v1068_v15, %v1068_v15  ;;  %v802_v26 = vld [vmem:[#allocation2 + $0x18] sm:$0xf] }
 0x156   : > { %1401 = vst [vmem:[#allocation3 + $0xe0] sm:$0xff] %v1382_v53  ;;  %1326 = vrot.lane.b32.xlu1 %v1293_v57, %s5325_s26  ;;  %717 = vrot.lane.b32.xlu0 %v685_v56, %s5327_s20  ;;  %v1090_v25 = vpack.c.bf16 %v1067_v38, %v1066_v19  ;;  %v5111_v56 = vld [vmem:[#allocation3 + $0xf4] sm:$0xf0] }
 0x157   : > { %2168 = vrot.lane.b32.xlu2 %v7350_v34, %s5321_s8  ;;  %v867_v7 = vmul.f32 %v5638_v24, %v6102_v21  ;;  %v868_v2 = vmul.f32 %v5646_v62, %v6104_v59  ;;  %v1510_v34 = vpack.c.bf16 %v1487_v18, %v1486_v10  ;;  %v1271_v4 = vmul.f32 %v5667_v61, %v6102_v21 }
 0x158   : > { %v6093_v16 = vpop.permute.xlu1 %1572  ;;  %v1349_v32 = vpop.permute.xlu0 %1348 }
 0x159   : > { %v1368_v12 = vrot.slane %v1349_v32, 4  ;;  %v6097_v48 = vpop.permute.xlu2 %1976  ;;  %v890_v53 = vpack.c.bf16 %v868_v2, %v867_v7  ;;  %v1295_v7 = vpack.c.bf16 %v1273_v20, %v1273_v20 }
 0x15b   : > { %v1385_v42 = vsel %vm765_vm10, %v1368_v12, %v1369_v43  ;;  %v1890_v43 = vmul.f32 %v5917_v29, %v1449_v1  ;;  %v1891_v12 = vmul.f32 %v5926_v54, %v1450_v31 }
 0x15c   : > { %v1386_v11 = vsel %vm1373_vm7, %v1349_v32, %v1385_v42  ;;  %v5109_v19 = vld [vmem:[#allocation3 + $0xe4] sm:$0xf0] }
 0x15d   : > { %1403 = vst [vmem:[#allocation3 + $0xf0] sm:$0xff] %v1386_v11  ;;  %v4702_v32 = vld [vmem:[#allocation3 + $0xe0] sm:$0xf]  ;;  %v1272_v11 = vmul.f32 %v5675_v6, %v6104_v59  ;;  %v1914_v15 = vpack.c.bf16 %v1891_v12, %v1890_v43 }
 0x15e   : > { %719 = vrot.lane.b32.xlu1 %v686_v50, %s5327_s20  ;;  %1122 = vrot.lane.b32.xlu0 %v1090_v25, %s5326_s6  ;;  %v4703_v50 = vor.u32 %v5109_v19, %v4702_v32  ;;  %v600_v25 = vld [vmem:[#allocation2 + $0x18] sm:$0xf]  ;;  %v1452_v19 = vunpack.c.l.bf16 %v6000_v0 }
 0x15f   : > { %922 = vrot.lane.b32.xlu2 %v889_v13, %s5328_s21  ;;  %v832_v13 = vunpack.c.l.bf16 %v802_v26  ;;  %v629_v1 = vunpack.c.l.bf16 %v600_v25  ;;  %v1294_v2 = vpack.c.bf16 %v1272_v11, %v1271_v4  ;;  %v1004_v32 = vld [vmem:[#allocation2 + $0x18] sm:$0xf]  ;;  %v1453_v26 = vunpack.c.h.bf16 %v6000_v0 }
 0x160   : > { %v6111_v5 = vpop.permute.xlu1 %1564  ;;  %v6113_v45 = vpop.permute.xlu0 %1556  ;;  %v1489_v25 = vmul.f32 %v5810_v35, %v1452_v19 }
 0x161   : > { %v6120_v36 = vpop.permute.xlu2 %1968  ;;  %v869_v31 = vmul.f32 %v5607_v41, %v832_v13  ;;  %v666_v44 = vmul.f32 %v5575_v14, %v629_v1  ;;  %v1490_v13 = vmul.f32 %v5833_v28, %v1453_v26  ;;  %v1069_v1 = vmul.f32 %v5701_v23, %v6102_v21 }
 0x163   : > { %v891_v20 = vpack.c.bf16 %v869_v31, %v869_v31  ;;  %v688_v4 = vpack.c.bf16 %v666_v44, %v666_v44  ;;  %v1207_v31 = vld [vmem:[#allocation2 + $0x20] sm:$0xff] }
 0x164   : > { %v4710_v57 = vld [vmem:[#allocation3 + $0xf0] sm:$0xf] }
 0x165   : > { %v4711_v33 = vor.u32 %v5111_v56, %v4710_v57  ;;  %v1587_v57 = vrot.slane %v6068_v55, 4  ;;  %v1589_v56 = vrot.slane %v6093_v16, 4  ;;  %v1034_v16 = vunpack.c.l.bf16 %v1004_v32 }
 0x166   : > { %1124 = vrot.lane.b32.xlu1 %v1091_v37, %s5326_s6  ;;  %924 = vrot.lane.b32.xlu0 %v890_v53, %s5328_s21  ;;  %v664_v37 = vmul.f32 %v5577_v17, %v6102_v21  ;;  %v665_v53 = vmul.f32 %v6104_v59, %v5593_v30 }
 0x167   : > { %1542 = vrot.lane.b32.xlu2 %v1510_v34, %s5324_s25  ;;  %2748 = vmatpush.bf16.msrb.mxu0 %v4711_v33 }
 0x168   : > { %v6127_v38 = vpop.permute.xlu1 %1552  ;;  %v6129_v52 = vpop.permute.xlu0 %1544  ;;  %v687_v11 = vpack.c.bf16 %v665_v53, %v664_v37 }
 0x169   : > { %v6134_v42 = vpop.permute.xlu2 %1960 }
 0x16b   : > { %2749 = vmatpush.bf16.msrb.mxu0 %v4703_v50 }
 0x16e   : > { %1946 = vrot.lane.b32.xlu1 %v1914_v15, %s5322_s18  ;;  %1330 = vrot.lane.b32.xlu0 %v1295_v7, %s5325_s26  ;;  %v1071_v7 = vmul.f32 %v5663_v58, %v1034_v16 }
 0x16f   : > { %1328 = vrot.lane.b32.xlu2 %v1294_v2, %s5325_s26  ;;  %v1070_v2 = vmul.f32 %v5732_v46, %v6104_v59 }
 0x170   : > { %v1567_v10 = vpop.permute.xlu1 %1566  ;;  %v1571_v18 = vpop.permute.xlu0 %1570  ;;  %v1093_v59 = vpack.c.bf16 %v1071_v7, %v1071_v7 }
 0x171   : > { %v1586_v49 = vrot.slane %v1567_v10, 4  ;;  %v1588_v34 = vrot.slane %v1571_v18, 4  ;;  %v6151_v33 = vpop.permute.xlu2 %1948 }
 0x173   : > { %v1603_v43 = vsel %vm765_vm10, %v1586_v49, %v1587_v57  ;;  %v1605_v12 = vsel %vm765_vm10, %v1588_v34, %v1589_v56  ;;  %v1512_v49 = vpack.c.bf16 %v1490_v13, %v1489_v25  ;;  %v6173_v34 = vunpack.c.l.bf16 %v1207_v31 }
 0x174   : > { %v1604_v50 = vsel %vm1263_vm4, %v1567_v10, %v1603_v43  ;;  %v1606_v55 = vsel %vm1263_vm4, %v1571_v18, %v1605_v12  ;;  %v1583_v10 = vrot.slane %v6080_v47, 4  ;;  %v1585_v18 = vrot.slane %v6111_v5, 4 }
 0x175   : > { %1621 = vst [vmem:[#allocation3 + $0x170] sm:$0xff] %v1604_v50  ;;  %v6177_v12 = vunpack.c.h.bf16 %v1207_v31  ;;  %v1092_v47 = vpack.c.bf16 %v1070_v2, %v1069_v1  ;;  %v1893_v50 = vmul.f32 %v5917_v29, %v1452_v19  ;;  %v870_v7 = vmul.f32 %v5638_v24, %v6173_v34  ;;  %v6196_v1 = vld [vmem:[#allocation2 + $0x28] sm:$0xff]  }
 0x176   : > { %1622 = vst [vmem:[#allocation3 + $0x178] sm:$0xff] %v1606_v55  ;;  %926 = vrot.lane.b32.xlu1 %v891_v20, %s5328_s21  ;;  %723 = vrot.lane.b32.xlu0 %v688_v4, %s5327_s20  ;;  %v1894_v55 = vmul.f32 %v5926_v54, %v1453_v26  ;;  %v6194_v26 = vld [vmem:[#allocation2 + $0x28] sm:$0xff]  }
 0x177   : > { %721 = vrot.lane.b32.xlu2 %v687_v11, %s5327_s20  ;;  %v1274_v11 = vmul.f32 %v5667_v61, %v6173_v34  ;;  %v1275_v25 = vmul.f32 %v5675_v6, %v6177_v12  ;;  %v871_v19 = vmul.f32 %v6177_v12, %v5646_v62 }
 0x178   : > { %v1559_v0 = vpop.permute.xlu1 %1558  ;;  %v1563_v15 = vpop.permute.xlu0 %1562  ;;  %v1916_v31 = vpack.c.bf16 %v1894_v55, %v1893_v50  ;;  %v1993_v50 = vrot.slane %v6097_v48, 4 }
 0x179   : > { %v1582_v44 = vrot.slane %v1559_v0, 4  ;;  %v1584_v37 = vrot.slane %v1563_v15, 4  ;;  %v1971_v53 = vpop.permute.xlu2 %1970 }
 0x17a   : > { %v1990_v13 = vrot.slane %v1971_v53, 4 }
 0x17b   : > { %v1599_v57 = vsel %vm765_vm10, %v1582_v44, %v1583_v10  ;;  %v1601_v56 = vsel %vm765_vm10, %v1584_v37, %v1585_v18  ;;  %v1296_v18 = vpack.c.bf16 %v1275_v25, %v1274_v11  ;;  %v835_v37 = vunpack.c.l.bf16 %v6194_v26 }
 0x17c   : > { %v1600_v21 = vsel %vm1263_vm4, %v1559_v0, %v1599_v57  ;;  %v1602_v32 = vsel %vm1263_vm4, %v1563_v15, %v1601_v56  ;;  %v4774_v43 = vld [vmem:[#allocation3 + $0x170] sm:$0xf]  ;;  %v1239_v57 = vunpack.c.l.bf16 %v6196_v1  ;;  %v892_v56 = vpack.c.bf16 %v871_v19, %v870_v7 }
 0x17d   : > { %1619 = vst [vmem:[#allocation3 + $0x160] sm:$0xff] %v1600_v21  ;;  %v5127_v5 = vld [vmem:[#allocation3 + $0x174] sm:$0xf0] }
 0x17e   : > { %1620 = vst [vmem:[#allocation3 + $0x168] sm:$0xff] %v1602_v32  ;;  %1546 = vrot.lane.b32.xlu1 %v1512_v49, %s5324_s25  ;;  %1128 = vrot.lane.b32.xlu0 %v1093_v59, %s5326_s6  ;;  %v4775_v20 = vor.u32 %v5127_v5, %v4774_v43  ;;  %v1276_v43 = vmul.f32 %v5665_v60, %v1239_v57 }
 0x17f   : > { %1126 = vrot.lane.b32.xlu2 %v1092_v47, %s5326_s6  ;;  %v667_v47 = vmul.f32 %v5577_v17, %v6173_v34  ;;  %v668_v5 = vmul.f32 %v6177_v12, %v5593_v30 }
 0x180   : > { %2767 = vmatpush.bf16.msrb.mxu1 %v4775_v20  ;;  %v6184_v4 = vpop.permute.xlu1 %1952  ;;  %v1973_v16 = vpop.permute.xlu0 %1972  ;;  %v1006_v20 = vld [vmem:[#allocation2 + $0x28] sm:$0xf] }
 0x181   : > { %v1991_v0 = vrot.slane %v1973_v16, 4  ;;  %v1963_v15 = vpop.permute.xlu2 %1962  ;;  %v1037_v19 = vunpack.c.l.bf16 %v1006_v20 }
 0x182   : > { %v1986_v55 = vrot.slane %v1963_v15, 4 }
 0x183   : > { %v2007_v2 = vsel %vm765_vm10, %v1990_v13, %v1991_v0  ;;  %v602_v13 = vld [vmem:[#allocation2 + $0x28] sm:$0xf] }
 0x184   : > { %v2008_v10 = vsel %vm859_vm3, %v1971_v53, %v2007_v2  ;;  %v4766_v44 = vld [vmem:[#allocation3 + $0x160] sm:$0xf]  ;;  %v872_v53 = vmul.f32 %v5607_v41, %v835_v37  ;;  %v632_v48 = vunpack.c.l.bf16 %v602_v13 }
 0x185   : > { %2025 = vst [vmem:[#allocation3 + $0x1f0] sm:$0xff] %v2008_v10  ;;  %v5125_v49 = vld [vmem:[#allocation3 + $0x164] sm:$0xf0] }
 0x186   : > { %1950 = vrot.lane.b32.xlu0 %v1916_v31, %s5322_s18  ;;  %1332 = vrot.lane.b32.xlu1 %v1296_v18, %s5325_s26  ;;  %v4767_v21 = vor.u32 %v5125_v49, %v4766_v44  ;;  %v893_v10 = vpack.c.bf16 %v872_v53, %v872_v53  ;;  %v689_v18 = vpack.c.bf16 %v668_v5, %v667_v47  ;;  %v1455_v53 = vunpack.c.l.bf16 %v6023_v40 }
 0x187   : > { %928 = vrot.lane.b32.xlu2 %v892_v56, %s5328_s21  ;;  %v1297_v44 = vpack.c.bf16 %v1276_v43, %v1276_v43  ;;  %v1072_v56 = vmul.f32 %v5701_v23, %v6173_v34  ;;  %v1074_v49 = vmul.f32 %v5663_v58, %v1037_v19  ;;  %v1456_v43 = vunpack.c.h.bf16 %v6023_v40 }
 0x188   : > { %2768 = vmatpush.bf16.msrb.mxu1 %v4767_v21  ;;  %v1975_v32 = vpop.permute.xlu1 %1974  ;;  %v1965_v59 = vpop.permute.xlu0 %1964 }
 0x189   : > { %v1992_v16 = vrot.slane %v1975_v32, 4  ;;  %v1987_v11 = vrot.slane %v1965_v59, 4  ;;  %v6212_v25 = vpop.permute.xlu2 %1548  ;;  %v805_v59 = vld [vmem:[#allocation2 + $0x30] sm:$0xff]  ;;  %v1095_v5 = vpack.c.bf16 %v1074_v49, %v1074_v49  ;;  %v1493_v40 = vmul.f32 %v5833_v28, %v1456_v43 }
 0x18a   : > { %v6235_v34 = vunpack.c.h.bf16 %v805_v59  ;;  %v1897_v19 = vmul.f32 %v5926_v54, %v1456_v43 }
 0x18b   : > { %v2009_v0 = vsel %vm765_vm10, %v1992_v16, %v1993_v50  ;;  %v2003_v7 = vsel %vm765_vm10, %v1986_v55, %v1987_v11  ;;  %v6233_v55 = vunpack.c.l.bf16 %v805_v59  ;;  %v1492_v11 = vmul.f32 %v5810_v35, %v1455_v53 }
 0x18c   : > { %v2010_v2 = vsel %vm859_vm3, %v1975_v32, %v2009_v0  ;;  %v2004_v31 = vsel %vm859_vm3, %v1963_v15, %v2003_v7  ;;  %v1073_v15 = vmul.f32 %v6177_v12, %v5732_v46  ;;  %v669_v32 = vmul.f32 %v5575_v14, %v632_v48  ;;  %v4838_v20 = vld [vmem:[#allocation3 + $0x1f0] sm:$0xf] }
 0x18d   : > { %2026 = vst [vmem:[#allocation3 + $0x1f8] sm:$0xff] %v2010_v2  ;;  %v1896_v7 = vmul.f32 %v5917_v29, %v1455_v53  ;;  %v873_v2 = vmul.f32 %v5638_v24, %v6233_v55 }
 0x18e   : > { %2023 = vst [vmem:[#allocation3 + $0x1e0] sm:$0xff] %v2004_v31  ;;  %930 = vrot.lane.b32.xlu0 %v893_v10, %s5328_s21  ;;  %725 = vrot.lane.b32.xlu1 %v689_v18, %s5327_s20  ;;  %v1094_v47 = vpack.c.bf16 %v1073_v15, %v1072_v56  ;;  %v690_v12 = vpack.c.bf16 %v669_v32, %v669_v32  ;;  %v6248_v10 = vld [vmem:[#allocation2 + $0x38] sm:$0xff]  }
 0x18f   : > { %1334 = vrot.lane.b32.xlu2 %v1297_v44, %s5325_s26  ;;  %v874_v31 = vmul.f32 %v5646_v62, %v6235_v34  ;;  %v6250_v18 = vld [vmem:[#allocation2 + $0x38] sm:$0xff]   ;;  %v1989_v44 = vrot.slane %v6120_v36, 4  ;;  %v838_v53 = vunpack.c.l.bf16 %v6248_v10  ;;  %v1918_v36 = vpack.c.bf16 %v1897_v19, %v1896_v7 }
 0x190   : > { %v1771_v37 = vpop.permute.xlu1 %1770  ;;  %v6221_v57 = vpop.permute.xlu0 %1956  ;;  %v1242_v24 = vunpack.c.l.bf16 %v6250_v18 }
 0x191   : > { %v6228_v21 = vpop.permute.xlu2 %1772  ;;  %v1789_v48 = vrot.slane %v1771_v37, 4  ;;  %v1277_v37 = vmul.f32 %v5667_v61, %v6233_v55 }
 0x194   : > { %v5143_v50 = vld [vmem:[#allocation3 + $0x1f4] sm:$0xf0] }
 0x195   : > { %v4839_v16 = vor.u32 %v5143_v50, %v4838_v20  ;;  %v1278_v20 = vmul.f32 %v5675_v6, %v6235_v34 }
 0x196   : > { %1130 = vrot.lane.b32.xlu0 %v1094_v47, %s5326_s6  ;;  %1132 = vrot.lane.b32.xlu1 %v1095_v5, %s5326_s6  ;;  %v1514_v47 = vpack.c.bf16 %v1493_v40, %v1492_v11  ;;  %v894_v5 = vpack.c.bf16 %v874_v31, %v873_v2  ;;  %v1279_v11 = vmul.f32 %v5665_v60, %v1242_v24  ;;  %v1790_v40 = vrot.slane %v6228_v21, 4  ;;  %v604_v2 = vld [vmem:[#allocation2 + $0x38] sm:$0xf]  ;;  %v4830_v60 = vld [vmem:[#allocation3 + $0x1e0] sm:$0xf] }
 0x197   : > { %727 = vrot.lane.b32.xlu2 %v690_v12, %s5327_s20  ;;  %2786 = vmatpush.bf16.msrb.mxu2 %v4839_v16  ;;  %v875_v16 = vmul.f32 %v5607_v41, %v838_v53 }
 0x198   : > { %v1967_v13 = vpop.permute.xlu1 %1966  ;;  %v1769_v0 = vpop.permute.xlu0 %1768 }
 0x199   : > { %v1988_v56 = vrot.slane %v1967_v13, 4  ;;  %v1788_v15 = vrot.slane %v1769_v0, 4  ;;  %v2175_v49 = vpop.permute.xlu2 %2174 }
 0x19b   : > { %v2005_v32 = vsel %vm765_vm10, %v1988_v56, %v1989_v44  ;;  %v1805_v59 = vsel %vm765_vm10, %v1788_v15, %v1789_v48  ;;  %v1298_v44 = vpack.c.bf16 %v1278_v20, %v1277_v37  ;;  %v1299_v48 = vpack.c.bf16 %v1279_v11, %v1279_v11  ;;  %v1008_v20 = vld [vmem:[#allocation2 + $0x38] sm:$0xf] }
 0x19c   : > { %v2006_v62 = vsel %vm859_vm3, %v1967_v13, %v2005_v32  ;;  %v1806_v43 = vsel %vm1061_vm5, %v1769_v0, %v1805_v59  ;;  %v2193_v13 = vrot.slane %v2175_v49, 4  ;;  %v635_v15 = vunpack.c.l.bf16 %v604_v2  ;;  %v1627_v2 = vld [vmem:[#allocation2 + $0x24] sm:$0xff] }
 0x19d   : > { %2024 = vst [vmem:[#allocation3 + $0x1e8] sm:$0xff] %v2006_v62  ;;  %v895_v49 = vpack.c.bf16 %v875_v16, %v875_v16  ;;  %v671_v62 = vmul.f32 %v6235_v34, %v5593_v30  ;;  %v1076_v37 = vmul.f32 %v5732_v46, %v6235_v34  ;;  %v1040_v11 = vunpack.c.l.bf16 %v1008_v20  ;;  %v2038_v46 = vld [vmem:[#allocation2 + $0x5c] sm:$0xf] }
 0x19e   : > { %1823 = vst [vmem:[#allocation3 + $0x1b0] sm:$0xff] %v1806_v43  ;;  %1550 = vrot.lane.b32.xlu0 %v1514_v47, %s5324_s25  ;;  %932 = vrot.lane.b32.xlu1 %v894_v5, %s5328_s21  ;;  %v672_v24 = vmul.f32 %v5575_v14, %v635_v15  ;;  %v1458_v14 = vunpack.c.l.bf16 %v6043_v3 }
 0x19f   : > { %1954 = vrot.lane.b32.xlu2 %v1918_v36, %s5322_s18  ;;  %v1075_v36 = vmul.f32 %v5701_v23, %v6233_v55 }
 0x1a0   : > { %v2173_v50 = vpop.permute.xlu1 %2172  ;;  %v1775_v12 = vpop.permute.xlu0 %1774  ;;  %v692_v16 = vpack.c.bf16 %v672_v24, %v672_v24  ;;  %v1495_v23 = vmul.f32 %v5810_v35, %v1458_v14  ;;  %v2072_v35 = vunpack.c.l.bf16 %v2038_v46  ;;  %v2033_v46 = vld [vmem:[#allocation2 + $0x34] sm:$0xff] }
 0x1a1   : > { %v2192_v0 = vrot.slane %v2173_v50, 4  ;;  %v1791_v7 = vrot.slane %v1775_v12, 4  ;;  %v6269_v19 = vpop.permute.xlu2 %1760  ;;  %v1459_v12 = vunpack.c.h.bf16 %v6043_v3 }
 0x1a3   : > { %v2209_v31 = vsel %vm765_vm10, %v2192_v0, %v2193_v13  ;;  %v1807_v61 = vsel %vm765_vm10, %v1790_v40, %v1791_v7  ;;  %v1096_v40 = vpack.c.bf16 %v1076_v37, %v1075_v36  ;;  %v1496_v3 = vmul.f32 %v5833_v28, %v1459_v12 }
 0x1a4   : > { %v2210_v6 = vsel %vm656_vm2, %v2173_v50, %v2209_v31  ;;  %v1808_v41 = vsel %vm1061_vm5, %v6228_v21, %v1807_v61  ;;  %v5141_v56 = vld [vmem:[#allocation3 + $0x1e4] sm:$0xf0]  ;;  %v670_v21 = vmul.f32 %v5577_v17, %v6233_v55  ;;  %v1899_v13 = vmul.f32 %v5917_v29, %v1458_v14 }
 0x1a5   : > { %2227 = vst [vmem:[#allocation3 + $0x230] sm:$0xff] %v2210_v6  ;;  %v4831_v32 = vor.u32 %v5141_v56, %v4830_v60  ;;  %v1900_v0 = vmul.f32 %v5926_v54, %v1459_v12  ;;  %v1077_v7 = vmul.f32 %v5663_v58, %v1040_v11  ;;  %v1784_v31 = vrot.slane %v6269_v19, 4 }
 0x1a6   : > { %1824 = vst [vmem:[#allocation3 + $0x1b8] sm:$0xff] %v1808_v41  ;;  %1336 = vrot.lane.b32.xlu0 %v1298_v44, %s5325_s26  ;;  %1338 = vrot.lane.b32.xlu1 %v1299_v48, %s5325_s26  ;;  %v691_v30 = vpack.c.bf16 %v671_v62, %v670_v21  ;;  %v1657_v28 = vunpack.c.l.bf16 %v1627_v2  ;;  %v1658_v56 = vunpack.c.h.bf16 %v1627_v2 }
 0x1a7   : > { %934 = vrot.lane.b32.xlu2 %v895_v49, %s5328_s21  ;;  %2787 = vmatpush.bf16.msrb.mxu2 %v4831_v32  ;;  %v1920_v54 = vpack.c.bf16 %v1900_v0, %v1899_v13  ;;  %v1097_v15 = vpack.c.bf16 %v1077_v7, %v1077_v7  ;;  %v1516_v49 = vpack.c.bf16 %v1496_v3, %v1495_v23  ;;  %v1659_v32 = vunpack.c.h.bf16 %v6194_v26 }
 0x1a8   : > { %v2179_v59 = vpop.permute.xlu1 %2178  ;;  %v2177_v53 = vpop.permute.xlu0 %2176  ;;  %v1694_v24 = vmul.f32 %v5821_v27, %v1657_v28  ;;  %v1695_v21 = vmul.f32 %v5852_v9, %v1658_v56  ;;  %v2098_v3 = vmul.f32 %v5819_v22, %v1657_v28  ;;  %v2099_v13 = vmul.f32 %v5845_v8, %v1658_v56 }
 0x1a9   : > { %v2195_v43 = vrot.slane %v2179_v59, 4  ;;  %v2194_v47 = vrot.slane %v2177_v53, 4  ;;  %v1767_v5 = vpop.permute.xlu2 %1766  ;;  %v1696_v26 = vmul.f32 %v5814_v39, %v1659_v32  ;;  %v1575_v0 = vrot.slane %v6129_v52, 4 }
 0x1aa   : > { %v1787_v61 = vrot.slane %v1767_v5, 4  ;;  %v1716_v37 = vpack.c.bf16 %v1695_v21, %v1694_v24  ;;  %v2066_v28 = vunpack.c.h.bf16 %v6250_v18 }
 0x1ab   : > { %v2211_v50 = vsel %vm765_vm10, %v2194_v47, %v2195_v43 }
 0x1ac   : > { %v2212_v17 = vsel %vm656_vm2, %v2177_v53, %v2211_v50  ;;  %v1662_v50 = vunpack.c.h.bf16 %v6248_v10  ;;  %v2103_v18 = vmul.f32 %v5817_v51, %v2066_v28  ;;  %v2030_v28 = vld [vmem:[#allocation2 + $0x1c] sm:$0xf] }
 0x1ad   : > { %2228 = vst [vmem:[#allocation3 + $0x238] sm:$0xff] %v2212_v17  ;;  %v1717_v17 = vpack.c.bf16 %v1696_v26, %v1696_v26 }
 0x1ae   : > { %731 = vrot.lane.b32.xlu1 %v692_v16, %s5327_s20  ;;  %729 = vrot.lane.b32.xlu0 %v691_v30, %s5327_s20  ;;  %v1697_v16 = vmul.f32 %v5821_v27, %v1458_v14  ;;  %v1698_v30 = vmul.f32 %v5852_v9, %v1459_v12  ;;  %v1699_v23 = vmul.f32 %v5814_v39, %v1662_v50  ;;  %v2065_v12 = vunpack.c.h.bf16 %v2033_v46 }
 0x1af   : > { %1134 = vrot.lane.b32.xlu2 %v1096_v40, %s5326_s6 }
 0x1b0   : > { %v1765_v55 = vpop.permute.xlu1 %1764  ;;  %v1763_v34 = vpop.permute.xlu0 %1762  ;;  %v1718_v14 = vpack.c.bf16 %v1698_v30, %v1697_v16  ;;  %v2102_v56 = vmul.f32 %v5845_v8, %v2065_v12 }
 0x1b1   : > { %v1786_v44 = vrot.slane %v1765_v55, 4  ;;  %v1785_v6 = vrot.slane %v1763_v34, 4  ;;  %v6301_v41 = vpop.permute.xlu2 %2168 }
 0x1b3   : > { %v1803_v48 = vsel %vm765_vm10, %v1786_v44, %v1787_v61  ;;  %v1801_v60 = vsel %vm765_vm10, %v1784_v31, %v1785_v6  ;;  %v2064_v31 = vunpack.c.l.bf16 %v2033_v46  ;;  %v1719_v6 = vpack.c.bf16 %v1699_v23, %v1699_v23 }
 0x1b4   : > { %v1804_v29 = vsel %vm1061_vm5, %v1765_v55, %v1803_v48  ;;  %v1802_v58 = vsel %vm1061_vm5, %v6269_v19, %v1801_v60  ;;  %v2109_v19 = vmul.f32 %v5817_v51, %v2072_v35  ;;  %v2063_v35 = vunpack.c.h.bf16 %v6196_v1 }
 0x1b5   : > { %1822 = vst [vmem:[#allocation3 + $0x1a8] sm:$0xff] %v1804_v29  ;;  %v2120_v60 = vpack.c.bf16 %v2099_v13, %v2098_v3  ;;  %v2101_v52 = vmul.f32 %v5819_v22, %v2064_v31 }
 0x1b6   : > { %1821 = vst [vmem:[#allocation3 + $0x1a0] sm:$0xff] %v1802_v58  ;;  %1958 = vrot.lane.b32.xlu1 %v1920_v54, %s5322_s18  ;;  %1136 = vrot.lane.b32.xlu0 %v1097_v15, %s5326_s6  ;;  %v2127_v20 = vpack.c.bf16 %v2109_v19, %v2109_v19  ;;  %v2100_v1 = vmul.f32 %v5817_v51, %v2063_v35  ;;  %v1624_v54 = vld [vmem:[#allocation2 + $0xc] sm:$0xf] }
 0x1b7   : > { %1554 = vrot.lane.b32.xlu2 %v1516_v49, %s5324_s25  ;;  %v2122_v21 = vpack.c.bf16 %v2102_v56, %v2101_v52  ;;  %v1653_v19 = vunpack.c.l.bf16 %v1624_v54 }
 0x1b8   : > { %v2167_v59 = vpop.permute.xlu1 %2166  ;;  %v2165_v53 = vpop.permute.xlu0 %2164 }
 0x1b9   : > { %v2189_v62 = vrot.slane %v2167_v59, 4  ;;  %v2188_v43 = vrot.slane %v2165_v53, 4  ;;  %v923_v47 = vpop.permute.xlu2 %922  ;;  %v1623_v59 = vld [vmem:[#allocation2 + $0x4] sm:$0xff] }
 0x1ba   : > { %v953_v55 = vrot.slane %v923_v47, 4  ;;  %v1651_v47 = vunpack.c.l.bf16 %v1623_v59  ;;  %v1652_v26 = vunpack.c.h.bf16 %v1623_v59 }
 0x1bb   : > { %v2205_v5 = vsel %vm765_vm10, %v2188_v43, %v2189_v62  ;;  %v2121_v43 = vpack.c.bf16 %v2100_v1, %v2100_v1  ;;  %v2060_v1 = vunpack.c.l.bf16 %v2030_v28 }
 0x1bc   : > { %v2206_v36 = vsel %vm656_vm2, %v2165_v53, %v2205_v5  ;;  %v6343_v53 = vld [vmem:[#allocation2 + $0x14] sm:$0xff]  ;;  %v2123_v5 = vpack.c.bf16 %v2103_v18, %v2103_v18  ;;  %v1688_v16 = vmul.f32 %v5821_v27, %v1651_v47  ;;  %v1689_v30 = vmul.f32 %v5852_v9, %v1652_v26 }
 0x1bd   : > { %2225 = vst [vmem:[#allocation3 + $0x220] sm:$0xff] %v2206_v36  ;;  %v1654_v36 = vunpack.c.l.bf16 %v6343_v53  ;;  %v2092_v12 = vmul.f32 %v5819_v22, %v1651_v47 }
 0x1be   : > { %1752 = vrot.lane.b32.xlu1 %v1716_v37, %s5323_s24  ;;  %2170 = vrot.lane.b32.xlu0 %v2127_v20, %s5321_s8  ;;  %v1655_v37 = vunpack.c.h.bf16 %v6343_v53  ;;  %v1979_v53 = vrot.slane %v6151_v33, 4 }
 0x1bf   : > { %1754 = vrot.lane.b32.xlu2 %v1717_v17, %s5323_s24  ;;  %v1690_v17 = vmul.f32 %v5814_v39, %v1653_v19  ;;  %v1691_v46 = vmul.f32 %v5821_v27, %v1654_v36  ;;  %v2095_v18 = vmul.f32 %v5819_v22, %v1654_v36 }
 0x1c0   : > { %v1325_v11 = vpop.permute.xlu0 %1324  ;;  %v921_v40 = vpop.permute.xlu1 %920  ;;  %v2096_v59 = vmul.f32 %v5845_v8, %v1655_v37 }
 0x1c1   : > { %v1543_v34 = vpop.permute.xlu2 %1542  ;;  %v952_v10 = vrot.slane %v921_v40, 4  ;;  %v1356_v15 = vrot.slane %v1325_v11, 4 }
 0x1c2   : > { %v1574_v7 = vrot.slane %v1543_v34, 4 }
 0x1c3   : > { %v968_v2 = vsel %vm765_vm10, %v952_v10, %v953_v55  ;;  %v1692_v55 = vmul.f32 %v5852_v9, %v1655_v37  ;;  %v2028_v10 = vld [vmem:[#allocation2 + $0xc] sm:$0xf] }
 0x1c4   : > { %v1590_v61 = vsel %vm765_vm10, %v1574_v7, %v1575_v0  ;;  %v970_v44 = vsel %vm969_vm11, %v921_v40, %v968_v2  ;;  %v1713_v0 = vpack.c.bf16 %v1690_v17, %v1690_v17  ;;  %v1712_v7 = vpack.c.bf16 %v1689_v30, %v1688_v16 }
 0x1c5   : > { %v1592_v48 = vsel %vm1263_vm4, %v1543_v34, %v1590_v61  ;;  %993 = vst [vmem:[#allocation3 + $0x40] sm:$0xff] %v970_v44  ;;  %v1626_v34 = vld [vmem:[#allocation2 + $0x1c] sm:$0xf]  ;;  %v2057_v31 = vunpack.c.l.bf16 %v2028_v10  ;;  %v2093_v61 = vmul.f32 %v5845_v8, %v1652_v26 }
 0x1c6   : > { %1615 = vst [vmem:[#allocation3 + $0x140] sm:$0xff] %v1592_v48  ;;  %1758 = vrot.lane.b32.xlu1 %v1719_v6, %s5323_s24  ;;  %1756 = vrot.lane.b32.xlu0 %v1718_v14, %s5323_s24  ;;  %v1656_v2 = vunpack.c.l.bf16 %v1626_v34  ;;  %v1714_v14 = vpack.c.bf16 %v1692_v55, %v1691_v46  ;;  %v1577_v55 = vrot.slane %v6212_v25, 4 }
 0x1c7   : > { %2156 = vrot.lane.b32.xlu2 %v2120_v60, %s5321_s8  ;;  %v2094_v60 = vmul.f32 %v5817_v51, %v2057_v31 }
 0x1c8   : > { %v1327_v29 = vpop.permute.xlu1 %1326  ;;  %v718_v58 = vpop.permute.xlu0 %717  ;;  %v1693_v44 = vmul.f32 %v5814_v39, %v1656_v2 }
 0x1c9   : > { %v1357_v49 = vrot.slane %v1327_v29, 4  ;;  %v6340_v32 = vpop.permute.xlu2 %1328  ;;  %v2116_v29 = vpack.c.bf16 %v2093_v61, %v2092_v12  ;;  %v2117_v54 = vpack.c.bf16 %v2094_v60, %v2094_v60 }
 0x1cb   : > { %v1372_v24 = vsel %vm765_vm10, %v1356_v15, %v1357_v49  ;;  %v2097_v49 = vmul.f32 %v5817_v51, %v2060_v1 }
 0x1cc   : > { %v1374_v62 = vsel %vm1373_vm7, %v1325_v11, %v1372_v24  ;;  %v749_v11 = vrot.slane %v718_v58, 4  ;;  %v1358_v24 = vrot.slane %v6340_v32, 4 }
 0x1cd   : > { %1397 = vst [vmem:[#allocation3 + $0xc0] sm:$0xff] %v1374_v62  ;;  %v2119_v22 = vpack.c.bf16 %v2097_v49, %v2097_v49 }
 0x1ce   : > { %2160 = vrot.lane.b32.xlu1 %v2122_v21, %s5321_s8  ;;  %2158 = vrot.lane.b32.xlu0 %v2121_v43, %s5321_s8 }
 0x1cf   : > { %2162 = vrot.lane.b32.xlu2 %v2123_v5, %s5321_s8  ;;  %v2118_v5 = vpack.c.bf16 %v2096_v59, %v2095_v18 }
 0x1d0   : > { %v720_v20 = vpop.permute.xlu1 %719  ;;  %v1123_v50 = vpop.permute.xlu0 %1122 }
 0x1d1   : > { %v750_v40 = vrot.slane %v720_v20, 4  ;;  %v6355_v23 = vpop.permute.xlu2 %721  ;;  %v1154_v6 = vrot.slane %v1123_v50, 4 }
 0x1d2   : > { %v751_v36 = vrot.slane %v6355_v23, 4 }
 0x1d3   : > { %v766_v3 = vsel %vm765_vm10, %v749_v11, %v750_v40 }
 0x1d4   : > { %v768_v13 = vsel %vm767_vm8, %v718_v58, %v766_v3  ;;  %v1715_v58 = vpack.c.bf16 %v1693_v44, %v1693_v44  ;;  %v1983_v44 = vrot.slane %v6221_v57, 4 }
 0x1d5   : > { %791 = vst [vmem:[#allocation3] sm:$0xff] %v768_v13 }
 0x1d6   : > { %1746 = vrot.lane.b32.xlu1 %v1713_v0, %s5323_s24  ;;  %1744 = vrot.lane.b32.xlu0 %v1712_v7, %s5323_s24 }
 0x1d7   : > { %1748 = vrot.lane.b32.xlu2 %v1714_v14, %s5323_s24 }
 0x1d8   : > { %v1125_v27 = vpop.permute.xlu1 %1124  ;;  %v925_v9 = vpop.permute.xlu0 %924 }
 0x1d9   : > { %v1155_v35 = vrot.slane %v1125_v27, 4  ;;  %v1127_v48 = vpop.permute.xlu2 %1126  ;;  %v954_v37 = vrot.slane %v925_v9, 4  ;;  %v1981_v27 = vrot.slane %v6184_v4, 4 }
 0x1da   : > { %v1156_v34 = vrot.slane %v1127_v48, 4 }
 0x1db   : > { %v1170_v52 = vsel %vm765_vm10, %v1154_v6, %v1155_v35 }
 0x1dc   : > { %v1172_v56 = vsel %vm1171_vm9, %v1123_v50, %v1170_v52 }
 0x1dd   : > { %1195 = vst [vmem:[#allocation3 + $0x80] sm:$0xff] %v1172_v56 }
 0x1de   : > { %2148 = vrot.lane.b32.xlu1 %v2116_v29, %s5321_s8  ;;  %1750 = vrot.lane.b32.xlu0 %v1715_v58, %s5323_s24 }
 0x1df   : > { %2150 = vrot.lane.b32.xlu2 %v2117_v54, %s5321_s8 }
 0x1e0   : > { %v1947_v39 = vpop.permute.xlu1 %1946  ;;  %v1331_v15 = vpop.permute.xlu0 %1330 }
 0x1e1   : > { %v1978_v21 = vrot.slane %v1947_v39, 4  ;;  %v1359_v19 = vrot.slane %v1331_v15, 4  ;;  %v6378_v62 = vpop.permute.xlu2 %928 }
 0x1e2   : > { %v956_v57 = vrot.slane %v6378_v62, 4 }
 0x1e3   : > { %v1994_v43 = vsel %vm765_vm10, %v1978_v21, %v1979_v53  ;;  %v1375_v47 = vsel %vm765_vm10, %v1358_v24, %v1359_v19 }
 0x1e4   : > { %v1996_v26 = vsel %vm859_vm3, %v1947_v39, %v1994_v43  ;;  %v1376_v51 = vsel %vm1373_vm7, %v6340_v32, %v1375_v47  ;;  %v1411_v47 = vld [vmem:[#allocation2 + $0x64] sm:$0xff] }
 0x1e5   : > { %2019 = vst [vmem:[#allocation3 + $0x1c0] sm:$0xff] %v1996_v26  ;;  %v1412_v26 = vld [vmem:[#allocation2 + $0x74] sm:$0xff] }
 0x1e6   : > { %1398 = vst [vmem:[#allocation3 + $0xc8] sm:$0xff] %v1376_v51  ;;  %2154 = vrot.lane.b32.xlu1 %v2119_v22, %s5321_s8  ;;  %2152 = vrot.lane.b32.xlu0 %v2118_v5, %s5321_s8  ;;  %v1410_v5 = vld [vmem:[#allocation2 + $0x54] sm:$0xff] }
 0x1e7   : > { %1419 = vst [vmem:[#allocation3 + $0x130] sm:$0xff] %v1411_v47 }
 0x1e8   : > { %v927_v8 = vpop.permute.xlu1 %926  ;;  %v724_v33 = vpop.permute.xlu0 %723  ;;  %1420 = vst [vmem:[#allocation3 + $0x138] sm:$0xff] %v1412_v26 }
 0x1e9   : > { %v955_v20 = vrot.slane %v927_v8, 4  ;;  %v752_v50 = vrot.slane %v724_v33, 4  ;;  %v1335_v17 = vpop.permute.xlu2 %1334  ;;  %1418 = vst [vmem:[#allocation3 + $0x128] sm:$0xff] %v1410_v5 }
 0x1eb   : > { %v971_v16 = vsel %vm765_vm10, %v954_v37, %v955_v20  ;;  %v769_v32 = vsel %vm765_vm10, %v751_v36, %v752_v50  ;;  %v1579_v36 = vrot.slane %v6127_v38, 4 }
 0x1ec   : > { %v972_v30 = vsel %vm969_vm11, %v925_v9, %v971_v16  ;;  %v770_v11 = vsel %vm767_vm8, %v6355_v23, %v769_v32  ;;  %v1361_v9 = vrot.slane %v1335_v17, 4  ;;  %v1581_v16 = vrot.slane %v6113_v45, 4 }
 0x1ed   : > { %994 = vst [vmem:[#allocation3 + $0x48] sm:$0xff] %v972_v30 }
 0x1ee   : > { %792 = vst [vmem:[#allocation3 + $0x8] sm:$0xff] %v770_v11 }
 0x1f0   : > { %v1547_v40 = vpop.permute.xlu1 %1546  ;;  %v1129_v46 = vpop.permute.xlu0 %1128 }
 0x1f1   : > { %v1576_v10 = vrot.slane %v1547_v40, 4  ;;  %v1157_v3 = vrot.slane %v1129_v46, 4  ;;  %v728_v13 = vpop.permute.xlu2 %727 }
 0x1f2   : > { %v754_v58 = vrot.slane %v728_v13, 4 }
 0x1f3   : > { %v1593_v0 = vsel %vm765_vm10, %v1576_v10, %v1577_v55  ;;  %v1173_v7 = vsel %vm765_vm10, %v1156_v34, %v1157_v3 }
 0x1f4   : > { %v1594_v2 = vsel %vm1263_vm4, %v1547_v40, %v1593_v0  ;;  %v1174_v14 = vsel %vm1171_vm9, %v1127_v48, %v1173_v7 }
 0x1f5   : > { %1616 = vst [vmem:[#allocation3 + $0x148] sm:$0xff] %v1594_v2 }
 0x1f6   : > { %1196 = vst [vmem:[#allocation3 + $0x88] sm:$0xff] %v1174_v14 }
 0x1f8   : > { %v1951_v23 = vpop.permute.xlu0 %1950  ;;  %v1333_v31 = vpop.permute.xlu1 %1332 }
 0x1f9   : > { %v1980_v25 = vrot.slane %v1951_v23, 4  ;;  %v1360_v12 = vrot.slane %v1333_v31, 4  ;;  %v1955_v61 = vpop.permute.xlu2 %1954 }
 0x1fa   : > { %v1982_v6 = vrot.slane %v1955_v61, 4 }
 0x1fb   : > { %v1997_v35 = vsel %vm765_vm10, %v1980_v25, %v1981_v27  ;;  %v1377_v60 = vsel %vm765_vm10, %v1360_v12, %v1361_v9 }
 0x1fc   : > { %v1998_v28 = vsel %vm859_vm3, %v1951_v23, %v1997_v35  ;;  %v1378_v48 = vsel %vm1373_vm7, %v1333_v31, %v1377_v60  ;;  %v1999_v52 = vsel %vm765_vm10, %v1982_v6, %v1983_v44  ;;  %v5121_v9 = vld [vmem:[#allocation3 + $0x144] sm:$0xf0]  ;;  %v4750_v44 = vld [vmem:[#allocation3 + $0x140] sm:$0xf]  ;;  %v4742_v60 = vld [vmem:[#allocation3 + $0x130] sm:$0xf] }
 0x1fd   : > { %2020 = vst [vmem:[#allocation3 + $0x1c8] sm:$0xff] %v1998_v28  ;;  %v2000_v4 = vsel %vm859_vm3, %v1955_v61, %v1999_v52  ;;  %v5089_v61 = vld [vmem:[#allocation3 + $0x44] sm:$0xf0]  ;;  %v5119_v28 = vld [vmem:[#allocation3 + $0x134] sm:$0xf0]  ;;  %v4751_v52 = vor.u32 %v5121_v9, %v4750_v44 }
 0x1fe   : > { %1399 = vst [vmem:[#allocation3 + $0xd0] sm:$0xff] %v1378_v48  ;;  %v4622_v48 = vld [vmem:[#allocation3 + $0x40] sm:$0xf] }
 0x1ff   : > { %2021 = vst [vmem:[#allocation3 + $0x1d0] sm:$0xff] %v2000_v4 }
 0x200   : > { %v931_v56 = vpop.permute.xlu0 %930  ;;  %v726_v29 = vpop.permute.xlu1 %725 }
 0x201   : > { %v957_v1 = vrot.slane %v931_v56, 4  ;;  %v753_v54 = vrot.slane %v726_v29, 4  ;;  %v935_v39 = vpop.permute.xlu2 %934  ;;  %v4623_v56 = vor.u32 %v5089_v61, %v4622_v48 }
 0x202   : > { %v959_v37 = vrot.slane %v935_v39, 4 }
 0x203   : > { %v973_v15 = vsel %vm765_vm10, %v956_v57, %v957_v1  ;;  %v771_v49 = vsel %vm765_vm10, %v753_v54, %v754_v58  ;;  %v4614_v57 = vld [vmem:[#allocation3 + $0x30] sm:$0xf]  ;;  %v4743_v54 = vor.u32 %v5119_v28, %v4742_v60  ;;  %v5072_v60 = vld [vmem:[%s7331_s5 + $0x10] sm:$0xf0]  ;;  %v4590_v28 = vld [vmem:[#allocation3] sm:$0xf] }
 0x204   : > { %v974_v18 = vsel %vm969_vm11, %v6378_v62, %v973_v15  ;;  %v772_v59 = vsel %vm767_vm8, %v726_v29, %v771_v49  ;;  %v1409_v62 = vld [vmem:[#allocation2 + $0x44] sm:$0xff] }
 0x205   : > { %995 = vst [vmem:[#allocation3 + $0x50] sm:$0xff] %v974_v18  ;;  %v4694_v58 = vld [vmem:[#allocation3 + $0xd0] sm:$0xf]  ;;  %v5117_v18 = vld [vmem:[#allocation3 + $0x124] sm:$0xf0] }
 0x206   : > { %793 = vst [vmem:[#allocation3 + $0x10] sm:$0xff] %v772_v59  ;;  %v5087_v59 = vld [vmem:[#allocation3 + $0x34] sm:$0xf0] }
 0x207   : > { %1417 = vst [vmem:[#allocation3 + $0x120] sm:$0xff] %v1409_v62 }
 0x208   : > { %v1131_v53 = vpop.permute.xlu0 %1130  ;;  %v1133_v24 = vpop.permute.xlu1 %1132 }
 0x209   : > { %v1158_v21 = vrot.slane %v1131_v53, 4  ;;  %v1159_v19 = vrot.slane %v1133_v24, 4  ;;  %v6412_v43 = vpop.permute.xlu2 %1134  ;;  %v4615_v24 = vor.u32 %v5087_v59, %v4614_v57  ;;  %v4870_v57 = vld [vmem:[#allocation3 + $0x230] sm:$0xf]  ;;  %v4704_v59 = vld [vmem:[#allocation3 + $0xe8] sm:$0xf0] }
 0x20a   : > { %v1160_v5 = vrot.slane %v6412_v43, 4 }
 0x20b   : > { %v1175_v51 = vsel %vm765_vm10, %v1158_v21, %v1159_v19  ;;  %v4606_v21 = vld [vmem:[#allocation3 + $0x20] sm:$0xf]  ;;  %v1985_v19 = vrot.slane %v6134_v42, 4  ;;  %v5115_v42 = vld [vmem:[#allocation3 + $0x114] sm:$0xf0] }
 0x20c   : > { %v1176_v22 = vsel %vm1171_vm9, %v1131_v53, %v1175_v51  ;;  %v4630_v14 = vld [vmem:[#allocation3 + $0x50] sm:$0xf]  ;;  %v5105_v53 = vld [vmem:[#allocation3 + $0xc4] sm:$0xf0] }
 0x20d   : > { %1197 = vst [vmem:[#allocation3 + $0x90] sm:$0xff] %v1176_v22  ;;  %v5085_v51 = vld [vmem:[#allocation3 + $0x24] sm:$0xf0]  ;;  %v4686_v22 = vld [vmem:[#allocation3 + $0xc0] sm:$0xf] }
 0x20e   : > { %v4734_v49 = vld [vmem:[#allocation3 + $0x120] sm:$0xf] }
 0x20f   : > { %v4735_v62 = vor.u32 %v5117_v18, %v4734_v49  ;;  %v4822_v49 = vld [vmem:[#allocation3 + $0x1d0] sm:$0xf] }
 0x210   : > { %v1551_v8 = vpop.permute.xlu0 %1550  ;;  %v933_v33 = vpop.permute.xlu1 %932 }
 0x211   : > { %v1578_v20 = vrot.slane %v1551_v8, 4  ;;  %v1555_v50 = vpop.permute.xlu2 %1554  ;;  %v958_v17 = vrot.slane %v933_v33, 4 }
 0x212   : > { %v1580_v32 = vrot.slane %v1555_v50, 4 }
 0x213   : > { %v1595_v30 = vsel %vm765_vm10, %v1578_v20, %v1579_v36  ;;  %v975_v11 = vsel %vm765_vm10, %v958_v17, %v959_v37  ;;  %v4687_v36 = vor.u32 %v5105_v53, %v4686_v22  ;;  %v4678_v37 = vld [vmem:[#allocation3 + $0xb0] sm:$0xf]  ;;  %v5103_v20 = vld [vmem:[#allocation3 + $0xb4] sm:$0xf0]  ;;  %v5097_v22 = vld [vmem:[#allocation3 + $0x84] sm:$0xf0] }
 0x214   : > { %v1596_v40 = vsel %vm1263_vm4, %v1551_v8, %v1595_v30  ;;  %v1597_v46 = vsel %vm765_vm10, %v1580_v32, %v1581_v16  ;;  %v976_v55 = vsel %vm969_vm11, %v933_v33, %v975_v11  ;;  %v4607_v16 = vor.u32 %v5085_v51, %v4606_v21  ;;  %v4598_v11 = vld [vmem:[#allocation3 + $0x10] sm:$0xf]  ;;  %v5094_v51 = vld [vmem:[#allocation3 + $0x74] sm:$0xf] }
 0x215   : > { %1617 = vst [vmem:[#allocation3 + $0x150] sm:$0xff] %v1596_v40  ;;  %v1598_v38 = vsel %vm1263_vm4, %v1555_v50, %v1597_v46 }
 0x216   : > { %1618 = vst [vmem:[#allocation3 + $0x158] sm:$0xff] %v1598_v38  ;;  %v4726_v38 = vld [vmem:[#allocation3 + $0x110] sm:$0xf] }
 0x217   : > { %996 = vst [vmem:[#allocation3 + $0x58] sm:$0xff] %v976_v55  ;;  %v4679_v55 = vor.u32 %v5103_v20, %v4678_v37  ;;  %v5070_v37 = vld [vmem:[%s7331_s5 + $0x4] sm:$0xf]  ;;  %v4552_v20 = vld [vmem:[%s7331_s5 + $0x14] sm:$0xf0] }
 0x218   : > { %v1337_v34 = vpop.permute.xlu0 %1336  ;;  %v1339_v10 = vpop.permute.xlu1 %1338 }
 0x219   : > { %v1362_v3 = vrot.slane %v1337_v34, 4  ;;  %v1363_v45 = vrot.slane %v1339_v10, 4  ;;  %v6428_v39 = vpop.permute.xlu2 %1754  ;;  %v4727_v10 = vor.u32 %v5115_v42, %v4726_v38 }
 0x21b   : > { %v1379_v13 = vsel %vm765_vm10, %v1362_v3, %v1363_v45  ;;  %v4670_v3 = vld [vmem:[#allocation3 + $0xa0] sm:$0xf]  ;;  %v5101_v45 = vld [vmem:[#allocation3 + $0xa4] sm:$0xf0] }
 0x21c   : > { %v1380_v0 = vsel %vm1373_vm7, %v1337_v34, %v1379_v13  ;;  %v4758_v7 = vld [vmem:[#allocation3 + $0x150] sm:$0xf]  ;;  %v5113_v34 = vld [vmem:[#allocation3 + $0x104] sm:$0xf0] }
 0x21d   : > { %1400 = vst [vmem:[#allocation3 + $0xd8] sm:$0xff] %v1380_v0  ;;  %v5123_v2 = vld [vmem:[#allocation3 + $0x154] sm:$0xf0]  ;;  %v5081_v0 = vld [vmem:[#allocation3 + $0x4] sm:$0xf0] }
 0x21e   : > { %v5091_v23 = vld [vmem:[#allocation3 + $0x54] sm:$0xf0]  ;;  %v4759_v31 = vor.u32 %v5123_v2, %v4758_v7  ;;  %v4718_v7 = vld [vmem:[#allocation3 + $0x100] sm:$0xf] }
 0x21f   : > { %v4631_v27 = vor.u32 %v5091_v23, %v4630_v14  ;;  %v5151_v2 = vld [vmem:[#allocation3 + $0x234] sm:$0xf0]  ;;  %v4712_v14 = vld [vmem:[#allocation3 + $0xf8] sm:$0xf0]  ;;  %v2190_v23 = vrot.slane %v6301_v41, 4  ;;  %v4719_v48 = vor.u32 %v5113_v34, %v4718_v7 }
 0x220   : > { %2769 = vmatpush.bf16.msrb.mxu1 %v4759_v31  ;;  %v732_v25 = vpop.permute.xlu1 %731  ;;  %v730_v12 = vpop.permute.xlu0 %729  ;;  %v1781_v31 = vrot.slane %v6428_v39, 4 }
 0x221   : > { %2731 = vmatpush.bf16.msra.mxu3 %v4631_v27  ;;  %v756_v6 = vrot.slane %v732_v25, 4  ;;  %v755_v35 = vrot.slane %v730_v12, 4  ;;  %v6437_v13 = vpop.permute.xlu2 %2156  ;;  %v4558_v25 = vld [vmem:[%s7331_s5 + $0x8] sm:$0xf] }
 0x223   : > { %v773_v4 = vsel %vm765_vm10, %v755_v35, %v756_v6  ;;  %v4671_v6 = vor.u32 %v5101_v45, %v4670_v3  ;;  %v4550_v35 = vld [vmem:[%s7331_s5] sm:$0xf]  ;;  %v4806_v3 = vld [vmem:[#allocation3 + $0x1b0] sm:$0xf]  ;;  %v5092_v45 = vld [vmem:[#allocation3 + $0x64] sm:$0xf] }
 0x224   : > { %v774_v29 = vsel %vm767_vm8, %v730_v12, %v773_v4  ;;  %2770 = vmatpush.bf16.msrb.mxu1 %v4751_v52  ;;  %v5107_v1 = vld [vmem:[#allocation3 + $0xd4] sm:$0xf0]  ;;  %v5073_v12 = vld [vmem:[%s7331_s5 + $0x18] sm:$0xf0]  ;;  %v6460_v53 = vor.u32 %v5072_v60, %v4550_v35  ;;  %v4632_v35 = vld [vmem:[#allocation3 + $0x58] sm:$0xf0] }
 0x225   : > { %794 = vst [vmem:[#allocation3 + $0x18] sm:$0xff] %v774_v29  ;;  %2732 = vmatpush.bf16.msra.mxu3 %v4623_v56  ;;  %v4695_v15 = vor.u32 %v5107_v1, %v4694_v58  ;;  %v4591_v29 = vor.u32 %v5081_v0, %v4590_v28  ;;  %v5108_v58 = vld [vmem:[#allocation3 + $0xe4] sm:$0xf]  ;;  %v6455_v1 = vor.u32 %v5073_v12, %v4558_v25  ;;  %v5102_v60 = vld [vmem:[#allocation3 + $0xb4] sm:$0xf] }
 0x226   : > { %v6475_v0 = vor.u32 %v5070_v37, %v4552_v20  ;;  %v5104_v12 = vld [vmem:[#allocation3 + $0xc4] sm:$0xf]  ;;  %v4680_v28 = vld [vmem:[#allocation3 + $0xb8] sm:$0xf0] }
 0x227   : > { %2750 = vmatpush.bf16.msrb.mxu0 %v4695_v15  ;;  %v4871_v15 = vor.u32 %v5151_v2, %v4870_v57  ;;  %v4862_v2 = vld [vmem:[#allocation3 + $0x220] sm:$0xf]  ;;  %v5078_v57 = vld [vmem:[%s7331_s5 + $0x40] sm:$0xf0] }
 0x228   : > { %2771 = vmatpush.bf16.msrb.mxu1 %v4743_v54  ;;  %v1959_v47 = vpop.permute.xlu1 %1958  ;;  %v1137_v26 = vpop.permute.xlu0 %1136 }
 0x229   : > { %2733 = vmatpush.bf16.msra.mxu3 %v4615_v24  ;;  %v1984_v8 = vrot.slane %v1959_v47, 4  ;;  %v1161_v33 = vrot.slane %v1137_v26, 4  ;;  %v4662_v24 = vld [vmem:[#allocation3 + $0x90] sm:$0xf]  ;;  %v5137_v26 = vld [vmem:[#allocation3 + $0x1c4] sm:$0xf0] }
 0x22b   : > { %v2001_v50 = vsel %vm765_vm10, %v1984_v8, %v1985_v19  ;;  %v1177_v17 = vsel %vm765_vm10, %v1160_v5, %v1161_v33  ;;  %2751 = vmatpush.bf16.msrb.mxu0 %v4687_v36  ;;  %v4648_v5 = vld [vmem:[#allocation3 + $0x78] sm:$0xf0] }
 0x22c   : > { %v2002_v32 = vsel %vm859_vm3, %v1959_v47, %v2001_v50  ;;  %v1178_v30 = vsel %vm1171_vm9, %v6412_v43, %v1177_v17  ;;  %2772 = vmatpush.bf16.msrb.mxu1 %v4735_v62  ;;  %v5083_v40 = vld [vmem:[#allocation3 + $0x14] sm:$0xf0]  ;;  %v5110_v43 = vld [vmem:[#allocation3 + $0xf4] sm:$0xf]  ;;  %v4814_v62 = vld [vmem:[#allocation3 + $0x1c0] sm:$0xf]  ;;  %v4651_v34 = vor.u32 %v5094_v51, %v4648_v5 }
 0x22d   : > { %2022 = vst [vmem:[#allocation3 + $0x1d8] sm:$0xff] %v2002_v32  ;;  %2734 = vmatpush.bf16.msra.mxu3 %v4607_v16  ;;  %v4599_v46 = vor.u32 %v5083_v40, %v4598_v11  ;;  %v4715_v52 = vor.u32 %v5110_v43, %v4712_v14  ;;  %v4696_v36 = vld [vmem:[#allocation3 + $0xd8] sm:$0xf0]  ;;  %v4654_v16 = vld [vmem:[#allocation3 + $0x80] sm:$0xf]  ;;  %v4815_v42 = vor.u32 %v5137_v26, %v4814_v62 }
 0x22e   : > { %1198 = vst [vmem:[#allocation3 + $0x98] sm:$0xff] %v1178_v30  ;;  %v6470_v32 = vld [vmem:[#allocation1] sm:$0xff]  ;;  %v2163_v30 = vpop.permute.xlu2 %2162  ;;  %v4655_v11 = vor.u32 %v5097_v22, %v4654_v16  ;;  %v5106_v40 = vld [vmem:[#allocation3 + $0xd4] sm:$0xf]  ;;  %v4688_v43 = vld [vmem:[#allocation3 + $0xc8] sm:$0xf0] }
 0x22f   : > { %2752 = vmatpush.bf16.msrb.mxu0 %v4679_v55  ;;  %v6472_v55 = vld [vmem:[#allocation1 + $0x9] sm:$0xff]  ;;  %v4640_v14 = vld [vmem:[#allocation3 + $0x68] sm:$0xf0] }
 0x230   : > { %2773 = vmatpush.bf16.msrb.mxu1 %v4727_v10  ;;  %v1753_v27 = vpop.permute.xlu1 %1752  ;;  %v2171_v9 = vpop.permute.xlu0 %2170  ;;  %v4699_v10 = vor.u32 %v5106_v40, %v4696_v36  ;;  %v4672_v26 = vld [vmem:[#allocation3 + $0xa8] sm:$0xf0]  ;;  %v5086_v40 = vld [vmem:[#allocation3 + $0x34] sm:$0xf] }
 0x231   : > { %2735 = vmatpush.bf16.msra.mxu3 %v4599_v46  ;;  %v1780_v61 = vrot.slane %v1753_v27, 4  ;;  %v2191_v44 = vrot.slane %v2171_v9, 4  ;;  %v5135_v46 = vld [vmem:[#allocation3 + $0x1b4] sm:$0xf0]  ;;  %v4885_v9 = vld [vmem:[%s7335_s9 + $0xe] sm:$0x3] }
 0x232   : > { %3726 = vst [vmem:[#allocation1] ss:$9 sm:$0xff] %v4885_v9 }
 0x233   : > { %v1797_v4 = vsel %vm765_vm10, %v1780_v61, %v1781_v31  ;;  %v2207_v56 = vsel %vm765_vm10, %v2190_v23, %v2191_v44  ;;  %2753 = vmatpush.bf16.msrb.mxu0 %v4671_v6  ;;  %v4798_v23 = vld [vmem:[#allocation3 + $0x1a0] sm:$0xf]  ;;  %v4807_v31 = vor.u32 %v5135_v46, %v4806_v3  ;;  %v5133_v61 = vld [vmem:[#allocation3 + $0x1a4] sm:$0xf0]  ;;  %v4691_v44 = vor.u32 %v5104_v12, %v4688_v43  ;;  %v4616_v43 = vld [vmem:[#allocation3 + $0x38] sm:$0xf0] }
 0x234   : > { %v1798_v54 = vsel %vm1061_vm5, %v1753_v27, %v1797_v4  ;;  %v2208_v39 = vsel %vm656_vm2, %v6301_v41, %v2207_v56  ;;  %2774 = vmatpush.bf16.msrb.mxu1 %v4719_v48  ;;  %v5139_v18 = vld [vmem:[#allocation3 + $0x1d4] sm:$0xf0]  ;;  %v4707_v41 = vor.u32 %v5108_v58, %v4704_v59  ;;  %v4643_v6 = vor.u32 %v5092_v45, %v4640_v14  ;;  %v5098_v14 = vld [vmem:[#allocation3 + $0x94] sm:$0xf]  ;;  %v5084_v12 = vld [vmem:[#allocation3 + $0x24] sm:$0xf] }
 0x235   : > { %1819 = vst [vmem:[#allocation3 + $0x190] sm:$0xff] %v1798_v54  ;;  %2736 = vmatpush.bf16.msra.mxu3 %v4591_v29  ;;  %v5099_v21 = vld [vmem:[#allocation3 + $0x94] sm:$0xf0]  ;;  %v4823_v19 = vor.u32 %v5139_v18, %v4822_v49  ;;  %v2184_v48 = vrot.slane %v6437_v13, 4  ;;  %v4578_v29 = vld [vmem:[%s7331_s5 + $0x30] sm:$0xf]  ;;  %v4683_v59 = vor.u32 %v5102_v60, %v4680_v28  ;;  %v4619_v9 = vor.u32 %v5086_v40, %v4616_v43 }
 0x236   : > { %2226 = vst [vmem:[#allocation3 + $0x228] sm:$0xff] %v2208_v39  ;;  %v4663_v47 = vor.u32 %v5099_v21, %v4662_v24  ;;  %v4799_v39 = vor.u32 %v5133_v61, %v4798_v23  ;;  %v5077_v49 = vld [vmem:[%s7331_s5 + $0x38] sm:$0xf0]  ;;  %v6497_v51 = vor.u32 %v5078_v57, %v4578_v29  ;;  %v4656_v60 = vld [vmem:[#allocation3 + $0x88] sm:$0xf0] }
 0x237   : > { %2788 = vmatpush.bf16.msrb.mxu2 %v4823_v19  ;;  %2775 = vmatmul.bf16.vlgmr.msrb.gmra.mxu1 %v6455_v1  ;;  %v5090_v18 = vld [vmem:[#allocation3 + $0x54] sm:$0xf]  ;;  %v5148_v40 = vld [vmem:[#allocation3 + $0x224] sm:$0xf] }
 0x238   : > { %2843 = vmatpush.bf16.msra.mxu1 %v4715_v52  ;;  %2754 = vmatpush.bf16.msrb.mxu0 %v4663_v47  ;;  %v1759_v8 = vpop.permute.xlu1 %1758  ;;  %v1757_v33 = vpop.permute.xlu0 %1756  ;;  %v2187_v52 = vrot.slane %v2163_v30, 4  ;;  %v4635_v19 = vor.u32 %v5090_v18, %v4632_v35  ;;  %v5100_v47 = vld [vmem:[#allocation3 + $0xa4] sm:$0xf]  ;;  %v4608_v35 = vld [vmem:[#allocation3 + $0x28] sm:$0xf0] }
 0x239   : > { %2809 = vmatpush.bf16.msrb.mxu3 %v4871_v15  ;;  %v1783_v50 = vrot.slane %v1759_v8, 4  ;;  %v1782_v17 = vrot.slane %v1757_v33, 4  ;;  %v4570_v15 = vld [vmem:[%s7331_s5 + $0x28] sm:$0xf]  ;;  %v3727_v20 = vld [vmem:[#allocation1] sm:$0xff]  ;;  %v4675_v30 = vor.u32 %v5100_v47, %v4672_v26  ;;  %v4611_v29 = vor.u32 %v5084_v12, %v4608_v35 }
 0x23a   : > { %2737 = vmatmul.bf16.vlgmr.msra.gmra.mxu3 %v6460_v53  ;;  %v6504_v36 = vor.u32 %v5077_v49, %v4570_v15  ;;  %v3729_v16 = vpack.i.b16 %v3727_v20, %v3727_v20  ;;  %v4840_v12 = vld [vmem:[#allocation3 + $0x1f8] sm:$0xf0] }
 0x23b   : > { %v1799_v38 = vsel %vm765_vm10, %v1782_v17, %v1783_v50  ;;  %2789 = vmatpush.bf16.msrb.mxu2 %v4815_v42  ;;  %v3728_v50 = vld [vmem:[#allocation1 + $0x9] sm:$0xff] }
 0x23c   : > { %2844 = vmatpush.bf16.msra.mxu1 %v4707_v41  ;;  %v1800_v7 = vsel %vm1061_vm5, %v1757_v33, %v1799_v38  ;;  %2755 = vmatpush.bf16.msrb.mxu0 %v4655_v11  ;;  %v6499_v41 = vpop.permute.xlu2 %1748  ;;  %v4790_v5 = vld [vmem:[#allocation3 + $0x190] sm:$0xf]  ;;  %v4624_v33 = vld [vmem:[#allocation3 + $0x48] sm:$0xf0]  ;;  %v5088_v17 = vld [vmem:[#allocation3 + $0x44] sm:$0xf]  ;;  %v3732_v42 = vpack.i.b16 %v3728_v50, %v3728_v50 }
 0x23d   : > { %1820 = vst [vmem:[#allocation3 + $0x198] sm:$0xff] %v1800_v7  ;;  %v5149_v27 = vld [vmem:[#allocation3 + $0x224] sm:$0xf0]  ;;  %v4627_v11 = vor.u32 %v5088_v17, %v4624_v33  ;;  %v3731_v3 = vperm.slane %v3729_v16, 0  ;;  %v1778_v15 = vrot.slane %v6499_v41, 4 }
 0x23e   : > { %v4863_v25 = vor.u32 %v5149_v27, %v4862_v2  ;;  %v3734_v45 = vperm.slane %v3732_v42, 0 }
 0x23f   : > { %2790 = vmatpush.bf16.msrb.mxu2 %v4807_v31  ;;  %2756 = vmatmul.bf16.vlgmr.msrb.gmra.mxu0 %v6475_v0  ;;  %v3747_v23 = vunpack.c.l.bf16 %v3731_v3  ;;  %v4560_v3 = vld [vmem:[%s7331_s5 + $0x1c] sm:$0xf0] }
 0x240   : > { %2824 = vmatpush.bf16.msra.mxu0 %v4651_v34  ;;  %2845 = vmatpush.bf16.msra.mxu1 %v4699_v10  ;;  %v2161_v4 = vpop.permute.xlu1 %2160  ;;  %v2159_v56 = vpop.permute.xlu0 %2158  ;;  %v5075_v34 = vld [vmem:[%s7331_s5 + $0x2c] sm:$0xf]  ;;  %v4572_v10 = vld [vmem:[%s7331_s5 + $0x3c] sm:$0xf0]  ;;  %v3748_v31 = vunpack.c.l.bf16 %v3734_v45 }
 0x241   : > { %2810 = vmatpush.bf16.msrb.mxu3 %v4863_v25  ;;  %v2186_v58 = vrot.slane %v2161_v4, 4  ;;  %v2185_v54 = vrot.slane %v2159_v56, 4  ;;  %v6515_v61 = vor.u32 %v5075_v34, %v4572_v10  ;;  %v5096_v56 = vld [vmem:[#allocation3 + $0x84] sm:$0xf] }
 0x242   : > { %v5254_v28 = vpack.i.bf16 %v3748_v31, %v3747_v23  ;;  %v4659_v57 = vor.u32 %v5096_v56, %v4656_v60  ;;  %v5124_v31 = vld [vmem:[#allocation3 + $0x164] sm:$0xf] }
 0x243   : > { %v2203_v24 = vsel %vm765_vm10, %v2186_v58, %v2187_v52  ;;  %v2201_v21 = vsel %vm765_vm10, %v2184_v48, %v2185_v54  ;;  %2791 = vmatpush.bf16.msrb.mxu2 %v4799_v39  ;;  %v4600_v39 = vld [vmem:[#allocation3 + $0x18] sm:$0xf0] }
 0x244   : > { %2846 = vmatpush.bf16.msra.mxu1 %v4691_v44  ;;  %2825 = vmatpush.bf16.msra.mxu0 %v4643_v6  ;;  %v2204_v22 = vsel %vm656_vm2, %v2161_v4, %v2203_v24  ;;  %v2202_v62 = vsel %vm656_vm2, %v6437_v13, %v2201_v21  ;;  %v5131_v8 = vld [vmem:[#allocation3 + $0x194] sm:$0xf0]  ;;  %v4664_v13 = vld [vmem:[#allocation3 + $0x98] sm:$0xf0]  ;;  %v2151_v52 = vpop.permute.xlu2 %2150  ;;  %v5082_v24 = vld [vmem:[#allocation3 + $0x14] sm:$0xf] }
 0x245   : > { %2224 = vst [vmem:[#allocation3 + $0x218] sm:$0xff] %v2204_v22  ;;  %v4791_v37 = vor.u32 %v5131_v8, %v4790_v5  ;;  %v4667_v25 = vor.u32 %v5098_v14, %v4664_v13  ;;  %5255 = vrot.lane.b32.xlu0 %v5254_v28, %s5328_s21  ;;  %v2181_v49 = vrot.slane %v2151_v52, 4  ;;  %v4603_v47 = vor.u32 %v5082_v24, %v4600_v39  ;;  %v4872_v5 = vld [vmem:[#allocation3 + $0x238] sm:$0xf0]  ;;  %v5080_v8 = vld [vmem:[#allocation3 + $0x4] sm:$0xf] }
 0x246   : > { %2223 = vst [vmem:[#allocation3 + $0x210] sm:$0xff] %v2202_v62  ;;  %v4592_v62 = vld [vmem:[#allocation3 + $0x8] sm:$0xf0]  ;;  %v4776_v13 = vld [vmem:[#allocation3 + $0x178] sm:$0xf0] }
 0x247   : > { %2792 = vmatpush.bf16.msrb.mxu2 %v4791_v37  ;;  %2780 = vmatmul.bf16.gmra.mxu1 %v6497_v51  ;;  %v4595_v33 = vor.u32 %v5080_v8, %v4592_v62  ;;  %v5150_v37 = vld [vmem:[#allocation3 + $0x234] sm:$0xf]  ;;  %v4752_v24 = vld [vmem:[#allocation3 + $0x148] sm:$0xf0] }
 0x248   : > { %2826 = vmatpush.bf16.msra.mxu0 %v4635_v19  ;;  %2847 = vmatpush.bf16.msra.mxu1 %v4683_v59  ;;  %v1747_v46 = vpop.permute.xlu1 %1746  ;;  %v1745_v38 = vpop.permute.xlu0 %1744  ;;  %v4875_v17 = vor.u32 %v5150_v37, %v4872_v5  ;;  %v4824_v5 = vld [vmem:[#allocation3 + $0x1d8] sm:$0xf0]  ;;  %v5076_v8 = vld [vmem:[%s7331_s5 + $0x34] sm:$0xf]  ;;  %v5138_v37 = vld [vmem:[#allocation3 + $0x1d4] sm:$0xf] }
 0x249   : > { %v1777_v7 = vrot.slane %v1747_v46, 4  ;;  %v1776_v2 = vrot.slane %v1745_v38, 4  ;;  %v5071_v46 = vld [vmem:[%s7331_s5 + $0xc] sm:$0xf] }
 0x24a   : > { %2742 = vmatmul.bf16.gmra.mxu3 %v6504_v36  ;;  %v6535_v14 = vor.u32 %v5071_v46, %v4560_v3  ;;  %v5079_v46 = vld [vmem:[%s7331_s5 + $0x48] sm:$0xf0] }
 0x24b   : > { %v1792_v27 = vsel %vm765_vm10, %v1776_v2, %v1777_v7 }
 0x24c   : > { %2848 = vmatpush.bf16.msra.mxu1 %v4675_v30  ;;  %2827 = vmatpush.bf16.msra.mxu0 %v4627_v11  ;;  %v1794_v44 = vsel %vm1061_vm5, %v1745_v38, %v1792_v27  ;;  %v5147_v6 = vld [vmem:[#allocation3 + $0x214] sm:$0xf0]  ;;  %v4864_v30 = vld [vmem:[#allocation3 + $0x228] sm:$0xf0]  ;;  %v5126_v11 = vld [vmem:[#allocation3 + $0x174] sm:$0xf] }
 0x24d   : > { %1817 = vst [vmem:[#allocation3 + $0x180] sm:$0xff] %v1794_v44  ;;  %v4854_v48 = vld [vmem:[#allocation3 + $0x210] sm:$0xf]  ;;  %v5146_v34 = vld [vmem:[#allocation3 + $0x214] sm:$0xf]  ;;  %v4779_v43 = vor.u32 %v5126_v11, %v4776_v13 }
 0x24e   : > { %v4855_v4 = vor.u32 %v5147_v6, %v4854_v48  ;;  %v4856_v10 = vld [vmem:[#allocation3 + $0x218] sm:$0xf0]  ;;  %v4768_v27 = vld [vmem:[#allocation3 + $0x168] sm:$0xf0]  ;;  %v5122_v44 = vld [vmem:[#allocation3 + $0x154] sm:$0xf] }
 0x24f   : > { %2761 = vmatmul.bf16.gmra.mxu0 %v6515_v61  ;;  %v4859_v23 = vor.u32 %v5146_v34, %v4856_v10  ;;  %v4760_v6 = vld [vmem:[#allocation3 + $0x158] sm:$0xf0]  ;;  %v4566_v48 = vld [vmem:[%s7331_s5 + $0x10] sm:$0xf]  ;;  %v5136_v11 = vld [vmem:[#allocation3 + $0x1c4] sm:$0xf] }
 0x250   : > { %2828 = vmatpush.bf16.msra.mxu0 %v4619_v9  ;;  %2849 = vmatpush.bf16.msra.mxu1 %v4667_v25  ;;  %v2149_v58 = vpop.permute.xlu1 %2148  ;;  %v1751_v54 = vpop.permute.xlu0 %1750  ;;  %v3618_v9 = vpack.i.b16 %v6470_v32, %v6470_v32  ;;  %v3621_v25 = vpack.i.b16 %v6472_v55, %v6472_v55  ;;  %v5074_v32 = vld [vmem:[%s7331_s5 + $0x20] sm:$0xf0]  ;;  %v4586_v13 = vld [vmem:[%s7331_s5 + $0x38] sm:$0xf] }
 0x251   : > { %2811 = vmatpush.bf16.msrb.mxu3 %v4855_v4  ;;  %v2180_v18 = vrot.slane %v2149_v58, 4  ;;  %v1779_v59 = vrot.slane %v1751_v54, 4  ;;  %v5142_v54 = vld [vmem:[#allocation3 + $0x1f4] sm:$0xf]  ;;  %v4587_v10 = vor.u32 %v5079_v46, %v4586_v13  ;;  %v3723_v46 = vld [vmem:[#allocation2 + $0x3c] sm:$0xf] }
 0x252   : > { %v3620_v35 = vperm.slane %v3618_v9, 0  ;;  %v3623_v60 = vperm.slane %v3621_v25, 0  ;;  %v4843_v39 = vor.u32 %v5142_v54, %v4840_v12  ;;  %v4792_v12 = vld [vmem:[#allocation3 + $0x198] sm:$0xf0]  ;;  %v7355_v54 = vld [vmem:[#allocation9_spill] sm:$0xff] }
 0x253   : > { %v2196_v21 = vsel %vm765_vm10, %v2180_v18, %v2181_v49  ;;  %v1795_v19 = vsel %vm765_vm10, %v1778_v15, %v1779_v59  ;;  %v6549_v15 = vor.u32 %v5074_v32, %v4566_v48  ;;  %v4763_v18 = vor.u32 %v5122_v44, %v4760_v6  ;;  %v4832_v59 = vld [vmem:[#allocation3 + $0x1e8] sm:$0xf0] }
 0x254   : > { %2829 = vmatpush.bf16.msra.mxu0 %v4611_v29  ;;  %2850 = vmatpush.bf16.msra.mxu1 %v4659_v57  ;;  %v2198_v26 = vsel %vm656_vm2, %v2149_v58, %v2196_v21  ;;  %v1796_v22 = vsel %vm1061_vm5, %v6499_v41, %v1795_v19  ;;  %v4782_v45 = vld [vmem:[#allocation3 + $0x180] sm:$0xf]  ;;  %v3636_v56 = vunpack.c.l.bf16 %v3620_v35  ;;  %v3637_v29 = vunpack.c.l.bf16 %v3623_v60  ;;  %v5140_v21 = vld [vmem:[#allocation3 + $0x1e4] sm:$0xf]  ;;  %v5130_v35 = vld [vmem:[#allocation3 + $0x194] sm:$0xf] }
 0x255   : > { %2221 = vst [vmem:[#allocation3 + $0x200] sm:$0xff] %v2198_v26  ;;  %v5120_v19 = vld [vmem:[#allocation3 + $0x144] sm:$0xf]  ;;  %v5118_v26 = vld [vmem:[#allocation3 + $0x134] sm:$0xf]  ;;  %v4795_v60 = vor.u32 %v5130_v35, %v4792_v12 }
 0x256   : > { %1818 = vst [vmem:[#allocation3 + $0x188] sm:$0xff] %v1796_v22  ;;  %v5264_v49 = vpack.i.bf16 %v3637_v29, %v3636_v56  ;;  %v4744_v22 = vld [vmem:[#allocation3 + $0x138] sm:$0xf0]  ;;  %v4755_v62 = vor.u32 %v5120_v19, %v4752_v24  ;;  %v7353_v56 = vld [vmem:[#allocation12_spill] sm:$0xff] }
 0x257   : > { %2851 = vmatmul.bf16.vlgmr.msra.gmra.mxu1 %v6475_v0  ;;  %v4867_v0 = vor.u32 %v5148_v40, %v4864_v30  ;;  %v4808_v40 = vld [vmem:[#allocation3 + $0x1b8] sm:$0xf0]  ;;  %v3510_v29 = vpack.i.b16 %v7353_v56, %v7353_v56 }
 0x258   : > { %2830 = vmatpush.bf16.msra.mxu0 %v4603_v47  ;;  %v2155_v20 = vpop.permute.xlu1 %2154  ;;  %v2153_v50 = vpop.permute.xlu0 %2152  ;;  %5265 = vrot.lane.b32.xlu2 %v5264_v49, %s5326_s6  ;;  %v4835_v47 = vor.u32 %v5140_v21, %v4832_v59 }
 0x259   : > { %v2183_v16 = vrot.slane %v2155_v20, 4  ;;  %v2182_v42 = vrot.slane %v2153_v50, 4  ;;  %v4827_v20 = vor.u32 %v5138_v37, %v4824_v5  ;;  %v7358_v5 = vld [vmem:[#allocation6_spill] sm:$0xff] }
 0x25b   : > { %v2199_v41 = vsel %vm765_vm10, %v2182_v42, %v2183_v16  ;;  %v4816_v42 = vld [vmem:[#allocation3 + $0x1c8] sm:$0xf0] }
 0x25c   : > { %2831 = vmatpush.bf16.msra.mxu0 %v4595_v33  ;;  %v2200_v38 = vsel %vm656_vm2, %v2153_v50, %v2199_v41  ;;  %v4846_v28 = vld [vmem:[#allocation3 + $0x200] sm:$0xf]  ;;  %v5144_v52 = vld [vmem:[#allocation3 + $0x204] sm:$0xf]  ;;  %v4747_v33 = vor.u32 %v5118_v26, %v4744_v22  ;;  %v4819_v41 = vor.u32 %v5136_v11, %v4816_v42  ;;  %v7357_v22 = vld [vmem:[#allocation5_spill] sm:$0xff] }
 0x25d   : > { %2222 = vst [vmem:[#allocation3 + $0x208] sm:$0xff] %v2200_v38  ;;  %v5129_v7 = vld [vmem:[#allocation3 + $0x184] sm:$0xf0]  ;;  %v5116_v50 = vld [vmem:[#allocation3 + $0x124] sm:$0xf] }
 0x25e   : > { %v4783_v2 = vor.u32 %v5129_v7, %v4782_v45  ;;  %v4728_v38 = vld [vmem:[#allocation3 + $0x118] sm:$0xf0]  ;;  %v5132_v45 = vld [vmem:[#allocation3 + $0x1a4] sm:$0xf]  ;;  %v4800_v7 = vld [vmem:[#allocation3 + $0x1a8] sm:$0xf0] }
 0x25f   : > { %2832 = vmatmul.bf16.vlgmr.msra.gmra.mxu0 %v6460_v53  ;;  %v4771_v53 = vor.u32 %v5124_v31, %v4768_v27  ;;  %v3388_v31 = vpack.i.b16 %v5564_v63, %v5564_v63  ;;  %v7351_v27 = vld [vmem:[#allocation10_spill] sm:$0xff]  ;;  %v4784_v48 = vld [vmem:[#allocation3 + $0x188] sm:$0xf0]  ;;  %v5128_v63 = vld [vmem:[#allocation3 + $0x184] sm:$0xf] }
 0x260   : > { %2904 = vmatpush.bf16.msrb.mxu0 %v4875_v17  ;;  %2793 = vmatpush.bf16.msrb.mxu2 %v4783_v2  ;;  %v4736_v17 = vld [vmem:[#allocation3 + $0x128] sm:$0xf0]  ;;  %v3391_v9 = vpack.i.b16 %v7351_v27, %v7351_v27 }
 0x261   : > { %v4739_v30 = vor.u32 %v5116_v50, %v4736_v17  ;;  %v4720_v2 = vld [vmem:[#allocation3 + $0x108] sm:$0xf0]  ;;  %v3390_v44 = vperm.slane %v3388_v31, 0 }
 0x262   : > { %v3393_v6 = vperm.slane %v3391_v9, 0 }
 0x263   : > { %2794 = vmatmul.bf16.vlgmr.msrb.gmra.mxu2 %v6535_v14 }
 0x264   : > { %2905 = vmatpush.bf16.msrb.mxu0 %v4867_v0  ;;  %2862 = vmatpush.bf16.msra.mxu2 %v4779_v43  ;;  %v5145_v55 = vld [vmem:[#allocation3 + $0x204] sm:$0xf0]  ;;  %v4848_v4 = vld [vmem:[#allocation3 + $0x208] sm:$0xf0]  ;;  %v5134_v0 = vld [vmem:[#allocation3 + $0x1b4] sm:$0xf] }
 0x265   : > { %v4847_v57 = vor.u32 %v5145_v55, %v4846_v28  ;;  %v4851_v58 = vor.u32 %v5144_v52, %v4848_v4  ;;  %v4811_v34 = vor.u32 %v5134_v0, %v4808_v40  ;;  %v5112_v43 = vld [vmem:[#allocation3 + $0x104] sm:$0xf]  ;;  %v3407_v28 = vunpack.c.l.bf16 %v3393_v6  ;;  %v7352_v52 = vld [vmem:[#allocation11_spill] sm:$0xff] }
 0x266   : > { %v4723_v25 = vor.u32 %v5112_v43, %v4720_v2  ;;  %v4787_v55 = vor.u32 %v5128_v63, %v4784_v48  ;;  %v3507_v4 = vpack.i.b16 %v7352_v52, %v7352_v52  ;;  %v3719_v0 = vld [vmem:[#allocation2 + $0x1c] sm:$0xf]  ;;  %v3606_v63 = vld [vmem:[#allocation2 + $0xc] sm:$0xf] }
 0x267   : > { %2812 = vmatpush.bf16.msrb.mxu3 %v4847_v57  ;;  %2856 = vmatmul.bf16.gmra.mxu1 %v6515_v61  ;;  %v4580_v61 = vld [vmem:[%s7331_s5 + $0x44] sm:$0xf0]  ;;  %v3608_v52 = vld [vmem:[#allocation2 + $0x1c] sm:$0xf] }
 0x268   : > { %2906 = vmatpush.bf16.msrb.mxu0 %v4859_v23  ;;  %2863 = vmatpush.bf16.msra.mxu2 %v4771_v53  ;;  %v4583_v16 = vor.u32 %v5076_v8, %v4580_v61  ;;  %v4803_v23 = vor.u32 %v5132_v45, %v4800_v7  ;;  %v3406_v53 = vunpack.c.l.bf16 %v3390_v44  ;;  %v7354_v57 = vld [vmem:[#allocation8_spill] sm:$0xff]  ;;  %v3166_v8 = vpack.i.b16 %v7358_v5, %v7358_v5  ;;  %v7359_v61 = vld [vmem:[#allocation7_spill] sm:$0xff] }
 0x269   : > { %v3612_v7 = vld [vmem:[#allocation2 + $0x3c] sm:$0xf] }
 0x26a   : > { %4876 = vmatmul.msk.bf16.vlgmr.msrb.gmra.mxu3 %vm451_vm0, %v6549_v15  ;;  %v5259_v32 = vpack.i.bf16 %v3407_v28, %v3406_v53  ;;  %v3168_v50 = vperm.slane %v3166_v8, 0 }
 0x26b   : > { %2881 = vmatpush.bf16.msra.mxu3 %v4843_v39  ;;  %v3509_v39 = vperm.slane %v3507_v4, 0 }
 0x26c   : > { %2907 = vmatpush.bf16.msrb.mxu0 %v4851_v58  ;;  %2864 = vmatpush.bf16.msra.mxu2 %v4763_v18  ;;  %v3277_v58 = vpack.i.b16 %v7354_v57, %v7354_v57  ;;  %v3626_v57 = vunpack.c.l.bf16 %v3606_v63 }
 0x26d   : > { %5260 = vrot.lane.b32.xlu1 %v5259_v32, %s5324_s25  ;;  %v3525_v18 = vunpack.c.l.bf16 %v3509_v39  ;;  %v3610_v32 = vld [vmem:[#allocation2 + $0x2c] sm:$0xf] }
 0x26f   : > { %2882 = vmatpush.bf16.msra.mxu3 %v4835_v47  ;;  %2837 = vmatmul.bf16.gmra.mxu0 %v6504_v36  ;;  %v5114_v36 = vld [vmem:[#allocation3 + $0x114] sm:$0xf]  ;;  %v7356_v47 = vld [vmem:[#allocation4_spill] sm:$0xff] }
 0x270   : > { %2865 = vmatpush.bf16.msra.mxu2 %v4755_v62  ;;  %v4731_v3 = vor.u32 %v5114_v36, %v4728_v38  ;;  %v3055_v26 = vpack.i.b16 %v7356_v47, %v7356_v47  ;;  %v3058_v62 = vpack.i.b16 %v7357_v22, %v7357_v22  ;;  %v3721_v38 = vld [vmem:[#allocation2 + $0x2c] sm:$0xf]  ;;  %v3746_v36 = vunpack.c.l.bf16 %v3723_v46 }
 0x272   : > { %v3057_v37 = vperm.slane %v3055_v26, 0 }
 0x273   : > { %2883 = vmatpush.bf16.msra.mxu3 %v4827_v20  ;;  %2799 = vmatmul.bf16.gmra.mxu2 %v4583_v16  ;;  %v3060_v20 = vperm.slane %v3058_v62, 0 }
 0x274   : > { %2866 = vmatpush.bf16.msra.mxu2 %v4747_v33  ;;  %v3169_v33 = vpack.i.b16 %v7359_v61, %v7359_v61 }
 0x275   : > { %v3074_v42 = vunpack.c.l.bf16 %v3060_v20 }
 0x276   : > { %v3171_v17 = vperm.slane %v3169_v33, 0 }
 0x277   : > { %2884 = vmatpush.bf16.msra.mxu3 %v4819_v41 }
 0x278   : > { %2867 = vmatpush.bf16.msra.mxu2 %v4739_v30  ;;  %v3184_v30 = vunpack.c.l.bf16 %v3168_v50  ;;  %v3185_v11 = vunpack.c.l.bf16 %v3171_v17 }
 0x27a   : > { %4877 = vmatmul.msk.bf16.gmra.mxu3 %vm451_vm0, %v4587_v10  ;;  %v5279_v40 = vpack.i.bf16 %v3185_v11, %v3184_v30 }
 0x27b   : > { %2885 = vmatpush.bf16.msra.mxu3 %v4811_v34  ;;  %v3743_v34 = vunpack.c.l.bf16 %v3721_v38 }
 0x27c   : > { %2868 = vmatpush.bf16.msra.mxu2 %v4731_v3  ;;  %v3717_v3 = vld [vmem:[#allocation2 + $0xc] sm:$0xf] }
 0x27d   : > { %v3737_v43 = vunpack.c.l.bf16 %v3717_v3 }
 0x27f   : > { %2886 = vmatpush.bf16.msra.mxu3 %v4803_v23  ;;  %4878 = vmatmul.msk.bf16.vlgmr.msrb.gmra.mxu0 %vm451_vm0, %v6549_v15  ;;  %v3512_v15 = vperm.slane %v3510_v29, 0 }
 0x280   : > { %2869 = vmatpush.bf16.msra.mxu2 %v4723_v25  ;;  %v3635_v25 = vunpack.c.l.bf16 %v3612_v7 }
 0x281   : > { %v3526_v59 = vunpack.c.l.bf16 %v3512_v15 }
 0x283   : > { %2887 = vmatpush.bf16.msra.mxu3 %v4795_v60  ;;  %2870 = vmatmul.bf16.vlgmr.msra.gmra.mxu2 %v6455_v1  ;;  %v3280_v1 = vpack.i.b16 %v7355_v54, %v7355_v54  ;;  %v5274_v21 = vpack.i.bf16 %v3526_v59, %v3525_v18 }
 0x285   : > { %v3282_v49 = vperm.slane %v3280_v1, 0  ;;  %5275 = vrot.lane.b32.xlu1 %v5274_v21, %s5325_s26  ;;  %v4886_v21 = vld [vmem:[%s7335_s9 + $0x10] sm:$0x3] }
 0x286   : > { %3837 = vst [vmem:[#allocation1] ss:$9 sm:$0xff] %v4886_v21 }
 0x287   : > { %2888 = vmatpush.bf16.msra.mxu3 %v4787_v55  ;;  %v3296_v24 = vunpack.c.l.bf16 %v3282_v49  ;;  %v3632_v55 = vunpack.c.l.bf16 %v3610_v32 }
 0x28a   : > { %2889 = vmatmul.bf16.vlgmr.msra.gmra.mxu3 %v6535_v14  ;;  %v3279_v14 = vperm.slane %v3277_v58, 0  ;;  %v3629_v58 = vunpack.c.l.bf16 %v3608_v52 }
 0x28d   : > { %v3838_v62 = vld [vmem:[#allocation1] sm:$0xff]  ;;  %v3839_v5 = vld [vmem:[#allocation1 + $0x9] sm:$0xff] }
 0x28e   : > { %v3840_v8 = vpack.i.b16 %v3838_v62, %v3838_v62  ;;  %v3843_v61 = vpack.i.b16 %v3839_v5, %v3839_v5 }
 0x28f   : > { %4879 = vmatmul.msk.bf16.gmra.mxu0 %vm451_vm0, %v4587_v10  ;;  %v3740_v10 = vunpack.c.l.bf16 %v3719_v0 }
 0x290   : > { %v3842_v33 = vperm.slane %v3840_v8, 0 }
 0x292   : > { %v3858_v50 = vunpack.c.l.bf16 %v3842_v33 }
 0x293   : > { %2875 = vmatmul.bf16.gmra.mxu2 %v6497_v51  ;;  %v3295_v51 = vunpack.c.l.bf16 %v3279_v14 }
 0x295   : > { %v5269_v19 = vpack.i.bf16 %v3296_v24, %v3295_v51 }
 0x297   : > { %5270 = vrot.lane.b32.xlu0 %v5269_v19, %s5323_s24 }
 0x29a   : > { %2894 = vmatmul.bf16.gmra.mxu3 %v4583_v16  ;;  %v3073_v16 = vunpack.c.l.bf16 %v3057_v37  ;;  %v3845_v37 = vperm.slane %v3843_v61, 0  ;;  %v3501_v61 = vld [vmem:[#allocation2 + $0x3c] sm:$0xf] }
 0x29c   : > { %v5284_v41 = vpack.i.bf16 %v3074_v42, %v3073_v16  ;;  %v3859_v17 = vunpack.c.l.bf16 %v3845_v37 }
 0x29e   : > { %5285 = vrot.lane.b32.xlu2 %v5284_v41, %s5321_s8  ;;  %v5289_v11 = vpack.i.bf16 %v3859_v17, %v3858_v50  ;;  %v3524_v17 = vunpack.c.l.bf16 %v3501_v61 }
 0x29f   : > { %5280 = vrot.lane.b32.xlu0 %v5279_v40, %s5322_s18 }
 0x2b2   : > { %v6610_v9 = vpop.permute.xlu2 %5265 }
 0x2b3   : > { %v6613_v12 = vunpack.i.h.bf16 %v6610_v9 }
 0x2b4   : > { %v2776_v59 = vpop.f32.mrf.mxu1 }
 0x2b5   : > { %v3659_v48 = vmul.f32 %v6613_v12, %v3635_v25  ;;  %v3656_v4 = vmul.f32 %v6613_v12, %v3632_v55  ;;  %v3650_v39 = vmul.f32 %v6613_v12, %v3626_v57  ;;  %v3653_v15 = vmul.f32 %v6613_v12, %v3629_v58 }
 0x2b7   : > { %v6602_v45 = vpop.permute.xlu0 %5255  ;;  %v3667_v29 = vpack.c.bf16 %v3659_v48, %v3659_v48  ;;  %v3665_v54 = vpack.c.bf16 %v3656_v4, %v3656_v4  ;;  %v3661_v49 = vpack.c.bf16 %v3650_v39, %v3650_v39  ;;  %v3663_v18 = vpack.c.bf16 %v3653_v15, %v3653_v15 }
 0x2b8   : > { %v6605_v2 = vunpack.i.h.bf16 %v6602_v45 }
 0x2ba   : > { %v3770_v23 = vmul.f32 %v6605_v2, %v3746_v36  ;;  %v3767_v31 = vmul.f32 %v6605_v2, %v3743_v34  ;;  %v3764_v27 = vmul.f32 %v6605_v2, %v3740_v10  ;;  %v3761_v28 = vmul.f32 %v6605_v2, %v3737_v43 }
 0x2bc   : > { %v6600_v13 = vpop.f32.mrf.mxu0  ;;  %v3778_v6 = vpack.c.bf16 %v3770_v23, %v3770_v23  ;;  %v3776_v35 = vpack.c.bf16 %v3767_v31, %v3767_v31  ;;  %v3774_v60 = vpack.c.bf16 %v3764_v27, %v3764_v27  ;;  %v3772_v56 = vpack.c.bf16 %v3761_v28, %v3761_v28  ;;  %v2778_v47 = vpop.f32.mrf.mxu1 }
 0x2bd   : > { %v2738_v53 = vpop.f32.mrf.mxu3 }
 0x2be   : > { %3801 = vrot.lane.b32.xlu1 %v3778_v6, %s5322_s18  ;;  %3797 = vrot.lane.b32.xlu0 %v3776_v35, %s5322_s18  ;;  %v2758_v43 = vadd.f32 %v6600_v13, %v2738_v53 }
 0x2bf   : > { %3793 = vrot.lane.b32.xlu2 %v3774_v60, %s5322_s18 }
 0x2c0   : > { %v2777_v25 = vadd.f32 %v2776_v59, %v2758_v43 }
 0x2c4   : > { %v6615_v44 = vpop.f32.mrf.mxu0  ;;  %v2781_v16 = vpop.f32.mrf.mxu1 }
 0x2c5   : > { %v2740_v14 = vpop.f32.mrf.mxu3 }
 0x2c6   : > { %3789 = vrot.lane.b32.xlu1 %v3772_v56, %s5322_s18  ;;  %3690 = vrot.lane.b32.xlu0 %v3667_v29, %s5323_s24  ;;  %v2760_v32 = vadd.f32 %v6615_v44, %v2740_v14 }
 0x2c7   : > { %3686 = vrot.lane.b32.xlu2 %v3665_v54, %s5323_s24 }
 0x2c8   : > { %v2779_v53 = vadd.f32 %v2778_v47, %v2760_v32  ;;  %v5329_v32 = vmov 256.0  }
 0x2c9   : > { %5294 = vrcp.f32 %v5329_v32 }
 0x2cc   : > { %v6623_v1 = vpop.f32.mrf.mxu0  ;;  %v2783_v38 = vpop.f32.mrf.mxu1 }
 0x2cd   : > { %v2743_v24 = vpop.f32.mrf.mxu3 }
 0x2ce   : > { %3678 = vrot.lane.b32.xlu0 %v3661_v49, %s5323_s24  ;;  %3682 = vrot.lane.b32.xlu1 %v3663_v18, %s5323_s24  ;;  %v2763_v44 = vadd.f32 %v6623_v1, %v2743_v24 }
 0x2d4   : > { %v6632_v51 = vpop.f32.mrf.mxu0  ;;  %v2852_v10 = vpop.f32.mrf.mxu1 }
 0x2d5   : > { %v6637_v26 = vpop.f32.mrf.mxu3 }
 0x2d6   : > { %5290 = vrot.lane.b32.xlu0 %v5289_v11, %s5327_s20  ;;  %v2765_v1 = vadd.f32 %v6632_v51, %v6637_v26 }
 0x2dc   : > { %v2833_v19 = vpop.f32.mrf.mxu0  ;;  %v2854_v27 = vpop.f32.mrf.mxu1 }
 0x2dd   : > { %v2853_v31 = vadd.f32 %v2852_v10, %v2833_v19  ;;  %v2782_v19 = vadd.f32 %v2781_v16, %v2763_v44 }
 0x2df   : > { %v6648_v29 = vpop.permute.xlu1 %5260 }
 0x2e4   : > { %v2835_v20 = vpop.f32.mrf.mxu0  ;;  %v2857_v57 = vpop.f32.mrf.mxu1 }
 0x2e5   : > { %v2855_v52 = vadd.f32 %v2854_v27, %v2835_v20 }
 0x2e6   : > { %v2795_v22 = vpop.f32.mrf.mxu2 }
 0x2e7   : > { %v2796_v60 = vadd.f32 %v2795_v22, %v2777_v25  ;;  %v3499_v25 = vld [vmem:[#allocation2 + $0x2c] sm:$0xf] }
 0x2ec   : > { %v2838_v40 = vpop.f32.mrf.mxu0  ;;  %v2859_v33 = vpop.f32.mrf.mxu1 }
 0x2ed   : > { %v2814_v42 = vpop.f32.mrf.mxu3  ;;  %v2858_v18 = vadd.f32 %v2857_v57, %v2838_v40 }
 0x2ee   : > { %v2797_v30 = vpop.f32.mrf.mxu2  ;;  %v6642_v63 = vadd.f32 %v2814_v42, %v2796_v60 }
 0x2ef   : > { %v2798_v54 = vadd.f32 %v2797_v30, %v2779_v53  ;;  %v2784_v30 = vadd.f32 %v2783_v38, %v2765_v1  ;;  %v3497_v38 = vld [vmem:[#allocation2 + $0x1c] sm:$0xf] }
 0x2f0   : > { %v3518_v27 = vunpack.c.l.bf16 %v3497_v38 }
 0x2f4   : > { %v2840_v34 = vpop.f32.mrf.mxu0 }
 0x2f5   : > { %v2816_v41 = vpop.f32.mrf.mxu3  ;;  %v2860_v16 = vadd.f32 %v2859_v33, %v2840_v34 }
 0x2f6   : > { %v2800_v46 = vpop.f32.mrf.mxu2  ;;  %v6651_v14 = vadd.f32 %v2816_v41, %v2798_v54 }
 0x2f7   : > { %v2801_v62 = vadd.f32 %v2800_v46, %v2782_v19  ;;  %v6657_v8 = vpop.permute.xlu1 %5275 }
 0x2f8   : > { %v6666_v50 = vunpack.i.h.bf16 %v6657_v8  ;;  %v6690_v53 = vpop.permute.xlu2 %5285 }
 0x2fa   : > { %v3548_v51 = vmul.f32 %v6666_v50, %v3524_v17 }
 0x2fc   : > { %v2909_v23 = vpop.f32.mrf.mxu0  ;;  %v3556_v43 = vpack.c.bf16 %v3548_v51, %v3548_v51 }
 0x2fd   : > { %v2819_v0 = vpop.f32.mrf.mxu3 }
 0x2fe   : > { %v2802_v36 = vpop.f32.mrf.mxu2  ;;  %v6661_v24 = vadd.f32 %v2819_v0, %v2801_v62  ;;  %v3495_v0 = vld [vmem:[#allocation2 + $0xc] sm:$0xf] }
 0x2ff   : > { %v2803_v26 = vadd.f32 %v2802_v36, %v2784_v30 }
 0x304   : > { %v2911_v13 = vpop.f32.mrf.mxu0 }
 0x305   : > { %v2821_v3 = vpop.f32.mrf.mxu3 }
 0x306   : > { %v2871_v7 = vpop.f32.mrf.mxu2  ;;  %v6671_v10 = vadd.f32 %v2821_v3, %v2803_v26  ;;  %v3542_v3 = vmul.f32 %v6666_v50, %v3518_v27 }
 0x307   : > { %v2872_v6 = vadd.f32 %v2871_v7, %v2853_v31 }
 0x308   : > { %v3552_v60 = vpack.c.bf16 %v3542_v3, %v3542_v3 }
 0x30c   : > { %v2914_v21 = vpop.f32.mrf.mxu0 }
 0x30d   : > { %v2890_v35 = vpop.f32.mrf.mxu3 }
 0x30e   : > { %v2873_v28 = vpop.f32.mrf.mxu2  ;;  %v2891_v48 = vadd.f32 %v2890_v35, %v2872_v6  ;;  %v3521_v6 = vunpack.c.l.bf16 %v3499_v25 }
 0x30f   : > { %v2874_v56 = vadd.f32 %v2873_v28, %v2855_v52 }
 0x310   : > { %v6644_v55 = vadd.f32 %v2909_v23, %v2891_v48  ;;  %v3515_v23 = vunpack.c.l.bf16 %v3495_v0  ;;  %v3545_v35 = vmul.f32 %v6666_v50, %v3521_v6  ;;  %v6684_v48 = vpop.permute.xlu0 %5270 }
 0x312   : > { %v2919_v4 = vadd.f32 %v6644_v55, %v6642_v63  ;;  %v3539_v31 = vmul.f32 %v6666_v50, %v3515_v23  ;;  %v3554_v28 = vpack.c.bf16 %v3545_v35, %v3545_v35 }
 0x314   : > { %2920 = vadd.xlane.f32.xlu1 %v2919_v4  ;;  %v2916_v40 = vpop.f32.mrf.mxu0  ;;  %v3550_v36 = vpack.c.bf16 %v3539_v31, %v3539_v31 }
 0x315   : > { %v2892_v58 = vpop.f32.mrf.mxu3 }
 0x316   : > { %v2893_v39 = vadd.f32 %v2892_v58, %v2874_v56  ;;  %v2876_v15 = vpop.f32.mrf.mxu2 }
 0x317   : > { %v2877_v47 = vadd.f32 %v2876_v15, %v2858_v18 }
 0x318   : > { %v6653_v49 = vadd.f32 %v2911_v13, %v2893_v39  ;;  %v6688_v4 = vpop.permute.xlu0 %5280  ;;  %v5295_v13 = vpop.eup %5294 }
 0x319   : > { %v2932_v56 = vmul.f32 256.0, %v5295_v13  ;;  %v6696_v15 = vpop.permute.xlu2 %3793  ;;  %vm2936_vm12 = vweird.f32 %v5295_v13 }
 0x31a   : > { %v2922_v59 = vadd.f32 %v6653_v49, %v6651_v14 }
 0x31b   : > { %v2933_v54 = vsub.f32 1.0, %v2932_v56 }
 0x31c   : > { %2923 = vadd.xlane.f32.xlu2 %v2922_v59 }
 0x31d   : > { %v2895_v22 = vpop.f32.mrf.mxu3  ;;  %v2934_v39 = vmul.f32 %v5295_v13, %v2933_v54 }
 0x31e   : > { %v2896_v5 = vadd.f32 %v2895_v22, %v2877_v47  ;;  %v2878_v20 = vpop.f32.mrf.mxu2 }
 0x31f   : > { %v2879_v11 = vadd.f32 %v2878_v20, %v2860_v16  ;;  %v2935_v18 = vadd.f32 %v5295_v13, %v2934_v39 }
 0x320   : > { %v6663_v37 = vadd.f32 %v2914_v21, %v2896_v5 }
 0x321   : > { %v6702_v21 = vsel %vm2936_vm12, %v5295_v13, %v2935_v18  ;;  %v6704_v19 = vpop.permute.xlu2 %3686 }
 0x322   : > { %v2925_v42 = vadd.f32 %v6663_v37, %v6661_v24  ;;  %7360 = vst [vmem:[#allocation10_spill] sm:$0xff] %v6702_v21 }
 0x324   : > { %2926 = vadd.xlane.f32.xlu2 %v2925_v42 }
 0x325   : > { %v2897_v41 = vpop.f32.mrf.mxu3 }
 0x326   : > { %v2898_v46 = vadd.f32 %v2897_v41, %v2879_v11 }
 0x328   : > { %v6673_v7 = vadd.f32 %v2916_v40, %v2898_v46 }
 0x32a   : > { %v2928_v34 = vadd.f32 %v6673_v7, %v6671_v10 }
 0x32c   : > { %2929 = vadd.xlane.f32.xlu0 %v2928_v34 }
 0x32d   : > { %3579 = vrot.lane.b32.xlu1 %v3556_v43, %s5324_s25 }
 0x330   : > { %v6686_v52 = vpop.permute.xlu1 %3801  ;;  %v6694_v58 = vpop.permute.xlu0 %3797 }
 0x335   : > { %3567 = vrot.lane.b32.xlu1 %v3550_v36, %s5324_s25 }
 0x338   : > { %v6692_v57 = vpop.permute.xlu1 %3789  ;;  %v6700_v59 = vpop.permute.xlu0 %3690 }
 0x33c   : > { %3571 = vrot.lane.b32.xlu2 %v3552_v60, %s5324_s25 }
 0x340   : > { %3575 = vrot.lane.b32.xlu0 %v3554_v28, %s5324_s25  ;;  %v6698_v44 = vpop.permute.xlu1 %3682  ;;  %v6709_v1 = vpop.permute.xlu0 %3678 }
 0x348   : > { %v6722_v11 = vpop.permute.xlu0 %5290 }
 0x387   : > { %v2921_v47 = vpop.xlane.xlu1 %2920 }
 0x388   : > { %v2938_v22 = vmul.f32 %v6702_v21, %v2921_v47 }
 0x38a   : > { %v2942_v62 = vsub.f32 %v6642_v63, %v2938_v22  ;;  %v2943_v5 = vsub.f32 %v6644_v55, %v2938_v22 }
 0x38c   : > { %v2950_v61 = vmul.f32 %v2942_v62, %v2942_v62  ;;  %v2951_v33 = vmul.f32 %v2943_v5, %v2943_v5 }
 0x38e   : > { %v2958_v20 = vadd.f32 %v2951_v33, %v2950_v61 }
 0x38f   : > { %v2924_v17 = vpop.xlane.xlu2 %2923 }
 0x390   : > { %v2939_v16 = vmul.f32 %v6702_v21, %v2924_v17  ;;  %2959 = vadd.xlane.f32.xlu1 %v2958_v20 }
 0x392   : > { %v6713_v42 = vsub.f32 %v6651_v14, %v2939_v16  ;;  %v6716_v30 = vsub.f32 %v6653_v49, %v2939_v16 }
 0x394   : > { %v2952_v63 = vmul.f32 %v6713_v42, %v6713_v42  ;;  %v2953_v55 = vmul.f32 %v6716_v30, %v6716_v30 }
 0x396   : > { %v2961_v41 = vadd.f32 %v2953_v55, %v2952_v63 }
 0x397   : > { %v2927_v40 = vpop.xlane.xlu2 %2926 }
 0x398   : > { %v2940_v51 = vmul.f32 %v6702_v21, %v2927_v40  ;;  %2962 = vadd.xlane.f32.xlu2 %v2961_v41 }
 0x39a   : > { %v6726_v26 = vsub.f32 %v6661_v24, %v2940_v51  ;;  %v6729_v14 = vsub.f32 %v6663_v37, %v2940_v51 }
 0x39c   : > { %v2954_v49 = vmul.f32 %v6726_v26, %v6726_v26  ;;  %v2955_v46 = vmul.f32 %v6729_v14, %v6729_v14 }
 0x39e   : > { %v2964_v0 = vadd.f32 %v2955_v46, %v2954_v49 }
 0x39f   : > { %v2930_v43 = vpop.xlane.xlu0 %2929  ;;  %v6746_v27 = vpop.permute.xlu1 %3579 }
 0x3a0   : > { %v2941_v23 = vmul.f32 %v6702_v21, %v2930_v43  ;;  %2965 = vadd.xlane.f32.xlu2 %v2964_v0  ;;  %v6750_v36 = vpop.permute.xlu2 %3571  ;;  %v6759_v0 = vunpack.i.l.bf16 %v6602_v45 }
 0x3a2   : > { %v6737_v34 = vsub.f32 %v6671_v10, %v2941_v23  ;;  %v6740_v24 = vsub.f32 %v6673_v7, %v2941_v23 }
 0x3a4   : > { %v2956_v37 = vmul.f32 %v6737_v34, %v6737_v34  ;;  %v2957_v38 = vmul.f32 %v6740_v24, %v6740_v24 }
 0x3a6   : > { %v2967_v31 = vadd.f32 %v2957_v38, %v2956_v37 }
 0x3a7   : > { %v6748_v25 = vpop.permute.xlu1 %3567 }
 0x3a8   : > { %2968 = vadd.xlane.f32.xlu0 %v2967_v31 }
 0x3b2   : > { %v6754_v56 = vpop.permute.xlu0 %3575 }
 0x403   : > { %v2960_v6 = vpop.xlane.xlu1 %2959 }
 0x404   : > { %v2970_v10 = vmul.f32 %v2960_v6, %v6702_v21 }
 0x406   : > { %v2974_v3 = vadd.f32 1e-05, %v2970_v10 }
 0x408   : > { %5296 = vrsqrt.f32 %v2974_v3  ;;  %vm2984_vm14 = vweird.f32 %v2974_v3 }
 0x40b   : > { %v2963_v7 = vpop.xlane.xlu2 %2962 }
 0x40c   : > { %v2971_v35 = vmul.f32 %v2963_v7, %v6702_v21 }
 0x40e   : > { %v5297_v60 = vpop.eup %5296  ;;  %v2975_v28 = vadd.f32 1e-05, %v2971_v35 }
 0x40f   : > { %v2979_v32 = vmul.f32 %v5297_v60, %v2974_v3  ;;  %vm2985_vm13 = vweird.f32 %v5297_v60  ;;  %v6771_v3 = vsel %vm969_vm11, %v6759_v0, %v6605_v2 }
 0x410   : > { %5298 = vrsqrt.f32 %v2975_v28  ;;  %vm2986_vm15 = vmor %vm2984_vm14, %vm2985_vm13  ;;  %vm2994_vm1 = vweird.f32 %v2975_v28 }
 0x411   : > { %v2980_v13 = vmul.f32 %v5297_v60, %v2979_v32  ;;  %v6780_v32 = vunpack.i.h.bf16 %v6648_v29 }
 0x413   : > { %v2981_v54 = vmul.f32 0.5, %v2980_v13  ;;  %v2966_v39 = vpop.xlane.xlu2 %2965 }
 0x414   : > { %v2972_v18 = vmul.f32 %v2966_v39, %v6702_v21 }
 0x415   : > { %v2982_v47 = vsub.f32 1.5, %v2981_v54  ;;  %v6783_v54 = vunpack.i.l.bf16 %v6648_v29 }
 0x416   : > { %v5299_v22 = vpop.eup %5298  ;;  %v2976_v61 = vadd.f32 1e-05, %v2972_v18 }
 0x417   : > { %v2983_v33 = vmul.f32 %v5297_v60, %v2982_v47  ;;  %v2989_v20 = vmul.f32 %v5299_v22, %v2975_v28  ;;  %vm2995_vm0 = vweird.f32 %v5299_v22 }
 0x418   : > { %5300 = vrsqrt.f32 %v2976_v61  ;;  %vm2996_vm6 = vmor %vm2994_vm1, %vm2995_vm0  ;;  %vm3004_vm13 = vweird.f32 %v2976_v61 }
 0x419   : > { %v2987_v17 = vsel %vm2986_vm15, %v5297_v60, %v2983_v33  ;;  %v2990_v16 = vmul.f32 %v5299_v22, %v2989_v20 }
 0x41a   : > { %v3018_v63 = vmul.f32 %v2987_v17, %v2942_v62  ;;  %v3019_v55 = vmul.f32 %v2987_v17, %v2943_v5 }
 0x41b   : > { %v2991_v41 = vmul.f32 0.5, %v2990_v16  ;;  %v2969_v40 = vpop.xlane.xlu0 %2968 }
 0x41c   : > { %v3026_v51 = vmax.f32 %v3018_v63, 0.0  ;;  %v3027_v49 = vmax.f32 %v3019_v55, 0.0  ;;  %v2973_v46 = vmul.f32 %v2969_v40, %v6702_v21  ;;  %v6794_v63 = vunpack.i.l.bf16 %v6610_v9 }
 0x41d   : > { %v2992_v43 = vsub.f32 1.5, %v2991_v41 }
 0x41e   : > { %v5301_v23 = vpop.eup %5300  ;;  %v3034_v37 = vpack.c.bf16 %v3027_v49, %v3026_v51  ;;  %v6761_v38 = vadd.f32 1e-05, %v2973_v46 }
 0x41f   : > { %v2993_v31 = vmul.f32 %v5299_v22, %v2992_v43  ;;  %v2999_v6 = vmul.f32 %v5301_v23, %v2976_v61  ;;  %vm3005_vm12 = vweird.f32 %v5301_v23  ;;  %v6803_v61 = vsel %vm1263_vm4, %v6783_v54, %v6780_v32 }
 0x420   : > { %3038 = vst [vmem:[#allocation2 + $0x4] sm:$0xff] %v3034_v37  ;;  %5302 = vrsqrt.f32 %v6761_v38  ;;  %v6764_v62 = vunpack.c.l.bf16 %v3034_v37  ;;  %v6766_v5 = vunpack.c.h.bf16 %v3034_v37  ;;  %vm3006_vm14 = vmor %vm3004_vm13, %vm3005_vm12  ;;  %vm3014_vm0 = vweird.f32 %v6761_v38 }
 0x421   : > { %v2997_v10 = vsel %vm2996_vm6, %v5299_v22, %v2993_v31  ;;  %v3000_v45 = vmul.f32 %v5301_v23, %v2999_v6 }
 0x422   : > { %v3020_v7 = vmul.f32 %v2997_v10, %v6713_v42  ;;  %v3021_v35 = vmul.f32 %v2997_v10, %v6716_v30  ;;  %v3759_v60 = vmul.f32 %v6759_v0, %v6764_v62  ;;  %v3760_v28 = vmul.f32 %v6771_v3, %v6766_v5 }
 0x423   : > { %v3001_v13 = vmul.f32 0.5, %v3000_v45  ;;  %v6786_v42 = vunpack.i.h.bf16 %v6684_v48  ;;  %v6789_v30 = vunpack.i.l.bf16 %v6684_v48 }
 0x424   : > { %v3028_v39 = vmax.f32 %v3020_v7, 0.0  ;;  %v3029_v2 = vmax.f32 %v3021_v35, 0.0  ;;  %v3771_v18 = vpack.c.bf16 %v3760_v28, %v3759_v60 }
 0x425   : > { %v3002_v47 = vsub.f32 1.5, %v3001_v13  ;;  %v6808_v9 = vsel %vm1061_vm5, %v6789_v30, %v6786_v42 }
 0x426   : > { %v5303_v22 = vpop.eup %5302  ;;  %v3035_v33 = vpack.c.bf16 %v3029_v2, %v3028_v39  ;;  %3787 = vrot.lane.b32.xlu2 %v3771_v18, %s5322_s18  ;;  %v6825_v39 = vunpack.i.h.bf16 %v6688_v4 }
 0x427   : > { %v3003_v20 = vmul.f32 %v5301_v23, %v3002_v47  ;;  %v3009_v29 = vmul.f32 %v5303_v22, %v6761_v38  ;;  %v3376_v17 = vld [vmem:[#allocation2 + $0x8] sm:$0xf]  ;;  %v3375_v16 = vld [vmem:[#allocation2] sm:$0xff]  ;;  %vm3015_vm15 = vweird.f32 %v5303_v22 }
 0x428   : > { %3039 = vst [vmem:[#allocation2 + $0x14] sm:$0xff] %v3035_v33  ;;  %v3396_v55 = vunpack.c.l.bf16 %v3376_v17  ;;  %v6796_v48 = vunpack.c.l.bf16 %v3375_v16  ;;  %v6798_v41 = vunpack.c.h.bf16 %v3375_v16  ;;  %v3154_v40 = vld [vmem:[#allocation2 + $0x8] sm:$0xf]  ;;  %vm3016_vm1 = vmor %vm3014_vm0, %vm3015_vm15  ;;  %v3648_v17 = vmul.f32 %v6794_v63, %v6764_v62 }
 0x429   : > { %v3007_v51 = vsel %vm3006_vm14, %v5301_v23, %v3003_v20  ;;  %v3010_v49 = vmul.f32 %v5303_v22, %v3009_v29  ;;  %v3174_v10 = vunpack.c.l.bf16 %v3154_v40  ;;  %v3265_v40 = vld [vmem:[#allocation2 + $0x8] sm:$0xf] }
 0x42a   : > { %v3022_v46 = vmul.f32 %v3007_v51, %v6726_v26  ;;  %v3023_v43 = vmul.f32 %v3007_v51, %v6729_v14  ;;  %v3420_v37 = vmul.f32 %v6780_v32, %v3396_v55  ;;  %v3418_v23 = vmul.f32 %v6783_v54, %v6796_v48 }
 0x42b   : > { %v3011_v31 = vmul.f32 0.5, %v3010_v49  ;;  %v3419_v6 = vmul.f32 %v6803_v61, %v6798_v41  ;;  %v3307_v45 = vmul.f32 %v6789_v30, %v6796_v48  ;;  %v3308_v26 = vmul.f32 %v6798_v41, %v6808_v9 }
 0x42c   : > { %v3030_v7 = vmax.f32 %v3022_v46, 0.0  ;;  %v3031_v35 = vmax.f32 %v3023_v43, 0.0  ;;  %v3431_v60 = vpack.c.bf16 %v3420_v37, %v3420_v37  ;;  %v6822_v14 = vunpack.i.l.bf16 %v6657_v8 }
 0x42d   : > { %v3012_v28 = vsub.f32 1.5, %v3011_v31  ;;  %v3430_v13 = vpack.c.bf16 %v3419_v6, %v3418_v23  ;;  %v3319_v18 = vpack.c.bf16 %v3308_v26, %v3307_v45  ;;  %v6836_v8 = vsel %vm1171_vm9, %v6794_v63, %v6613_v12 }
 0x42e   : > { %v6827_v2 = vpack.c.bf16 %v3031_v35, %v3030_v7  ;;  %3448 = vrot.lane.b32.xlu0 %v3431_v60, %s5325_s26  ;;  %v3198_v20 = vmul.f32 %v6825_v39, %v3174_v10  ;;  %v3649_v38 = vmul.f32 %v6766_v5, %v6836_v8  ;;  %v6847_v16 = vsel %vm1373_vm7, %v6822_v14, %v6666_v50 }
 0x42f   : > { %v3013_v47 = vmul.f32 %v5303_v22, %v3012_v28  ;;  %3446 = vrot.lane.b32.xlu1 %v3430_v13, %s5325_s26  ;;  %3335 = vrot.lane.b32.xlu2 %v3319_v18, %s5326_s6  ;;  %v3537_v51 = vmul.f32 %v6822_v14, %v6764_v62  ;;  %v6855_v49 = vunpack.c.l.bf16 %v3035_v33  ;;  %v3266_v46 = vld [vmem:[#allocation2 + $0x10] sm:$0xff]  ;;  %v6857_v31 = vunpack.c.h.bf16 %v3035_v33 }
 0x430   : > { %3040 = vst [vmem:[#allocation2 + $0x24] sm:$0xff] %v6827_v2  ;;  %v3209_v23 = vpack.c.bf16 %v3198_v20, %v3198_v20  ;;  %v3660_v50 = vpack.c.bf16 %v3649_v38, %v3648_v17  ;;  %v3285_v6 = vunpack.c.l.bf16 %v3265_v40  ;;  %v6862_v10 = vunpack.c.l.bf16 %v3266_v46 }
 0x431   : > { %v3017_v29 = vsel %vm3016_vm1, %v5303_v22, %v3013_v47  ;;  %v3538_v22 = vmul.f32 %v6766_v5, %v6847_v16  ;;  %v6864_v45 = vunpack.c.h.bf16 %v3266_v46  ;;  %v3762_v7 = vmul.f32 %v6759_v0, %v6855_v49 }
 0x432   : > { %v3024_v55 = vmul.f32 %v3017_v29, %v6737_v34  ;;  %v3025_v12 = vmul.f32 %v3017_v29, %v6740_v24  ;;  %v3763_v33 = vmul.f32 %v6771_v3, %v6857_v31  ;;  %v3309_v35 = vmul.f32 %v6786_v42, %v3285_v6 }
 0x433   : > { %v3549_v24 = vpack.c.bf16 %v3538_v22, %v3537_v51  ;;  %v3421_v60 = vmul.f32 %v6783_v54, %v6862_v10  ;;  %v3422_v26 = vmul.f32 %v6803_v61, %v6864_v45  ;;  %v6879_v28 = vunpack.i.l.bf16 %v6688_v4  ;;  %v3267_v51 = vld [vmem:[#allocation2 + $0x18] sm:$0xf] }
 0x434   : > { %v3032_v43 = vmax.f32 %v3024_v55, 0.0  ;;  %v3033_v37 = vmax.f32 %v3025_v12, 0.0  ;;  %v3773_v13 = vpack.c.bf16 %v3763_v33, %v3762_v7  ;;  %v3320_v18 = vpack.c.bf16 %v3309_v35, %v3309_v35  ;;  %v3378_v55 = vld [vmem:[#allocation2 + $0x18] sm:$0xf] }
 0x435   : > { %v3432_v47 = vpack.c.bf16 %v3422_v26, %v3421_v60  ;;  %v6886_v20 = vsel %vm859_vm3, %v6879_v28, %v6825_v39  ;;  %v3310_v29 = vmul.f32 %v6789_v30, %v6862_v10  ;;  %v3311_v17 = vmul.f32 %v6808_v9, %v6864_v45  ;;  %v3156_v60 = vld [vmem:[#allocation2 + $0x18] sm:$0xf] }
 0x436   : > { %v6859_v34 = vpack.c.bf16 %v3033_v37, %v3032_v43  ;;  %3226 = vrot.lane.b32.xlu0 %v3209_v23, %s5328_s21  ;;  %v3196_v4 = vmul.f32 %v6879_v28, %v6796_v48  ;;  %v3197_v38 = vmul.f32 %v6798_v41, %v6886_v20  ;;  %v3651_v12 = vmul.f32 %v6794_v63, %v6855_v49 }
 0x437   : > { %3676 = vrot.lane.b32.xlu1 %v3660_v50, %s5323_s24  ;;  %3565 = vrot.lane.b32.xlu2 %v3549_v24, %s5324_s25  ;;  %v3652_v40 = vmul.f32 %v6857_v31, %v6836_v8  ;;  %v3321_v22 = vpack.c.bf16 %v3311_v17, %v3310_v29  ;;  %v3399_v43 = vunpack.c.l.bf16 %v3378_v55  ;;  %v3288_v23 = vunpack.c.l.bf16 %v3267_v51  ;;  %v3379_v35 = vld [vmem:[#allocation2 + $0x20] sm:$0xff] }
 0x438   : > { %3041 = vst [vmem:[#allocation2 + $0x34] sm:$0xff] %v6859_v34  ;;  %v3208_v46 = vpack.c.bf16 %v3197_v38, %v3196_v4  ;;  %v6904_v50 = vunpack.i.h.bf16 %v6722_v11  ;;  %v6907_v6 = vunpack.i.l.bf16 %v6722_v11  ;;  %v3540_v24 = vmul.f32 %v6822_v14, %v6855_v49 }
 0x439   : > { %v3662_v37 = vpack.c.bf16 %v3652_v40, %v3651_v12  ;;  %v3541_v7 = vmul.f32 %v6857_v31, %v6847_v16  ;;  %v3423_v33 = vmul.f32 %v6780_v32, %v3399_v43  ;;  %v3312_v26 = vmul.f32 %v6786_v42, %v3288_v23  ;;  %v3486_v43 = vld [vmem:[#allocation2 + $0x4] sm:$0xff] }
 0x43a   : > { %v6923_v11 = vsel %vm767_vm8, %v6907_v6, %v6904_v50  ;;  %v3177_v17 = vunpack.c.l.bf16 %v3156_v60  ;;  %v6927_v4 = vmul.f32 %v6907_v6, %v6764_v62  ;;  %v6935_v12 = vunpack.i.h.bf16 %v6690_v53  ;;  %v3380_v23 = vld [vmem:[#allocation2 + $0x28] sm:$0xf]  ;;  %3490 = vst [vmem:[#allocation3 + $0x80] sm:$0xff] %v3486_v43 }
 0x43b   : > { %v3433_v29 = vpack.c.bf16 %v3423_v33, %v3423_v33  ;;  %v6931_v38 = vmul.f32 %v6923_v11, %v6766_v5  ;;  %v3322_v55 = vpack.c.bf16 %v3312_v26, %v3312_v26  ;;  %v6939_v40 = vunpack.i.l.bf16 %v6690_v53 }
 0x43c   : > { %v3200_v53 = vmul.f32 %v6864_v45, %v6886_v20 }
 0x43d   : > { %v6960_v33 = vsel %vm656_vm2, %v6939_v40, %v6935_v12  ;;  %v6964_v60 = vmul.f32 %v6939_v40, %v6796_v48  ;;  %v7013_v5 = vmul.f32 %v6939_v40, %v6862_v10 }
 0x43e   : > { %3791 = vrot.lane.b32.xlu0 %v3773_v13, %s5322_s18  ;;  %v3551_v13 = vpack.c.bf16 %v3541_v7, %v3540_v24  ;;  %v3742_v7 = vunpack.c.h.bf16 %v6827_v2  ;;  %v6968_v26 = vmul.f32 %v6798_v41, %v6960_v33  ;;  %v6983_v41 = vunpack.c.l.bf16 %v6859_v34 }
 0x43f   : > { %3337 = vrot.lane.b32.xlu1 %v3320_v18, %s5326_s6  ;;  %3450 = vrot.lane.b32.xlu2 %v3432_v47, %s5325_s26  ;;  %v6916_v18 = vunpack.c.l.bf16 %v3379_v35  ;;  %v6918_v47 = vunpack.c.h.bf16 %v3379_v35 }
 0x441   : > { %v3424_v51 = vmul.f32 %v6783_v54, %v6916_v18  ;;  %v3425_v62 = vmul.f32 %v6803_v61, %v6918_v47  ;;  %v3091_v21 = vmul.f32 %v6939_v40, %v6916_v18 }
 0x443   : > { %v3434_v24 = vpack.c.bf16 %v3425_v62, %v3424_v51  ;;  %v3766_v51 = vmul.f32 %v6771_v3, %v3742_v7  ;;  %v3655_v62 = vmul.f32 %v3742_v7, %v6836_v8 }
 0x446   : > { %3339 = vrot.lane.b32.xlu0 %v3321_v22, %s5326_s6  ;;  %v3201_v22 = vmul.f32 %v6825_v39, %v3177_v17  ;;  %v6977_v17 = vmul.f32 %v6923_v11, %v6857_v31 }
 0x447   : > { %3224 = vrot.lane.b32.xlu1 %v3208_v46, %s5328_s21  ;;  %3680 = vrot.lane.b32.xlu2 %v3662_v37, %s5323_s24  ;;  %v3199_v46 = vmul.f32 %v6879_v28, %v6862_v10  ;;  %v6954_v37 = vunpack.c.l.bf16 %v6827_v2  ;;  %v3202_v10 = vmul.f32 %v6879_v28, %v6916_v18 }
 0x448   : > { %v3211_v35 = vpack.c.bf16 %v3201_v22, %v3201_v22 }
 0x449   : > { %v3210_v2 = vpack.c.bf16 %v3200_v53, %v3199_v46  ;;  %v3765_v48 = vmul.f32 %v6759_v0, %v6954_v37  ;;  %v3654_v31 = vmul.f32 %v6794_v63, %v6954_v37  ;;  %v6997_v46 = vld [vmem:[#allocation2 + $0x28] sm:$0xff]  }
 0x44a   : > { %v3291_v22 = vunpack.c.l.bf16 %v6997_v46 }
 0x44e   : > { %3569 = vrot.lane.b32.xlu0 %v3551_v13, %s5324_s25  ;;  %v6972_v13 = vmul.f32 %v6907_v6, %v6855_v49 }
 0x44f   : > { %3452 = vrot.lane.b32.xlu1 %v3433_v29, %s5325_s26  ;;  %3341 = vrot.lane.b32.xlu2 %v3322_v55, %s5326_s6  ;;  %v3402_v29 = vunpack.c.l.bf16 %v3380_v23  ;;  %v6986_v55 = vunpack.c.h.bf16 %v6859_v34  ;;  %v7001_v34 = vmul.f32 %v6794_v63, %v6983_v41  ;;  %v3487_v23 = vld [vmem:[#allocation2 + $0x14] sm:$0xff]  ;;  %v7017_v63 = vmul.f32 %v6864_v45, %v6960_v33 }
 0x450   : > { %3491 = vst [vmem:[#allocation3 + $0x88] sm:$0xff] %v3487_v23  ;;  %v3314_v23 = vmul.f32 %v6918_v47, %v6808_v9 }
 0x451   : > { %v7005_v53 = vmul.f32 %v6836_v8, %v6986_v55  ;;  %v3426_v43 = vmul.f32 %v6780_v32, %v3402_v29  ;;  %v7021_v8 = vmul.f32 %v6907_v6, %v6954_v37  ;;  %v7024_v29 = vmul.f32 %v6923_v11, %v3742_v7 }
 0x456   : > { %3454 = vrot.lane.b32.xlu0 %v3434_v24, %s5325_s26 }
 0x457   : > { %3230 = vrot.lane.b32.xlu1 %v3211_v35, %s5328_s21  ;;  %3228 = vrot.lane.b32.xlu2 %v3210_v2, %s5328_s21  ;;  %v3775_v35 = vpack.c.bf16 %v3766_v51, %v3765_v48  ;;  %v3664_v2 = vpack.c.bf16 %v3655_v62, %v3654_v31  ;;  %v3435_v48 = vpack.c.bf16 %v3426_v43, %v3426_v43 }
 0x458   : > { %v3203_v51 = vmul.f32 %v6918_v47, %v6886_v20  ;;  %v3315_v62 = vmul.f32 %v6786_v42, %v3291_v22  ;;  %v3313_v43 = vmul.f32 %v6789_v30, %v6916_v18  ;;  %v7045_v31 = vmul.f32 %v6907_v6, %v6983_v41  ;;  %v3047_v18 = vld [vmem:[#allocation2 + $0x28] sm:$0xf] }
 0x459   : > { %v7049_v22 = vmul.f32 %v6923_v11, %v6986_v55  ;;  %v3543_v6 = vmul.f32 %v6822_v14, %v6954_v37  ;;  %v7062_v11 = vld [vmem:[#allocation2 + $0x38] sm:$0xff]   ;;  %v3069_v37 = vunpack.c.l.bf16 %v3047_v18 }
 0x45a   : > { %v3212_v49 = vpack.c.bf16 %v3203_v51, %v3202_v10  ;;  %v3324_v24 = vpack.c.bf16 %v3315_v62, %v3315_v62  ;;  %v3092_v10 = vmul.f32 %v6918_v47, %v6960_v33  ;;  %v3544_v51 = vmul.f32 %v3742_v7, %v6847_v16  ;;  %v3381_v62 = vld [vmem:[#allocation2 + $0x30] sm:$0xff] }
 0x45b   : > { %v3405_v47 = vunpack.c.l.bf16 %v7062_v11 }
 0x45d   : > { %v3429_v7 = vmul.f32 %v6780_v32, %v3405_v47  ;;  %v3160_v32 = vld [vmem:[#allocation2 + $0x38] sm:$0xf] }
 0x45e   : > { %3684 = vrot.lane.b32.xlu0 %v3664_v2, %s5323_s24  ;;  %v3158_v2 = vld [vmem:[#allocation2 + $0x28] sm:$0xf] }
 0x45f   : > { %3795 = vrot.lane.b32.xlu1 %v3775_v35, %s5322_s18  ;;  %3456 = vrot.lane.b32.xlu2 %v3435_v48, %s5325_s26  ;;  %v3488_v35 = vld [vmem:[#allocation2 + $0x24] sm:$0xff]  ;;  %v3323_v48 = vpack.c.bf16 %v3314_v23, %v3313_v43  ;;  %v3180_v45 = vunpack.c.l.bf16 %v3158_v2  ;;  %v3489_v43 = vld [vmem:[#allocation2 + $0x34] sm:$0xff]  ;;  %v3101_v23 = vpack.c.bf16 %v3092_v10, %v3091_v21  ;;  %v3403_v2 = vunpack.c.l.bf16 %v3381_v62 }
 0x460   : > { %3492 = vst [vmem:[#allocation3 + $0x90] sm:$0xff] %v3488_v35  ;;  %v3553_v35 = vpack.c.bf16 %v3544_v51, %v3543_v6  ;;  %v3093_v21 = vmul.f32 %v6935_v12, %v3069_v37  ;;  %v3437_v10 = vpack.c.bf16 %v3429_v7, %v3429_v7  ;;  %v3804_v37 = vrot.slane %v6692_v57, 4 }
 0x461   : > { %3493 = vst [vmem:[#allocation3 + $0x98] sm:$0xff] %v3489_v43 }
 0x462   : > { %v3102_v51 = vpack.c.bf16 %v3093_v21, %v3093_v21 }
 0x466   : > { %3232 = vrot.lane.b32.xlu0 %v3212_v49, %s5328_s21 }
 0x467   : > { %3345 = vrot.lane.b32.xlu1 %v3324_v24, %s5326_s6  ;;  %3343 = vrot.lane.b32.xlu2 %v3323_v48, %s5326_s6  ;;  %v3204_v24 = vmul.f32 %v6825_v39, %v3180_v45  ;;  %v3404_v48 = vunpack.c.h.bf16 %v3381_v62  ;;  %v3427_v45 = vmul.f32 %v6783_v54, %v3403_v2  ;;  %v3316_v62 = vmul.f32 %v6789_v30, %v3403_v2 }
 0x468   : > { %v3768_v54 = vmul.f32 %v6759_v0, %v6983_v41  ;;  %v7361_v30 = vpack.c.bf16 %v7005_v53, %v7001_v34 }
 0x469   : > { %v3213_v49 = vpack.c.bf16 %v3204_v24, %v3204_v24  ;;  %v3428_v43 = vmul.f32 %v6803_v61, %v3404_v48  ;;  %v3317_v24 = vmul.f32 %v3404_v48, %v6808_v9  ;;  %v3769_v61 = vmul.f32 %v6771_v3, %v6986_v55 }
 0x46a   : > { %v3205_v3 = vmul.f32 %v6879_v28, %v3403_v2  ;;  %v3206_v7 = vmul.f32 %v3404_v48, %v6886_v20  ;;  %v3094_v28 = vmul.f32 %v6939_v40, %v3403_v2  ;;  %v3582_v2 = vrot.slane %v6748_v25, 4 }
 0x46b   : > { %v3436_v6 = vpack.c.bf16 %v3428_v43, %v3427_v45  ;;  %v3325_v18 = vpack.c.bf16 %v3317_v24, %v3316_v62  ;;  %v3777_v47 = vpack.c.bf16 %v3769_v61, %v3768_v54  ;;  %v3049_v43 = vld [vmem:[#allocation2 + $0x38] sm:$0xf]  ;;  %v3043_v62 = vld [vmem:[#allocation2 + $0x8] sm:$0xff]   ;;  %v3546_v24 = vmul.f32 %v6822_v14, %v6983_v41 }
 0x46c   : > { %v3072_v53 = vunpack.c.l.bf16 %v3049_v43  ;;  %v3045_v14 = vld [vmem:[#allocation2 + $0x18] sm:$0xff]   ;;  %v3854_v41 = vunpack.c.h.bf16 %v6997_v46  ;;  %v7363_v46 = vpack.c.bf16 %v6968_v26, %v6964_v60  ;;  %v3695_v43 = vrot.slane %v6698_v44, 4 }
 0x46e   : > { %3121 = vrot.lane.b32.xlu0 %v3101_v23, %s5327_s20  ;;  %v3183_v23 = vunpack.c.l.bf16 %v3160_v32  ;;  %v3096_v57 = vmul.f32 %v6935_v12, %v3072_v53  ;;  %v3547_v32 = vmul.f32 %v6986_v55, %v6847_v16  ;;  %v3878_v25 = vmul.f32 %v6904_v50, %v3854_v41 }
 0x46f   : > { %3573 = vrot.lane.b32.xlu1 %v3553_v35, %s5324_s25  ;;  %3234 = vrot.lane.b32.xlu2 %v3213_v49, %s5328_s21  ;;  %v3271_v49 = vld [vmem:[#allocation2 + $0x38] sm:$0xf] }
 0x470   : > { %v3294_v35 = vunpack.c.l.bf16 %v3271_v49  ;;  %v3207_v9 = vmul.f32 %v6825_v39, %v3183_v23  ;;  %v3214_v39 = vpack.c.bf16 %v3206_v7, %v3205_v3  ;;  %v3104_v54 = vpack.c.bf16 %v3096_v57, %v3096_v57 }
 0x471   : > { %v3063_v49 = vunpack.c.l.bf16 %v3043_v62  ;;  %v7362_v23 = vpack.c.bf16 %v7017_v63, %v7013_v5  ;;  %v3857_v5 = vunpack.c.h.bf16 %v7062_v11  ;;  %v7366_v57 = vpack.c.bf16 %v7049_v22, %v7045_v31 }
 0x472   : > { %v3318_v21 = vmul.f32 %v6786_v42, %v3294_v35  ;;  %v3095_v42 = vmul.f32 %v3404_v48, %v6960_v33  ;;  %v3066_v35 = vunpack.c.l.bf16 %v3045_v14  ;;  %v7367_v31 = vpack.c.bf16 %v6977_v17, %v6972_v13 }
 0x473   : > { %v3087_v40 = vmul.f32 %v6935_v12, %v3063_v49  ;;  %v3881_v7 = vmul.f32 %v6904_v50, %v3857_v5 }
 0x474   : > { %v3103_v61 = vpack.c.bf16 %v3095_v42, %v3094_v28  ;;  %v3693_v42 = vrot.slane %v6709_v1, 4  ;;  %v3806_v1 = vrot.slane %v6696_v15, 4 }
 0x475   : > { %v3098_v16 = vpack.c.bf16 %v3087_v40, %v3087_v40 }
 0x476   : > { %3460 = vrot.lane.b32.xlu0 %v3437_v10, %s5325_s26 }
 0x477   : > { %3458 = vrot.lane.b32.xlu1 %v3436_v6, %s5325_s26  ;;  %3123 = vrot.lane.b32.xlu2 %v3102_v51, %s5327_s20  ;;  %v3215_v6 = vpack.c.bf16 %v3207_v9, %v3207_v9  ;;  %v3326_v51 = vpack.c.bf16 %v3318_v21, %v3318_v21  ;;  %v3090_v9 = vmul.f32 %v6935_v12, %v3066_v35 }
 0x479   : > { %v3100_v63 = vpack.c.bf16 %v3090_v9, %v3090_v9 }
 0x47e   : > { %3347 = vrot.lane.b32.xlu0 %v3325_v18, %s5326_s6  ;;  %v3555_v18 = vpack.c.bf16 %v3547_v32, %v3546_v24 }
 0x47f   : > { %3688 = vrot.lane.b32.xlu1 %v7361_v30, %s5323_s24  ;;  %3799 = vrot.lane.b32.xlu2 %v3777_v47, %s5322_s18 }
 0x480   : > { %v3788_v0 = vpop.permute.xlu2 %3787 }
 0x481   : > { %v3803_v45 = vrot.slane %v3788_v0, 4 }
 0x483   : > { %v3811_v10 = vsel %vm765_vm10, %v3803_v45, %v3804_v37  ;;  %v7364_v37 = vpack.c.bf16 %v7024_v29, %v7021_v8  ;;  %v7365_v29 = vpack.c.bf16 %v6931_v38, %v6927_v4 }
 0x484   : > { %v3812_v34 = vsel %vm859_vm3, %v3788_v0, %v3811_v10  ;;  %v3887_v0 = vpack.c.bf16 %v3878_v25, %v3878_v25  ;;  %v3851_v10 = vunpack.c.h.bf16 %v3045_v14 }
 0x485   : > { %3823 = vst [vmem:[#allocation3 + $0xe0] sm:$0xff] %v3812_v34  ;;  %v3889_v34 = vpack.c.bf16 %v3881_v7, %v3881_v7 }
 0x486   : > { %3238 = vrot.lane.b32.xlu0 %v3215_v6, %s5328_s21 }
 0x487   : > { %3236 = vrot.lane.b32.xlu1 %v3214_v39, %s5328_s21  ;;  %3349 = vrot.lane.b32.xlu2 %v3326_v51, %s5326_s6  ;;  %v3848_v39 = vunpack.c.h.bf16 %v3043_v62  ;;  %v3875_v51 = vmul.f32 %v6904_v50, %v3851_v10 }
 0x489   : > { %v7101_v20 = vpop.permute.xlu2 %3335  ;;  %v3872_v38 = vmul.f32 %v6904_v50, %v3848_v39  ;;  %v3885_v32 = vpack.c.bf16 %v3875_v51, %v3875_v51 }
 0x48e   : > { %3127 = vrot.lane.b32.xlu0 %v3104_v54, %s5327_s20 }
 0x48f   : > { %3125 = vrot.lane.b32.xlu1 %v3103_v61, %s5327_s20  ;;  %3577 = vrot.lane.b32.xlu2 %v3555_v18, %s5324_s25  ;;  %v3883_v61 = vpack.c.bf16 %v3872_v38, %v3872_v38  ;;  %v3351_v18 = vrot.slane %v7101_v20, 4 }
 0x491   : > { %v3566_v33 = vpop.permute.xlu2 %3565 }
 0x492   : > { %v3581_v48 = vrot.slane %v3566_v33, 4 }
 0x494   : > { %v3589_v55 = vsel %vm765_vm10, %v3581_v48, %v3582_v2 }
 0x495   : > { %v3590_v47 = vsel %vm1263_vm4, %v3566_v33, %v3589_v55 }
 0x496   : > { %3117 = vrot.lane.b32.xlu0 %v7362_v23, %s5327_s20  ;;  %3601 = vst [vmem:[#allocation3 + $0xa0] sm:$0xff] %v3590_v47 }
 0x497   : > { %3115 = vrot.lane.b32.xlu1 %v3098_v16, %s5327_s20  ;;  %3113 = vrot.lane.b32.xlu2 %v7363_v46, %s5327_s20 }
 0x499   : > { %v7125_v30 = vpop.permute.xlu2 %3450 }
 0x49e   : > { %3908 = vrot.lane.b32.xlu0 %v3887_v0, %s5321_s8  ;;  %v3584_v0 = vrot.slane %v6750_v36, 4 }
 0x49f   : > { %3906 = vrot.lane.b32.xlu1 %v7364_v37, %s5321_s8  ;;  %3119 = vrot.lane.b32.xlu2 %v3100_v63, %s5327_s20  ;;  %v3464_v37 = vrot.slane %v7125_v30, 4  ;;  %s7311_s20 = scalar_lea.vmem %s7336_s10, %s5404_s19 }
 0x4a0   : > { %v3449_v3 = vpop.permute.xlu0 %3448 }
 0x4a1   : > { %v3463_v60 = vrot.slane %v3449_v3, 4  ;;  %v3447_v26 = vpop.permute.xlu1 %3446  ;;  %v3681_v12 = vpop.permute.xlu2 %3680 }
 0x4a2   : > { %v3462_v45 = vrot.slane %v3447_v26, 4  ;;  %v3694_v11 = vrot.slane %v3681_v12, 4 }
 0x4a4   : > { %v3470_v21 = vsel %vm765_vm10, %v3462_v45, %v3463_v60  ;;  %v3702_v8 = vsel %vm765_vm10, %v3694_v11, %v3695_v43 }
 0x4a5   : > { %v3471_v6 = vsel %vm1373_vm7, %v3447_v26, %v3470_v21  ;;  %v3703_v53 = vsel %vm1061_vm5, %v3681_v12, %v3702_v8 }
 0x4a6   : > { %3482 = vst [vmem:[#allocation3 + $0x60] sm:$0xff] %v3471_v6  ;;  %3898 = vrot.lane.b32.xlu0 %v7365_v29, %s5321_s8 }
 0x4a7   : > { %3912 = vrot.lane.b32.xlu1 %v3889_v34, %s5321_s8  ;;  %3713 = vst [vmem:[#allocation3 + $0xc8] sm:$0xff] %v3703_v53  ;;  %3910 = vrot.lane.b32.xlu2 %v7366_v57, %s5321_s8 }
 0x4a8   : > { %v3227_v44 = vpop.permute.xlu0 %3226 }
 0x4a9   : > { %v3677_v28 = vpop.permute.xlu1 %3676  ;;  %v3342_v4 = vpop.permute.xlu2 %3341  ;;  %v3241_v55 = vrot.slane %v3227_v44, 4  ;;  %v3697_v44 = vrot.slane %v6704_v19, 4 }
 0x4aa   : > { %v3692_v24 = vrot.slane %v3677_v28, 4  ;;  %v3354_v41 = vrot.slane %v3342_v4, 4 }
 0x4ac   : > { %v3700_v62 = vsel %vm765_vm10, %v3692_v24, %v3693_v42 }
 0x4ad   : > { %v3701_v54 = vsel %vm1061_vm5, %v3677_v28, %v3700_v62  ;;  %v3808_v28 = vrot.slane %v6694_v58, 4  ;;  %v3810_v58 = vrot.slane %v6686_v52, 4 }
 0x4ae   : > { %3712 = vst [vmem:[#allocation3 + $0xc0] sm:$0xff] %v3701_v54  ;;  %3904 = vrot.lane.b32.xlu0 %v3885_v32, %s5321_s8 }
 0x4af   : > { %3902 = vrot.lane.b32.xlu1 %v7367_v31, %s5321_s8  ;;  %3900 = vrot.lane.b32.xlu2 %v3883_v61, %s5321_s8 }
 0x4b0   : > { %v3792_v22 = vpop.permute.xlu0 %3791 }
 0x4b1   : > { %v3338_v50 = vpop.permute.xlu1 %3337  ;;  %v3805_v49 = vrot.slane %v3792_v22, 4  ;;  %v3229_v33 = vpop.permute.xlu2 %3228 }
 0x4b2   : > { %v3352_v40 = vrot.slane %v3338_v50, 4  ;;  %v3242_v10 = vrot.slane %v3229_v33, 4 }
 0x4b3   : > { %v3813_v2 = vsel %vm765_vm10, %v3805_v49, %v3806_v1 }
 0x4b4   : > { %v3359_v48 = vsel %vm765_vm10, %v3351_v18, %v3352_v40  ;;  %v3814_v14 = vsel %vm859_vm3, %v3792_v22, %v3813_v2 }
 0x4b5   : > { %v3360_v13 = vsel %vm1171_vm9, %v7101_v20, %v3359_v48  ;;  %3824 = vst [vmem:[#allocation3 + $0xe8] sm:$0xff] %v3814_v14 }
 0x4b6   : > { %3371 = vst [vmem:[#allocation3 + $0x40] sm:$0xff] %v3360_v13 }
 0x4b8   : > { %v3340_v17 = vpop.permute.xlu0 %3339 }
 0x4b9   : > { %v3225_v15 = vpop.permute.xlu1 %3224  ;;  %v3353_v16 = vrot.slane %v3340_v17, 4  ;;  %v3457_v47 = vpop.permute.xlu2 %3456 }
 0x4ba   : > { %v3240_v23 = vrot.slane %v3225_v15, 4  ;;  %v3467_v11 = vrot.slane %v3457_v47, 4 }
 0x4bb   : > { %v3361_v35 = vsel %vm765_vm10, %v3353_v16, %v3354_v41 }
 0x4bc   : > { %v3248_v25 = vsel %vm765_vm10, %v3240_v23, %v3241_v55  ;;  %v3362_v46 = vsel %vm1171_vm9, %v3340_v17, %v3361_v35 }
 0x4bd   : > { %v3249_v9 = vsel %vm969_vm11, %v3225_v15, %v3248_v25  ;;  %3372 = vst [vmem:[#allocation3 + $0x48] sm:$0xff] %v3362_v46  ;;  %v3586_v15 = vrot.slane %v6754_v56, 4 }
 0x4be   : > { %3260 = vst [vmem:[#allocation3 + $0x20] sm:$0xff] %v3249_v9 }
 0x4c0   : > { %v3570_v20 = vpop.permute.xlu0 %3569 }
 0x4c1   : > { %v3453_v5 = vpop.permute.xlu1 %3452  ;;  %v3583_v63 = vrot.slane %v3570_v20, 4  ;;  %v3344_v60 = vpop.permute.xlu2 %3343 }
 0x4c2   : > { %v3465_v3 = vrot.slane %v3453_v5, 4  ;;  %v3355_v22 = vrot.slane %v3344_v60, 4  ;;  %v5187_v5 = vld [vmem:[#allocation3 + $0xe4] sm:$0xf0] }
 0x4c3   : > { %v3591_v26 = vsel %vm765_vm10, %v3583_v63, %v3584_v0 }
 0x4c4   : > { %v3472_v7 = vsel %vm765_vm10, %v3464_v37, %v3465_v3  ;;  %v3592_v45 = vsel %vm1263_vm4, %v3570_v20, %v3591_v26  ;;  %v3588_v26 = vrot.slane %v6746_v27, 4 }
 0x4c5   : > { %v3473_v12 = vsel %vm1373_vm7, %v7125_v30, %v3472_v7  ;;  %3602 = vst [vmem:[#allocation3 + $0xa8] sm:$0xff] %v3592_v45 }
 0x4c6   : > { %3483 = vst [vmem:[#allocation3 + $0x68] sm:$0xff] %v3473_v12 }
 0x4c8   : > { %v3455_v43 = vpop.permute.xlu0 %3454 }
 0x4c9   : > { %v3231_v36 = vpop.permute.xlu1 %3230  ;;  %v3466_v21 = vrot.slane %v3455_v43, 4  ;;  %v3235_v34 = vpop.permute.xlu2 %3234 }
 0x4ca   : > { %v3243_v6 = vrot.slane %v3231_v36, 4  ;;  %v3245_v61 = vrot.slane %v3235_v34, 4 }
 0x4cb   : > { %v3474_v8 = vsel %vm765_vm10, %v3466_v21, %v3467_v11 }
 0x4cc   : > { %v3250_v29 = vsel %vm765_vm10, %v3242_v10, %v3243_v6  ;;  %v3475_v53 = vsel %vm1373_vm7, %v3455_v43, %v3474_v8  ;;  %v3699_v8 = vrot.slane %v6700_v59, 4 }
 0x4cd   : > { %v3251_v39 = vsel %vm969_vm11, %v3229_v33, %v3250_v29  ;;  %3484 = vst [vmem:[#allocation3 + $0x70] sm:$0xff] %v3475_v53 }
 0x4ce   : > { %3261 = vst [vmem:[#allocation3 + $0x28] sm:$0xff] %v3251_v39 }
 0x4d0   : > { %v3685_v30 = vpop.permute.xlu0 %3684 }
 0x4d1   : > { %v3796_v51 = vpop.permute.xlu1 %3795  ;;  %v3696_v57 = vrot.slane %v3685_v30, 4  ;;  %v3124_v24 = vpop.permute.xlu2 %3123 }
 0x4d2   : > { %v3807_v42 = vrot.slane %v3796_v51, 4  ;;  %v3134_v17 = vrot.slane %v3124_v24, 4 }
 0x4d3   : > { %v3704_v4 = vsel %vm765_vm10, %v3696_v57, %v3697_v44 }
 0x4d4   : > { %v3815_v38 = vsel %vm765_vm10, %v3807_v42, %v3808_v28  ;;  %v3705_v62 = vsel %vm1061_vm5, %v3685_v30, %v3704_v4  ;;  %v4969_v30 = vld [vmem:[#allocation3 + $0x70] sm:$0xf]  ;;  %v5172_v44 = vld [vmem:[#allocation3 + $0x74] sm:$0xf]  ;;  %v5171_v4 = vld [vmem:[#allocation3 + $0x64] sm:$0xf0] }
 0x4d5   : > { %v3816_v32 = vsel %vm859_vm3, %v3796_v51, %v3815_v38  ;;  %3714 = vst [vmem:[#allocation3 + $0xd0] sm:$0xff] %v3705_v62  ;;  %v4963_v38 = vld [vmem:[#allocation3 + $0x68] sm:$0xf0] }
 0x4d6   : > { %3825 = vst [vmem:[#allocation3 + $0xf0] sm:$0xff] %v3816_v32 }
 0x4d8   : > { %v3233_v54 = vpop.permute.xlu0 %3232 }
 0x4d9   : > { %v3346_v31 = vpop.permute.xlu1 %3345  ;;  %v3244_v19 = vrot.slane %v3233_v54, 4  ;;  %v3800_v50 = vpop.permute.xlu2 %3799 }
 0x4da   : > { %v3356_v1 = vrot.slane %v3346_v31, 4  ;;  %v3809_v18 = vrot.slane %v3800_v50, 4  ;;  %v5170_v31 = vld [vmem:[#allocation3 + $0x64] sm:$0xf] }
 0x4db   : > { %v3252_v49 = vsel %vm765_vm10, %v3244_v19, %v3245_v61  ;;  %v4961_v61 = vld [vmem:[#allocation3 + $0x60] sm:$0xf] }
 0x4dc   : > { %v3363_v40 = vsel %vm765_vm10, %v3355_v22, %v3356_v1  ;;  %v3253_v33 = vsel %vm969_vm11, %v3233_v54, %v3252_v49  ;;  %v3817_v48 = vsel %vm765_vm10, %v3809_v18, %v3810_v58  ;;  %v4962_v22 = vor.u32 %v5171_v4, %v4961_v61 }
 0x4dd   : > { %v3364_v2 = vsel %vm1171_vm9, %v3344_v60, %v3363_v40  ;;  %3262 = vst [vmem:[#allocation3 + $0x30] sm:$0xff] %v3253_v33  ;;  %v3818_v14 = vsel %vm859_vm3, %v3800_v50, %v3817_v48  ;;  %v5033_v46 = vld [vmem:[#allocation3 + $0xf0] sm:$0xf]  ;;  %v5025_v60 = vld [vmem:[#allocation3 + $0xe0] sm:$0xf]  ;;  %v4966_v1 = vor.u32 %v5170_v31, %v4963_v38 }
 0x4de   : > { %3373 = vst [vmem:[#allocation3 + $0x50] sm:$0xff] %v3364_v2  ;;  %v5026_v45 = vor.u32 %v5187_v5, %v5025_v60  ;;  %v5017_v48 = vld [vmem:[#allocation3 + $0xd0] sm:$0xf] }
 0x4df   : > { %3826 = vst [vmem:[#allocation3 + $0xf8] sm:$0xff] %v3818_v14 }
 0x4e0   : > { %v3122_v13 = vpop.permute.xlu0 %3121 }
 0x4e1   : > { %v3574_v41 = vpop.permute.xlu1 %3573  ;;  %v3133_v52 = vrot.slane %v3122_v13, 4  ;;  %v3350_v55 = vpop.permute.xlu2 %3349 }
 0x4e2   : > { %v3585_v16 = vrot.slane %v3574_v41, 4  ;;  %v3358_v10 = vrot.slane %v3350_v55, 4 }
 0x4e3   : > { %v3141_v23 = vsel %vm765_vm10, %v3133_v52, %v3134_v17  ;;  %v5009_v52 = vld [vmem:[#allocation3 + $0xc0] sm:$0xf] }
 0x4e4   : > { %v3593_v47 = vsel %vm765_vm10, %v3585_v16, %v3586_v15  ;;  %v3142_v35 = vsel %vm767_vm8, %v3122_v13, %v3141_v23  ;;  %v4947_v16 = vld [vmem:[#allocation3 + $0x48] sm:$0xf0] }
 0x4e5   : > { %v3594_v25 = vsel %vm1263_vm4, %v3574_v41, %v3593_v47  ;;  %3151 = vst [vmem:[#allocation3 + $0x10] sm:$0xff] %v3142_v35  ;;  %v4953_v50 = vld [vmem:[#allocation3 + $0x50] sm:$0xf]  ;;  %v5168_v18 = vld [vmem:[#allocation3 + $0x54] sm:$0xf] }
 0x4e6   : > { %3603 = vst [vmem:[#allocation3 + $0xb0] sm:$0xff] %v3594_v25  ;;  %v5189_v9 = vld [vmem:[#allocation3 + $0xf4] sm:$0xf0]  ;;  %v5167_v41 = vld [vmem:[#allocation3 + $0x44] sm:$0xf0] }
 0x4e7   : > { %v5034_v20 = vor.u32 %v5189_v9, %v5033_v46  ;;  %v4945_v47 = vld [vmem:[#allocation3 + $0x40] sm:$0xf]  ;;  %v5183_v35 = vld [vmem:[#allocation3 + $0xc4] sm:$0xf0] }
 0x4e8   : > { %v3461_v0 = vpop.permute.xlu0 %3460  ;;  %v4946_v9 = vor.u32 %v5167_v41, %v4945_v47  ;;  %v5035_v41 = vld [vmem:[#allocation3 + $0xf8] sm:$0xf0] }
 0x4e9   : > { %v3459_v63 = vpop.permute.xlu1 %3458  ;;  %v3469_v37 = vrot.slane %v3461_v0, 4  ;;  %4218 = vmatpush.bf16.msrb.mxu2 %v5034_v20  ;;  %v3578_v3 = vpop.permute.xlu2 %3577  ;;  %v5010_v20 = vor.u32 %v5183_v35, %v5009_v52  ;;  %v5166_v0 = vld [vmem:[#allocation3 + $0x44] sm:$0xf]  ;;  %v4889_v52 = vld [vmem:[%s7333_s7] sm:$0xf] }
 0x4ea   : > { %v3468_v56 = vrot.slane %v3459_v63, 4  ;;  %v3587_v7 = vrot.slane %v3578_v3, 4  ;;  %v4950_v5 = vor.u32 %v5166_v0, %v4947_v16  ;;  %v5188_v0 = vld [vmem:[#allocation3 + $0xf4] sm:$0xf] }
 0x4ec   : > { %v3476_v12 = vsel %vm765_vm10, %v3468_v56, %v3469_v37  ;;  %v3595_v11 = vsel %vm765_vm10, %v3587_v7, %v3588_v26  ;;  %v4937_v56 = vld [vmem:[#allocation3 + $0x30] sm:$0xf]  ;;  %v5160_v61 = vld [vmem:[#allocation3 + $0x14] sm:$0xf] }
 0x4ed   : > { %v3477_v43 = vsel %vm1373_vm7, %v3459_v63, %v3476_v12  ;;  %4219 = vmatpush.bf16.msrb.mxu2 %v5026_v45  ;;  %v3596_v36 = vsel %vm1263_vm4, %v3578_v3, %v3595_v11  ;;  %v5164_v3 = vld [vmem:[#allocation3 + $0x34] sm:$0xf]  ;;  %v5001_v7 = vld [vmem:[#allocation3 + $0xb0] sm:$0xf] }
 0x4ee   : > { %3485 = vst [vmem:[#allocation3 + $0x78] sm:$0xff] %v3477_v43 }
 0x4ef   : > { %3604 = vst [vmem:[#allocation3 + $0xb8] sm:$0xff] %v3596_v36  ;;  %v5163_v36 = vld [vmem:[#allocation3 + $0x24] sm:$0xf0] }
 0x4f0   : > { %v3348_v21 = vpop.permute.xlu0 %3347 }
 0x4f1   : > { %v3689_v6 = vpop.permute.xlu1 %3688  ;;  %v3357_v34 = vrot.slane %v3348_v21, 4  ;;  %v7211_v62 = vpop.permute.xlu2 %3113 }
 0x4f2   : > { %v3698_v27 = vrot.slane %v3689_v6, 4 }
 0x4f3   : > { %v3365_v29 = vsel %vm765_vm10, %v3357_v34, %v3358_v10 }
 0x4f4   : > { %v3706_v53 = vsel %vm765_vm10, %v3698_v27, %v3699_v8  ;;  %v3366_v39 = vsel %vm1171_vm9, %v3348_v21, %v3365_v29  ;;  %v5179_v21 = vld [vmem:[#allocation3 + $0xa4] sm:$0xf0]  ;;  %v4929_v29 = vld [vmem:[#allocation3 + $0x20] sm:$0xf] }
 0x4f5   : > { %v3707_v51 = vsel %vm1061_vm5, %v3689_v6, %v3706_v53  ;;  %3374 = vst [vmem:[#allocation3 + $0x58] sm:$0xff] %v3366_v39  ;;  %v5173_v57 = vld [vmem:[#allocation3 + $0x74] sm:$0xf0]  ;;  %v4971_v28 = vld [vmem:[#allocation3 + $0x78] sm:$0xf0]  ;;  %v3129_v39 = vrot.slane %v7211_v62, 4 }
 0x4f6   : > { %3715 = vst [vmem:[#allocation3 + $0xd8] sm:$0xff] %v3707_v51  ;;  %v4970_v42 = vor.u32 %v5173_v57, %v4969_v30  ;;  %v4974_v24 = vor.u32 %v5172_v44, %v4971_v28  ;;  %v5181_v63 = vld [vmem:[#allocation3 + $0xb4] sm:$0xf0]  ;;  %v4931_v6 = vld [vmem:[#allocation3 + $0x28] sm:$0xf0]  ;;  %v4930_v44 = vor.u32 %v5163_v36, %v4929_v29 }
 0x4f7   : > { %v5002_v43 = vor.u32 %v5181_v63, %v5001_v7  ;;  %v4993_v53 = vld [vmem:[#allocation3 + $0xa0] sm:$0xf]  ;;  %v5162_v57 = vld [vmem:[#allocation3 + $0x24] sm:$0xf] }
 0x4f8   : > { %4199 = vmatpush.bf16.msrb.mxu1 %v4970_v42  ;;  %4256 = vmatpush.bf16.msra.mxu0 %v4974_v24  ;;  %v3239_v59 = vpop.permute.xlu0 %3238  ;;  %v4994_v51 = vor.u32 %v5179_v21, %v4993_v53  ;;  %v4934_v42 = vor.u32 %v5162_v57, %v4931_v6  ;;  %v5177_v24 = vld [vmem:[#allocation3 + $0x94] sm:$0xf0]  ;;  %v5182_v29 = vld [vmem:[#allocation3 + $0xc4] sm:$0xf]  ;;  %v5155_v53 = vld [vmem:[%s7333_s7 + $0x1c] sm:$0xf] }
 0x4f9   : > { %v3237_v32 = vpop.permute.xlu1 %3236  ;;  %v3247_v54 = vrot.slane %v3239_v59, 4  ;;  %v3120_v46 = vpop.permute.xlu2 %3119  ;;  %v5011_v57 = vld [vmem:[#allocation3 + $0xc8] sm:$0xf0] }
 0x4fa   : > { %v3246_v19 = vrot.slane %v3237_v32, 4  ;;  %v3132_v34 = vrot.slane %v3120_v46, 4 }
 0x4fc   : > { %v3254_v58 = vsel %vm765_vm10, %v3246_v19, %v3247_v54  ;;  %4200 = vmatpush.bf16.msrb.mxu1 %v4962_v22  ;;  %4257 = vmatpush.bf16.msra.mxu0 %v4966_v1  ;;  %v5169_v49 = vld [vmem:[#allocation3 + $0x54] sm:$0xf0]  ;;  %v4955_v40 = vld [vmem:[#allocation3 + $0x58] sm:$0xf0]  ;;  %v4985_v54 = vld [vmem:[#allocation3 + $0x90] sm:$0xf] }
 0x4fd   : > { %v3255_v33 = vsel %vm969_vm11, %v3237_v32, %v3254_v58  ;;  %v4954_v2 = vor.u32 %v5169_v49, %v4953_v50  ;;  %v5185_v14 = vld [vmem:[#allocation3 + $0xd4] sm:$0xf0]  ;;  %v4958_v13 = vor.u32 %v5168_v18, %v4955_v40  ;;  %v4921_v32 = vld [vmem:[#allocation3 + $0x10] sm:$0xf]  ;;  %v4986_v50 = vor.u32 %v5177_v24, %v4985_v54  ;;  %v5175_v49 = vld [vmem:[#allocation3 + $0x84] sm:$0xf0] }
 0x4fe   : > { %3263 = vst [vmem:[#allocation3 + $0x38] sm:$0xff] %v3255_v33  ;;  %v5018_v17 = vor.u32 %v5185_v14, %v5017_v48  ;;  %v5152_v40 = vld [vmem:[%s7333_s7 + $0x4] sm:$0xf]  ;;  %v4977_v48 = vld [vmem:[#allocation3 + $0x80] sm:$0xf] }
 0x4ff   : > { %v5003_v24 = vld [vmem:[#allocation3 + $0xb8] sm:$0xf0] }
 0x500   : > { %4201 = vmatpush.bf16.msrb.mxu1 %v4954_v2  ;;  %4220 = vmatpush.bf16.msrb.mxu2 %v5018_v17  ;;  %v3128_v15 = vpop.permute.xlu0 %3127 }
 0x501   : > { %4258 = vmatpush.bf16.msra.mxu0 %v4958_v13  ;;  %v3126_v55 = vpop.permute.xlu1 %3125  ;;  %v3136_v23 = vrot.slane %v3128_v15, 4  ;;  %v7221_v59 = vpop.permute.xlu2 %3910  ;;  %v4978_v13 = vor.u32 %v5175_v49, %v4977_v48  ;;  %v4897_v48 = vld [vmem:[%s7333_s7 + $0x8] sm:$0xf] }
 0x502   : > { %v3135_v25 = vrot.slane %v3126_v55, 4  ;;  %v3920_v7 = vrot.slane %v7221_v59, 4 }
 0x504   : > { %v3143_v37 = vsel %vm765_vm10, %v3135_v25, %v3136_v23  ;;  %4202 = vmatpush.bf16.msrb.mxu1 %v4946_v9  ;;  %4221 = vmatpush.bf16.msrb.mxu2 %v5010_v20  ;;  %v5153_v23 = vld [vmem:[%s7333_s7 + $0x8] sm:$0xf0] }
 0x505   : > { %v3144_v60 = vsel %vm767_vm8, %v3126_v55, %v3143_v37  ;;  %4259 = vmatpush.bf16.msra.mxu0 %v4950_v5  ;;  %v5165_v26 = vld [vmem:[#allocation3 + $0x34] sm:$0xf0]  ;;  %v4939_v45 = vld [vmem:[#allocation3 + $0x38] sm:$0xf0]  ;;  %v5038_v5 = vor.u32 %v5188_v0, %v5035_v41  ;;  %v4890_v63 = vor.u32 %v5153_v23, %v4889_v52 }
 0x506   : > { %3152 = vst [vmem:[#allocation3 + $0x18] sm:$0xff] %v3144_v60  ;;  %v4938_v12 = vor.u32 %v5165_v26, %v4937_v56  ;;  %v4942_v11 = vor.u32 %v5164_v3, %v4939_v45  ;;  %v5027_v56 = vld [vmem:[#allocation3 + $0xe8] sm:$0xf0] }
 0x508   : > { %4203 = vmatpush.bf16.msrb.mxu1 %v4938_v12  ;;  %4222 = vmatpush.bf16.msrb.mxu2 %v5002_v43  ;;  %v3118_v10 = vpop.permute.xlu0 %3117  ;;  %v5186_v12 = vld [vmem:[#allocation3 + $0xe4] sm:$0xf] }
 0x509   : > { %4260 = vmatpush.bf16.msra.mxu0 %v4942_v11  ;;  %v3116_v8 = vpop.permute.xlu1 %3115  ;;  %v3131_v27 = vrot.slane %v3118_v10, 4  ;;  %v3901_v46 = vpop.permute.xlu2 %3900  ;;  %v5030_v11 = vor.u32 %v5186_v12, %v5027_v56 }
 0x50a   : > { %v3130_v30 = vrot.slane %v3116_v8, 4  ;;  %v3915_v3 = vrot.slane %v3901_v46, 4 }
 0x50b   : > { %v3139_v28 = vsel %vm765_vm10, %v3131_v27, %v3132_v34  ;;  %v5184_v34 = vld [vmem:[#allocation3 + $0xd4] sm:$0xf] }
 0x50c   : > { %v3137_v4 = vsel %vm765_vm10, %v3129_v39, %v3130_v30  ;;  %v3140_v38 = vsel %vm767_vm8, %v3118_v10, %v3139_v28  ;;  %4204 = vmatpush.bf16.msrb.mxu1 %v4930_v44  ;;  %4223 = vmatpush.bf16.msrb.mxu2 %v4994_v51  ;;  %v5019_v10 = vld [vmem:[#allocation3 + $0xd8] sm:$0xf0]  ;;  %v4903_v39 = vld [vmem:[%s7333_s7 + $0x24] sm:$0xf0]  ;;  %v5014_v28 = vor.u32 %v5182_v29, %v5011_v57 }
 0x50d   : > { %v3138_v31 = vsel %vm767_vm8, %v7211_v62, %v3137_v4  ;;  %3150 = vst [vmem:[#allocation3 + $0x8] sm:$0xff] %v3140_v38  ;;  %4261 = vmatpush.bf16.msra.mxu0 %v4934_v42  ;;  %v5161_v19 = vld [vmem:[#allocation3 + $0x14] sm:$0xf0]  ;;  %v4923_v22 = vld [vmem:[#allocation3 + $0x18] sm:$0xf0]  ;;  %v5022_v8 = vor.u32 %v5184_v34, %v5019_v10  ;;  %v4906_v42 = vor.u32 %v5155_v53, %v4903_v39 }
 0x50e   : > { %3149 = vst [vmem:[#allocation3] sm:$0xff] %v3138_v31  ;;  %v4922_v1 = vor.u32 %v5161_v19, %v4921_v32  ;;  %v4926_v58 = vor.u32 %v5160_v61, %v4923_v22  ;;  %v4891_v62 = vld [vmem:[%s7333_s7 + $0xc] sm:$0xf0]  ;;  %v5156_v32 = vld [vmem:[%s7333_s7 + $0x20] sm:$0xf0] }
 0x50f   : > { %v7231_v17 = vor.u32 %v5152_v40, %v4891_v62  ;;  %v5178_v40 = vld [vmem:[#allocation3 + $0xa4] sm:$0xf] }
 0x510   : > { %4205 = vmatpush.bf16.msrb.mxu1 %v4922_v1  ;;  %4224 = vmatpush.bf16.msrb.mxu2 %v4986_v50  ;;  %v3909_v18 = vpop.permute.xlu0 %3908  ;;  %v5180_v50 = vld [vmem:[#allocation3 + $0xb4] sm:$0xf] }
 0x511   : > { %4262 = vmatpush.bf16.msra.mxu0 %v4926_v58  ;;  %v3907_v33 = vpop.permute.xlu1 %3906  ;;  %v3919_v2 = vrot.slane %v3909_v18, 4  ;;  %v5006_v58 = vor.u32 %v5180_v50, %v5003_v24  ;;  %v4995_v18 = vld [vmem:[#allocation3 + $0xa8] sm:$0xf0] }
 0x512   : > { %v3918_v14 = vrot.slane %v3907_v33, 4  ;;  %v4998_v62 = vor.u32 %v5178_v40, %v4995_v18 }
 0x514   : > { %v3926_v15 = vsel %vm765_vm10, %v3918_v14, %v3919_v2  ;;  %4225 = vmatpush.bf16.msrb.mxu2 %v4978_v13  ;;  %v5159_v16 = vld [vmem:[#allocation3 + $0x4] sm:$0xf0]  ;;  %v4915_v55 = vld [vmem:[#allocation3 + $0x8] sm:$0xf0] }
 0x515   : > { %v3927_v47 = vsel %vm656_vm2, %v3907_v33, %v3926_v15  ;;  %v4913_v35 = vld [vmem:[#allocation3] sm:$0xf]  ;;  %v5158_v25 = vld [vmem:[#allocation3 + $0x4] sm:$0xf]  ;;  %v4987_v33 = vld [vmem:[#allocation3 + $0x98] sm:$0xf0] }
 0x516   : > { %3936 = vst [vmem:[#allocation3 + $0x110] sm:$0xff] %v3927_v47  ;;  %v4914_v9 = vor.u32 %v5159_v16, %v4913_v35  ;;  %v4918_v20 = vor.u32 %v5158_v25, %v4915_v55  ;;  %v5154_v14 = vld [vmem:[%s7333_s7 + $0x10] sm:$0xf0]  ;;  %v5176_v55 = vld [vmem:[#allocation3 + $0x94] sm:$0xf] }
 0x517   : > { %4226 = vmatmul.bf16.vlgmr.msrb.gmra.mxu2 %v7231_v17  ;;  %v4990_v23 = vor.u32 %v5176_v55, %v4987_v33  ;;  %v4898_v47 = vor.u32 %v5154_v14, %v4897_v48  ;;  %v4979_v35 = vld [vmem:[#allocation3 + $0x88] sm:$0xf0]  ;;  %v5174_v25 = vld [vmem:[#allocation3 + $0x84] sm:$0xf] }
 0x518   : > { %4206 = vmatpush.bf16.msrb.mxu1 %v4914_v9  ;;  %4263 = vmatpush.bf16.msra.mxu0 %v4918_v20  ;;  %v3899_v37 = vpop.permute.xlu0 %3898  ;;  %v4982_v46 = vor.u32 %v5174_v25, %v4979_v35  ;;  %v4909_v9 = vld [vmem:[%s7333_s7 + $0x20] sm:$0xf]  ;;  %v5157_v20 = vld [vmem:[%s7333_s7 + $0x28] sm:$0xf0] }
 0x519   : > { %v3913_v60 = vpop.permute.xlu1 %3912  ;;  %v3914_v26 = vrot.slane %v3899_v37, 4  ;;  %v4910_v0 = vor.u32 %v5157_v20, %v4909_v9 }
 0x51a   : > { %v3921_v45 = vrot.slane %v3913_v60, 4 }
 0x51b   : > { %v3922_v43 = vsel %vm765_vm10, %v3914_v26, %v3915_v3  ;;  %4207 = vmatmul.bf16.vlgmr.msrb.gmra.mxu1 %v4890_v63  ;;  %4264 = vmatmul.bf16.vlgmr.msra.gmra.mxu0 %v4890_v63 }
 0x51c   : > { %4275 = vmatpush.bf16.msra.mxu1 %v5038_v5  ;;  %v3928_v36 = vsel %vm765_vm10, %v3920_v7, %v3921_v45  ;;  %v3923_v21 = vsel %vm656_vm2, %v3899_v37, %v3922_v43 }
 0x51d   : > { %v3929_v6 = vsel %vm656_vm2, %v7221_v59, %v3928_v36  ;;  %3934 = vst [vmem:[#allocation3 + $0x100] sm:$0xff] %v3923_v21  ;;  %v5049_v38 = vld [vmem:[#allocation3 + $0x110] sm:$0xf]  ;;  %v5192_v31 = vld [vmem:[#allocation3 + $0x114] sm:$0xf] }
 0x51e   : > { %3937 = vst [vmem:[#allocation3 + $0x118] sm:$0xff] %v3929_v6  ;;  %v4901_v59 = vld [vmem:[%s7333_s7 + $0x18] sm:$0xf] }
 0x51f   : > { %v4902_v49 = vor.u32 %v5156_v32, %v4901_v59 }
 0x520   : > { %4276 = vmatpush.bf16.msra.mxu1 %v5030_v11  ;;  %v3905_v27 = vpop.permute.xlu0 %3904 }
 0x521   : > { %v3903_v30 = vpop.permute.xlu1 %3902  ;;  %v3917_v44 = vrot.slane %v3905_v27, 4 }
 0x522   : > { %v3916_v51 = vrot.slane %v3903_v30, 4 }
 0x524   : > { %4277 = vmatpush.bf16.msra.mxu1 %v5022_v8  ;;  %v3924_v4 = vsel %vm765_vm10, %v3916_v51, %v3917_v44  ;;  %v5041_v2 = vld [vmem:[#allocation3 + $0x100] sm:$0xf]  ;;  %v5190_v41 = vld [vmem:[#allocation3 + $0x104] sm:$0xf] }
 0x525   : > { %v3925_v54 = vsel %vm656_vm2, %v3903_v30, %v3924_v4  ;;  %v5193_v61 = vld [vmem:[#allocation3 + $0x114] sm:$0xf0]  ;;  %v5051_v19 = vld [vmem:[#allocation3 + $0x118] sm:$0xf0]  ;;  %vm4192_vm2 = vcmask 261120  }
 0x526   : > { %3935 = vst [vmem:[#allocation3 + $0x108] sm:$0xff] %v3925_v54  ;;  %v5050_v22 = vor.u32 %v5193_v61, %v5049_v38  ;;  %v5054_v1 = vor.u32 %v5192_v31, %v5051_v19 }
 0x527   : > { %4231 = vmatmul.bf16.gmra.mxu2 %v4906_v42 }
 0x528   : > { %4278 = vmatpush.bf16.msra.mxu1 %v5014_v28  ;;  %4243 = vmatpush.bf16.msrb.mxu3 %v5050_v22 }
 0x529   : > { %4300 = vmatpush.bf16.msra.mxu2 %v5054_v1 }
 0x52b   : > { %4212 = vmatmul.bf16.gmra.mxu1 %v4902_v49  ;;  %4269 = vmatmul.bf16.gmra.mxu0 %v4902_v49 }
 0x52c   : > { %4279 = vmatpush.bf16.msra.mxu1 %v5006_v58 }
 0x52d   : > { %v5191_v13 = vld [vmem:[#allocation3 + $0x104] sm:$0xf0]  ;;  %v5043_v52 = vld [vmem:[#allocation3 + $0x108] sm:$0xf0] }
 0x52e   : > { %v5042_v15 = vor.u32 %v5191_v13, %v5041_v2  ;;  %v5046_v16 = vor.u32 %v5190_v41, %v5043_v52 }
 0x530   : > { %4280 = vmatpush.bf16.msra.mxu1 %v4998_v62  ;;  %4244 = vmatpush.bf16.msrb.mxu3 %v5042_v15  ;;  %v7368_v62 = vld [vmem:[#allocation10_spill] sm:$0xff] }
 0x531   : > { %4301 = vmatpush.bf16.msra.mxu2 %v5046_v16 }
 0x533   : > { %5055 = vmatmul.msk.bf16.vlgmr.msrb.gmra.mxu3 %vm4192_vm2, %v4898_v47 }
 0x534   : > { %4281 = vmatpush.bf16.msra.mxu1 %v4990_v23 }
 0x537   : > { %5057 = vmatmul.msk.bf16.vlgmr.msra.gmra.mxu2 %vm4192_vm2, %v4898_v47 }
 0x538   : > { %4282 = vmatpush.bf16.msra.mxu1 %v4982_v46 }
 0x53b   : > { %4283 = vmatmul.bf16.vlgmr.msra.gmra.mxu1 %v7231_v17 }
 0x543   : > { %5056 = vmatmul.msk.bf16.gmra.mxu3 %vm4192_vm2, %v4910_v0 }
 0x547   : > { %5058 = vmatmul.msk.bf16.gmra.mxu2 %vm4192_vm2, %v4910_v0 }
 0x54b   : > { %4288 = vmatmul.bf16.gmra.mxu1 %v4906_v42 }
 0x598   : > { %v4208_v5 = vpop.f32.mrf.mxu1  ;;  %v4265_v17 = vpop.f32.mrf.mxu0 }
 0x59a   : > { %v4227_v63 = vpop.f32.mrf.mxu2 }
 0x59b   : > { %v4228_v43 = vadd.f32 %v4227_v63, %v4208_v5 }
 0x5a0   : > { %v4210_v37 = vpop.f32.mrf.mxu1  ;;  %v4267_v6 = vpop.f32.mrf.mxu0 }
 0x5a2   : > { %v4229_v56 = vpop.f32.mrf.mxu2 }
 0x5a3   : > { %v4230_v29 = vadd.f32 %v4229_v56, %v4210_v37 }
 0x5a8   : > { %v4213_v3 = vpop.f32.mrf.mxu1  ;;  %v4270_v57 = vpop.f32.mrf.mxu0 }
 0x5aa   : > { %v4232_v60 = vpop.f32.mrf.mxu2 }
 0x5ab   : > { %v4233_v24 = vadd.f32 %v4232_v60, %v4213_v3 }
 0x5b0   : > { %v4215_v26 = vpop.f32.mrf.mxu1  ;;  %v4272_v61 = vpop.f32.mrf.mxu0 }
 0x5b2   : > { %v4234_v7 = vpop.f32.mrf.mxu2 }
 0x5b3   : > { %v4235_v22 = vadd.f32 %v4234_v7, %v4215_v26 }
 0x5b6   : > { %v4246_v45 = vpop.f32.mrf.mxu3 }
 0x5b7   : > { %v4247_v21 = vadd.f32 %v4246_v45, %v4228_v43 }
 0x5b8   : > { %v4284_v12 = vpop.f32.mrf.mxu1 }
 0x5b9   : > { %v4285_v11 = vadd.f32 %v4284_v12, %v4265_v17 }
 0x5ba   : > { %v4303_v36 = vpop.f32.mrf.mxu2 }
 0x5bb   : > { %v4304_v10 = vadd.f32 %v4303_v36, %v4285_v11 }
 0x5bd   : > { %v4313_v34 = vadd.f32 %v4304_v10, %v4247_v21 }
 0x5be   : > { %v4248_v8 = vpop.f32.mrf.mxu3 }
 0x5bf   : > { %4314 = vadd.xlane.f32.xlu2 %v4313_v34  ;;  %v4249_v30 = vadd.f32 %v4248_v8, %v4230_v29 }
 0x5c0   : > { %v4286_v27 = vpop.f32.mrf.mxu1 }
 0x5c1   : > { %v4287_v53 = vadd.f32 %v4286_v27, %v4267_v6 }
 0x5c2   : > { %v4305_v39 = vpop.f32.mrf.mxu2 }
 0x5c3   : > { %v4306_v44 = vadd.f32 %v4305_v39, %v4287_v53 }
 0x5c5   : > { %v4316_v51 = vadd.f32 %v4306_v44, %v4249_v30 }
 0x5c6   : > { %v4251_v28 = vpop.f32.mrf.mxu3 }
 0x5c7   : > { %4317 = vadd.xlane.f32.xlu1 %v4316_v51  ;;  %v4252_v59 = vadd.f32 %v4251_v28, %v4233_v24 }
 0x5c8   : > { %v4289_v42 = vpop.f32.mrf.mxu1 }
 0x5c9   : > { %v4290_v4 = vadd.f32 %v4289_v42, %v4270_v57 }
 0x5ca   : > { %v4308_v38 = vpop.f32.mrf.mxu2 }
 0x5cb   : > { %v4309_v32 = vadd.f32 %v4308_v38, %v4290_v4 }
 0x5cd   : > { %v4319_v54 = vadd.f32 %v4309_v32, %v4252_v59 }
 0x5ce   : > { %v4253_v31 = vpop.f32.mrf.mxu3 }
 0x5cf   : > { %4320 = vadd.xlane.f32.xlu0 %v4319_v54  ;;  %v4254_v58 = vadd.f32 %v4253_v31, %v4235_v22 }
 0x5d0   : > { %v4291_v19 = vpop.f32.mrf.mxu1 }
 0x5d1   : > { %v4292_v1 = vadd.f32 %v4291_v19, %v4272_v61 }
 0x5d2   : > { %v4310_v50 = vpop.f32.mrf.mxu2 }
 0x5d3   : > { %v4311_v49 = vadd.f32 %v4310_v50, %v4292_v1 }
 0x5d5   : > { %v4322_v18 = vadd.f32 %v4311_v49, %v4254_v58 }
 0x5d7   : > { %4323 = vadd.xlane.f32.xlu2 %v4322_v18 }
 0x632   : > { %v4315_v40 = vpop.xlane.xlu2 %4314 }
 0x633   : > { %v4325_v33 = vmul.f32 %v4315_v40, %v7368_v62 }
 0x635   : > { %v4329_v2 = vsub.f32 %v4247_v21, %v4325_v33  ;;  %v4330_v48 = vsub.f32 %v4304_v10, %v4325_v33 }
 0x637   : > { %v4337_v14 = vmul.f32 %v4329_v2, %v4329_v2  ;;  %v4338_v13 = vmul.f32 %v4330_v48, %v4330_v48 }
 0x639   : > { %v4345_v41 = vadd.f32 %v4338_v13, %v4337_v14 }
 0x63a   : > { %v4318_v52 = vpop.xlane.xlu1 %4317 }
 0x63b   : > { %v4326_v15 = vmul.f32 %v4318_v52, %v7368_v62  ;;  %4346 = vadd.xlane.f32.xlu1 %v4345_v41 }
 0x63d   : > { %v7277_v16 = vsub.f32 %v4249_v30, %v4326_v15  ;;  %v7279_v55 = vsub.f32 %v4306_v44, %v4326_v15 }
 0x63f   : > { %v4339_v23 = vmul.f32 %v7277_v16, %v7277_v16  ;;  %v4340_v47 = vmul.f32 %v7279_v55, %v7279_v55 }
 0x641   : > { %v4348_v35 = vadd.f32 %v4340_v47, %v4339_v23 }
 0x642   : > { %v4321_v25 = vpop.xlane.xlu0 %4320 }
 0x643   : > { %v4327_v46 = vmul.f32 %v4321_v25, %v7368_v62  ;;  %4349 = vadd.xlane.f32.xlu0 %v4348_v35 }
 0x645   : > { %v7286_v9 = vsub.f32 %v4252_v59, %v4327_v46  ;;  %v7288_v20 = vsub.f32 %v4309_v32, %v4327_v46 }
 0x647   : > { %v4341_v0 = vmul.f32 %v7286_v9, %v7286_v9  ;;  %v4342_v5 = vmul.f32 %v7288_v20, %v7288_v20 }
 0x649   : > { %v4351_v63 = vadd.f32 %v4342_v5, %v4341_v0 }
 0x64a   : > { %v4324_v37 = vpop.xlane.xlu2 %4323 }
 0x64b   : > { %v4328_v56 = vmul.f32 %v4324_v37, %v7368_v62  ;;  %4352 = vadd.xlane.f32.xlu2 %v4351_v63 }
 0x64d   : > { %v7295_v3 = vsub.f32 %v4254_v58, %v4328_v56  ;;  %v7297_v60 = vsub.f32 %v4311_v49, %v4328_v56 }
 0x64f   : > { %v4343_v26 = vmul.f32 %v7295_v3, %v7295_v3  ;;  %v4344_v17 = vmul.f32 %v7297_v60, %v7297_v60 }
 0x651   : > { %v4354_v7 = vadd.f32 %v4344_v17, %v4343_v26 }
 0x653   : > { %4355 = vadd.xlane.f32.xlu1 %v4354_v7 }
 0x6ae   : > { %v4347_v45 = vpop.xlane.xlu1 %4346 }
 0x6af   : > { %v4357_v12 = vmul.f32 %v4347_v45, %v7368_v62 }
 0x6b1   : > { %v4361_v43 = vadd.f32 1e-05, %v4357_v12 }
 0x6b3   : > { %5304 = vrsqrt.f32 %v4361_v43  ;;  %vm4371_vm4 = vweird.f32 %v4361_v43 }
 0x6b6   : > { %v4350_v11 = vpop.xlane.xlu0 %4349 }
 0x6b7   : > { %v4358_v36 = vmul.f32 %v4350_v11, %v7368_v62 }
 0x6b9   : > { %v5305_v21 = vpop.eup %5304  ;;  %v4362_v10 = vadd.f32 1e-05, %v4358_v36 }
 0x6ba   : > { %v4366_v6 = vmul.f32 %v5305_v21, %v4361_v43  ;;  %vm4372_vm3 = vweird.f32 %v5305_v21 }
 0x6bb   : > { %5306 = vrsqrt.f32 %v4362_v10  ;;  %vm4373_vm5 = vmor %vm4371_vm4, %vm4372_vm3  ;;  %vm4381_vm8 = vweird.f32 %v4362_v10 }
 0x6bc   : > { %v4367_v34 = vmul.f32 %v5305_v21, %v4366_v6 }
 0x6be   : > { %v4368_v8 = vmul.f32 0.5, %v4367_v34  ;;  %v4353_v27 = vpop.xlane.xlu2 %4352 }
 0x6bf   : > { %v4359_v29 = vmul.f32 %v4353_v27, %v7368_v62 }
 0x6c0   : > { %v4369_v53 = vsub.f32 1.5, %v4368_v8 }
 0x6c1   : > { %v5307_v39 = vpop.eup %5306  ;;  %v4363_v30 = vadd.f32 1e-05, %v4359_v29 }
 0x6c2   : > { %v4370_v44 = vmul.f32 %v5305_v21, %v4369_v53  ;;  %v4376_v51 = vmul.f32 %v5307_v39, %v4362_v10  ;;  %vm4382_vm7 = vweird.f32 %v5307_v39 }
 0x6c3   : > { %5308 = vrsqrt.f32 %v4363_v30  ;;  %vm4383_vm9 = vmor %vm4381_vm8, %vm4382_vm7  ;;  %vm4391_vm11 = vweird.f32 %v4363_v30 }
 0x6c4   : > { %v4374_v57 = vsel %vm4373_vm5, %v5305_v21, %v4370_v44  ;;  %v4377_v28 = vmul.f32 %v5307_v39, %v4376_v51 }
 0x6c5   : > { %v4405_v42 = vmul.f32 %v4374_v57, %v4329_v2  ;;  %v4406_v24 = vmul.f32 %v4374_v57, %v4330_v48 }
 0x6c6   : > { %v4378_v4 = vmul.f32 0.5, %v4377_v28  ;;  %v4356_v38 = vpop.xlane.xlu1 %4355 }
 0x6c7   : > { %v4413_v59 = vmax.f32 %v4405_v42, 0.0  ;;  %v4414_v32 = vmax.f32 %v4406_v24, 0.0  ;;  %v4360_v54 = vmul.f32 %v4356_v38, %v7368_v62 }
 0x6c8   : > { %v4379_v61 = vsub.f32 1.5, %v4378_v4 }
 0x6c9   : > { %v5309_v31 = vpop.eup %5308  ;;  %v4421_v19 = vpack.c.bf16 %v4414_v32, %v4413_v59  ;;  %v4364_v22 = vadd.f32 1e-05, %v4360_v54 }
 0x6ca   : > { %v4380_v1 = vmul.f32 %v5307_v39, %v4379_v61  ;;  %v4386_v50 = vmul.f32 %v5309_v31, %v4363_v30  ;;  %vm4392_vm10 = vweird.f32 %v5309_v31 }
 0x6cb   : > { %4425 = vst [vmem:[%s7311_s20] sm:$0xff] %v4421_v19  ;;  %5310 = vrsqrt.f32 %v4364_v22  ;;  %vm4393_vm6 = vmor %vm4391_vm11, %vm4392_vm10  ;;  %vm4401_vm13 = vweird.f32 %v4364_v22 }
 0x6cc   : > { %v4384_v58 = vsel %vm4383_vm9, %v5307_v39, %v4380_v1  ;;  %v4387_v49 = vmul.f32 %v5309_v31, %v4386_v50 }
 0x6cd   : > { %v4407_v18 = vmul.f32 %v4384_v58, %v7277_v16  ;;  %v4408_v40 = vmul.f32 %v4384_v58, %v7279_v55 }
 0x6ce   : > { %v4388_v62 = vmul.f32 0.5, %v4387_v49 }
 0x6cf   : > { %v4415_v33 = vmax.f32 %v4407_v18, 0.0  ;;  %v4416_v2 = vmax.f32 %v4408_v40, 0.0 }
 0x6d0   : > { %v4389_v48 = vsub.f32 1.5, %v4388_v62 }
 0x6d1   : > { %v5311_v14 = vpop.eup %5310  ;;  %v4422_v13 = vpack.c.bf16 %v4416_v2, %v4415_v33 }
 0x6d2   : > { %v4390_v41 = vmul.f32 %v5309_v31, %v4389_v48  ;;  %v4396_v52 = vmul.f32 %v5311_v14, %v4364_v22  ;;  %vm4402_vm12 = vweird.f32 %v5311_v14 }
 0x6d3   : > { %4426 = vst [vmem:[%s7311_s20 + $0x8] sm:$0xff] %v4422_v13  ;;  %vm4403_vm14 = vmor %vm4401_vm13, %vm4402_vm12 }
 0x6d4   : > { %v4394_v15 = vsel %vm4393_vm6, %v5309_v31, %v4390_v41  ;;  %v4397_v23 = vmul.f32 %v5311_v14, %v4396_v52 }
 0x6d5   : > { %v4409_v47 = vmul.f32 %v4394_v15, %v7286_v9  ;;  %v4410_v16 = vmul.f32 %v4394_v15, %v7288_v20 }
 0x6d6   : > { %v4398_v55 = vmul.f32 0.5, %v4397_v23 }
 0x6d7   : > { %v4417_v35 = vmax.f32 %v4409_v47, 0.0  ;;  %v4418_v25 = vmax.f32 %v4410_v16, 0.0 }
 0x6d8   : > { %v4399_v46 = vsub.f32 1.5, %v4398_v55 }
 0x6d9   : > { %v4423_v0 = vpack.c.bf16 %v4418_v25, %v4417_v35 }
 0x6da   : > { %v4400_v5 = vmul.f32 %v5311_v14, %v4399_v46 }
 0x6db   : > { %4427 = vst [vmem:[%s7311_s20 + $0x10] sm:$0xff] %v4423_v0 }
 0x6dc   : > { %v4404_v63 = vsel %vm4403_vm14, %v5311_v14, %v4400_v5 }
 0x6dd   : > { %v4411_v37 = vmul.f32 %v4404_v63, %v7295_v3  ;;  %v4412_v56 = vmul.f32 %v4404_v63, %v7297_v60 }
 0x6df   : > { %v4419_v26 = vmax.f32 %v4411_v37, 0.0  ;;  %v4420_v9 = vmax.f32 %v4412_v56, 0.0 }
 0x6e1   : > { %v4424_v17 = vpack.c.bf16 %v4420_v9, %v4419_v26 }
 0x6e3   : > { %4428 = vst [vmem:[%s7311_s20 + $0x18] sm:$0xff] %v4424_v17 }
 0x6e4 PF: > { %s20_s13 = sadd.s32 1, %s5318_s13  }
 0x6e5   : > { %p17_p4 = scmp.ge.s32.totalorder %s20_s13, 4  }
 0x6e7   :  { %19 = sbr.rel (!%p17_p4) target bundleno = 1 (0x1), region = 100 }

</bundles_post_ra>
